<compile_context>
chip_gen: v5e
topology: v5e:2x2
jax: 0.10.0
libtpu: 0.0.40
codegen_flags: <defaults>
</compile_context>

<pallas_src>
import jax
import jax.numpy as jnp
from jax.experimental import pallas as pl
from jax.experimental.pallas import tpu as pltpu

# Padded hidden sizes (multiples of 128). Real sizes are 2000 / 500 / 10.
H1, H2, H3 = 2048, 512, 128

TM = 256                 # row tile for the batched grid path (128 may suit v5e better)
SMALL_BATCH_MAX = 1024   # below this, a single un-gridded invocation is cheaper


def linear3l_kernel(x_ref, w0_ref, p0_ref, w1_ref, p1_ref, w2_ref, p2_ref, o_ref):
    # p{0,1}_ref: (3, H)  rows = [linear bias, bn scale, bn shift]
    # p2_ref:     (5, H3) rows = [linear bias, bn scale, bn shift, wout row, bout@[0]]
    x = x_ref[...].astype(jnp.bfloat16)

    # Layer 0: Lin -> ReLU -> BN -> ReLU   (Dropout = identity in eval mode)
    h = jnp.dot(x, w0_ref[...], preferred_element_type=jnp.float32)
    h = jnp.maximum(h + p0_ref[0:1, :], 0.0)
    h = jnp.maximum(h * p0_ref[1:2, :] + p0_ref[2:3, :], 0.0)

    # Layer 1
    h = jnp.dot(h.astype(jnp.bfloat16), w1_ref[...], preferred_element_type=jnp.float32)
    h = jnp.maximum(h + p1_ref[0:1, :], 0.0)
    h = jnp.maximum(h * p1_ref[1:2, :] + p1_ref[2:3, :], 0.0)

    # Layer 2
    h = jnp.dot(h.astype(jnp.bfloat16), w2_ref[...], preferred_element_type=jnp.float32)
    h = jnp.maximum(h + p2_ref[0:1, :], 0.0)
    h = jnp.maximum(h * p2_ref[1:2, :] + p2_ref[2:3, :], 0.0)

    # Head Linear(10,1) as a VPU lane-reduce (padded lanes are zero), sigmoid,
    # stored lane-dense as a (1, TM) row.
    zrow = jnp.sum(h * p2_ref[3:4, :], axis=-1)          # (TM,)
    z = zrow[None, :] + p2_ref[4:5, 0:1]                  # (1, TM)
    o_ref[...] = jax.nn.sigmoid(z)


def linear_3l_forward(x, params, *, tm=TM):
    """x: (N, input_dim) f32. Returns (N,) f32 (matches out.view(-1))."""
    n, f = x.shape
    args = (x, params["w0"], params["p0"], params["w1"], params["p1"],
            params["w2"], params["p2"])

    if n <= SMALL_BATCH_MAX:
        # Small batch: single invocation, everything VMEM-resident, no grid overhead.
        vmem = pl.BlockSpec(memory_space=pltpu.MemorySpace.VMEM)
        out = pl.pallas_call(
            linear3l_kernel,
            out_shape=jax.ShapeDtypeStruct((1, n), jnp.float32),
            in_specs=[vmem] * len(args),
            out_specs=vmem,
            compiler_params=pltpu.CompilerParams(vmem_limit_bytes=32 << 20),
        )(*args)
        return out.reshape(-1)

    # Large batch: tile over rows; weights/params stay VMEM-resident across steps.
    n_pad = pl.cdiv(n, tm) * tm
    if n_pad != n:
        x = jnp.pad(x, ((0, n_pad - n), (0, 0)))

    def resident(arr):  # same block every grid step -> fetched once, stays in VMEM
        return pl.BlockSpec(arr.shape, lambda i: (0, 0))

    in_specs = [
        pl.BlockSpec((tm, f), lambda i: (i, 0)),
        resident(params["w0"]), resident(params["p0"]),
        resident(params["w1"]), resident(params["p1"]),
        resident(params["w2"]), resident(params["p2"]),
    ]
    out = pl.pallas_call(
        linear3l_kernel,
        out_shape=jax.ShapeDtypeStruct((1, n_pad), jnp.float32),
        grid_spec=pltpu.PrefetchScalarGridSpec(
            num_scalar_prefetch=0,
            grid=(n_pad // tm,),
            in_specs=in_specs,
            out_specs=pl.BlockSpec((1, tm), lambda i: (0, i)),
        ),
        compiler_params=pltpu.CompilerParams(
            dimension_semantics=("parallel",),   # shards row tiles across v7x's 2 TCs
            vmem_limit_bytes=32 << 20),
    )(x, params["w0"], params["p0"], params["w1"], params["p1"],
      params["w2"], params["p2"])
    return out.reshape(-1)[:n]


def init_params(key, input_dim):
    """Deterministic init mimicking torch defaults, with 128-aligned padding and
    bf16 weights. BN defaults (gamma=1, beta=0, mean=0, var=1, eps=1e-5) are folded
    into per-feature scale/shift; padded features have scale=shift=0."""
    eps = 1e-5
    real = [(input_dim, 2000), (2000, 500), (500, 10)]
    padded = [(input_dim, H1), (H1, H2), (H2, H3)]
    params = {}
    slabs = []
    for li, ((fi, fo), (pi_, po)) in enumerate(zip(real, padded)):
        key, kw, kb = jax.random.split(key, 3)
        bound = fi ** -0.5
        w = jax.random.uniform(kw, (fi, fo), jnp.float32, -bound, bound)
        b = jax.random.uniform(kb, (fo,), jnp.float32, -bound, bound)
        w_pad = jnp.zeros((pi_, po), jnp.float32).at[:fi, :fo].set(w)
        b_pad = jnp.zeros((po,), jnp.float32).at[:fo].set(b)
        scale = jnp.zeros((po,), jnp.float32).at[:fo].set(1.0 / (1.0 + eps) ** 0.5)
        shift = jnp.zeros((po,), jnp.float32)
        params[f"w{li}"] = w_pad.astype(jnp.bfloat16)
        slabs.append((b_pad, scale, shift))

    # Head: Linear(10, 1)
    key, kw, kb = jax.random.split(key, 3)
    bound = 10.0 ** -0.5
    wout = jax.random.uniform(kw, (10,), jnp.float32, -bound, bound)
    bout = jax.random.uniform(kb, (), jnp.float32, -bound, bound)
    wout_pad = jnp.zeros((H3,), jnp.float32).at[:10].set(wout)
    bout_row = jnp.zeros((H3,), jnp.float32).at[0].set(bout)

    params["p0"] = jnp.stack(slabs[0])                       # (3, 2048)
    params["p1"] = jnp.stack(slabs[1])                       # (3, 512)
    params["p2"] = jnp.stack(slabs[2] + (wout_pad, bout_row))  # (5, 128)
    return params


def reference_forward(x, params):
    """Pure-JAX mirror of the kernel math (eval mode) for verification."""
    def layer(h, w, p):
        h = jnp.dot(h.astype(jnp.bfloat16), w, preferred_element_type=jnp.float32)
        h = jnp.maximum(h + p[0:1], 0.0)
        return jnp.maximum(h * p[1:2] + p[2:3], 0.0)

    h = layer(x, params["w0"], params["p0"])
    h = layer(h, params["w1"], params["p1"])
    h = layer(h, params["w2"], params["p2"][:3])
    z = jnp.sum(h * params["p2"][3:4], axis=-1) + params["p2"][4, 0]
    return jax.nn.sigmoid(z)


if __name__ == "__main__":
    key = jax.random.PRNGKey(0)
    k_param, k_x1, k_x2 = jax.random.split(key, 3)

    input_dim = 32
    params = init_params(k_param, input_dim)

    # Small-batch path (single invocation).
    x_small = jax.random.normal(k_x1, (8, input_dim), jnp.float32)
    out_small = jax.block_until_ready(linear_3l_forward(x_small, params))
    ref_small = reference_forward(x_small, params)
    assert out_small.shape == (8,), out_small.shape
    assert bool(jnp.all(jnp.isfinite(out_small)))
    assert bool(jnp.allclose(out_small, ref_small, atol=2e-3, rtol=2e-3))

    # Large-batch path (row-tiled grid; exercises N-padding + lane-dense output).
    x_big = jax.random.normal(k_x2, (1500, input_dim), jnp.float32)
    out_big = jax.block_until_ready(linear_3l_forward(x_big, params))
    ref_big = reference_forward(x_big, params)
    assert out_big.shape == (1500,), out_big.shape
    assert bool(jnp.all(jnp.isfinite(out_big)))
    assert bool(jnp.allclose(out_big, ref_big, atol=2e-3, rtol=2e-3))

    print("KERNEL_OK")
</pallas_src>

<mosaic_0001>
module attributes {stable_mosaic.version = 11 : i64} {
  func.func @linear3l_kernel(%arg0: memref<8x32xf32, #tpu.memory_space<vmem>>, %arg1: memref<32x2048xbf16, #tpu.memory_space<vmem>>, %arg2: memref<3x2048xf32, #tpu.memory_space<vmem>>, %arg3: memref<2048x512xbf16, #tpu.memory_space<vmem>>, %arg4: memref<3x512xf32, #tpu.memory_space<vmem>>, %arg5: memref<512x128xbf16, #tpu.memory_space<vmem>>, %arg6: memref<5x128xf32, #tpu.memory_space<vmem>>, %arg7: memref<1x8xf32, #tpu.memory_space<vmem>>) attributes {dimension_semantics = [], scalar_prefetch = 0 : i64, scratch_operands = 0 : i64, tpu.core_type = #tpu.core_type<tc>} {
    %c0 = arith.constant 0 : index
    %c0_0 = arith.constant 0 : index
    %0 = vector.load %arg0[%c0, %c0_0] : memref<8x32xf32, #tpu.memory_space<vmem>>, vector<8x32xf32>
    %1 = arith.truncf %0 : vector<8x32xf32> to vector<8x32xbf16>
    %c0_1 = arith.constant 0 : index
    %c0_2 = arith.constant 0 : index
    %2 = vector.load %arg1[%c0_1, %c0_2] : memref<32x2048xbf16, #tpu.memory_space<vmem>>, vector<32x2048xbf16>
    %cst = arith.constant dense<0.000000e+00> : vector<8x2048xf32>
    %3 = tpu.matmul %1, %2, %cst {dimension_numbers = #tpu.dot_dimension_numbers<[1], [0], [0], [1], [0, 0, 1, 1], [], []>} : vector<8x32xbf16>, vector<32x2048xbf16>, vector<8x2048xf32> -> vector<8x2048xf32>
    %c0_3 = arith.constant 0 : index
    %c0_4 = arith.constant 0 : index
    %4 = vector.load %arg2[%c0_3, %c0_4] : memref<3x2048xf32, #tpu.memory_space<vmem>>, vector<1x2048xf32>
    %5 = vector.broadcast %4 : vector<1x2048xf32> to vector<8x2048xf32>
    %6 = arith.addf %3, %5 : vector<8x2048xf32>
    %cst_5 = arith.constant 0.000000e+00 : f32
    %7 = vector.broadcast %cst_5 : f32 to vector<8x2048xf32>
    %8 = arith.maximumf %6, %7 : vector<8x2048xf32>
    %c1 = arith.constant 1 : index
    %c0_6 = arith.constant 0 : index
    %9 = vector.load %arg2[%c1, %c0_6] : memref<3x2048xf32, #tpu.memory_space<vmem>>, vector<1x2048xf32>
    %10 = vector.broadcast %9 : vector<1x2048xf32> to vector<8x2048xf32>
    %11 = arith.mulf %8, %10 : vector<8x2048xf32>
    %c2 = arith.constant 2 : index
    %c0_7 = arith.constant 0 : index
    %12 = vector.load %arg2[%c2, %c0_7] : memref<3x2048xf32, #tpu.memory_space<vmem>>, vector<1x2048xf32>
    %13 = vector.broadcast %12 : vector<1x2048xf32> to vector<8x2048xf32>
    %14 = arith.addf %11, %13 : vector<8x2048xf32>
    %cst_8 = arith.constant 0.000000e+00 : f32
    %15 = vector.broadcast %cst_8 : f32 to vector<8x2048xf32>
    %16 = arith.maximumf %14, %15 : vector<8x2048xf32>
    %17 = arith.truncf %16 : vector<8x2048xf32> to vector<8x2048xbf16>
    %c0_9 = arith.constant 0 : index
    %c0_10 = arith.constant 0 : index
    %18 = vector.load %arg3[%c0_9, %c0_10] : memref<2048x512xbf16, #tpu.memory_space<vmem>>, vector<2048x512xbf16>
    %cst_11 = arith.constant dense<0.000000e+00> : vector<8x512xf32>
    %19 = tpu.matmul %17, %18, %cst_11 {dimension_numbers = #tpu.dot_dimension_numbers<[1], [0], [0], [1], [0, 0, 1, 1], [], []>} : vector<8x2048xbf16>, vector<2048x512xbf16>, vector<8x512xf32> -> vector<8x512xf32>
    %c0_12 = arith.constant 0 : index
    %c0_13 = arith.constant 0 : index
    %20 = vector.load %arg4[%c0_12, %c0_13] : memref<3x512xf32, #tpu.memory_space<vmem>>, vector<1x512xf32>
    %21 = vector.broadcast %20 : vector<1x512xf32> to vector<8x512xf32>
    %22 = arith.addf %19, %21 : vector<8x512xf32>
    %cst_14 = arith.constant 0.000000e+00 : f32
    %23 = vector.broadcast %cst_14 : f32 to vector<8x512xf32>
    %24 = arith.maximumf %22, %23 : vector<8x512xf32>
    %c1_15 = arith.constant 1 : index
    %c0_16 = arith.constant 0 : index
    %25 = vector.load %arg4[%c1_15, %c0_16] : memref<3x512xf32, #tpu.memory_space<vmem>>, vector<1x512xf32>
    %26 = vector.broadcast %25 : vector<1x512xf32> to vector<8x512xf32>
    %27 = arith.mulf %24, %26 : vector<8x512xf32>
    %c2_17 = arith.constant 2 : index
    %c0_18 = arith.constant 0 : index
    %28 = vector.load %arg4[%c2_17, %c0_18] : memref<3x512xf32, #tpu.memory_space<vmem>>, vector<1x512xf32>
    %29 = vector.broadcast %28 : vector<1x512xf32> to vector<8x512xf32>
    %30 = arith.addf %27, %29 : vector<8x512xf32>
    %cst_19 = arith.constant 0.000000e+00 : f32
    %31 = vector.broadcast %cst_19 : f32 to vector<8x512xf32>
    %32 = arith.maximumf %30, %31 : vector<8x512xf32>
    %33 = arith.truncf %32 : vector<8x512xf32> to vector<8x512xbf16>
    %c0_20 = arith.constant 0 : index
    %c0_21 = arith.constant 0 : index
    %34 = vector.load %arg5[%c0_20, %c0_21] : memref<512x128xbf16, #tpu.memory_space<vmem>>, vector<512x128xbf16>
    %cst_22 = arith.constant dense<0.000000e+00> : vector<8x128xf32>
    %35 = tpu.matmul %33, %34, %cst_22 {dimension_numbers = #tpu.dot_dimension_numbers<[1], [0], [0], [1], [0, 0, 1, 1], [], []>} : vector<8x512xbf16>, vector<512x128xbf16>, vector<8x128xf32> -> vector<8x128xf32>
    %c0_23 = arith.constant 0 : index
    %c0_24 = arith.constant 0 : index
    %36 = vector.load %arg6[%c0_23, %c0_24] : memref<5x128xf32, #tpu.memory_space<vmem>>, vector<1x128xf32>
    %37 = vector.broadcast %36 : vector<1x128xf32> to vector<8x128xf32>
    %38 = arith.addf %35, %37 : vector<8x128xf32>
    %cst_25 = arith.constant 0.000000e+00 : f32
    %39 = vector.broadcast %cst_25 : f32 to vector<8x128xf32>
    %40 = arith.maximumf %38, %39 : vector<8x128xf32>
    %c1_26 = arith.constant 1 : index
    %c0_27 = arith.constant 0 : index
    %41 = vector.load %arg6[%c1_26, %c0_27] : memref<5x128xf32, #tpu.memory_space<vmem>>, vector<1x128xf32>
    %42 = vector.broadcast %41 : vector<1x128xf32> to vector<8x128xf32>
    %43 = arith.mulf %40, %42 : vector<8x128xf32>
    %c2_28 = arith.constant 2 : index
    %c0_29 = arith.constant 0 : index
    %44 = vector.load %arg6[%c2_28, %c0_29] : memref<5x128xf32, #tpu.memory_space<vmem>>, vector<1x128xf32>
    %45 = vector.broadcast %44 : vector<1x128xf32> to vector<8x128xf32>
    %46 = arith.addf %43, %45 : vector<8x128xf32>
    %cst_30 = arith.constant 0.000000e+00 : f32
    %47 = vector.broadcast %cst_30 : f32 to vector<8x128xf32>
    %48 = arith.maximumf %46, %47 : vector<8x128xf32>
    %c3 = arith.constant 3 : index
    %c0_31 = arith.constant 0 : index
    %49 = vector.load %arg6[%c3, %c0_31] : memref<5x128xf32, #tpu.memory_space<vmem>>, vector<1x128xf32>
    %50 = vector.broadcast %49 : vector<1x128xf32> to vector<8x128xf32>
    %51 = arith.mulf %48, %50 : vector<8x128xf32>
    %cst_32 = arith.constant dense<0.000000e+00> : vector<8xf32>
    %52 = vector.multi_reduction <add>, %51, %cst_32 [1] : vector<8x128xf32> to vector<8xf32>
    %53 = vector.shape_cast %52 : vector<8xf32> to vector<1x8xf32>
    %c4 = arith.constant 4 : index
    %c0_33 = arith.constant 0 : index
    %54 = vector.load %arg6[%c4, %c0_33] : memref<5x128xf32, #tpu.memory_space<vmem>>, vector<1x1xf32>
    %55 = vector.broadcast %54 : vector<1x1xf32> to vector<1x8xf32>
    %56 = arith.addf %53, %55 : vector<1x8xf32>
    %57 = arith.negf %56 : vector<1x8xf32>
    %58 = math.exp %57 : vector<1x8xf32>
    %cst_34 = arith.constant 1.000000e+00 : f32
    %59 = vector.broadcast %cst_34 : f32 to vector<1x8xf32>
    %60 = arith.addf %59, %58 : vector<1x8xf32>
    %61 = arith.divf %59, %60 : vector<1x8xf32>
    %c0_35 = arith.constant 0 : index
    %c0_36 = arith.constant 0 : index
    %62 = vector.load %arg7[%c0_35, %c0_36] : memref<1x8xf32, #tpu.memory_space<vmem>>, vector<1x8xf32>
    tpu.vector_store %arg7[%c0_35, %c0_36], %61 {strides = array<i32>} : memref<1x8xf32, #tpu.memory_space<vmem>>, vector<1x8xf32>,
    return
  }
}

</mosaic_0001>

<bundles_post_ra>
// kernel: tpu_custom_call.1
= control target key start
LH: loop header
LB: loop body
LE: loop exit
PB: predicated region body
PF: predicated region fallthrough
CT: control target
= control target key end

     0   :  { %12 = vsyncpa [#allocation3], 0  ;;  %s8534_s0 = inlined_call_operand.hbm [shape: f32[8,32], index: 0, kind: input, shape index: {}]   ;;  %s8535_s1 = inlined_call_operand.hbm [shape: bf16[32,2048], index: 1, kind: input, shape index: {}]   ;;  %s8536_s2 = inlined_call_operand.hbm [shape: f32[3,2048], index: 2, kind: input, shape index: {}]   ;;  %s8537_s3 = inlined_call_operand.hbm [shape: bf16[2048,512], index: 3, kind: input, shape index: {}]   ;;  %s8538_s4 = inlined_call_operand.hbm [shape: f32[3,512], index: 4, kind: input, shape index: {}]   ;;  %s8539_s5 = inlined_call_operand.hbm [shape: bf16[512,128], index: 5, kind: input, shape index: {}]   ;;  %s8540_s6 = inlined_call_operand.hbm [shape: f32[5,128], index: 6, kind: input, shape index: {}]   ;;  %s8541_s7 = inlined_call_operand.hbm [shape: f32[1,8], index: 7, kind: output, shape index: {}]  }
   0x1   :  { %13 = vsyncpa [#allocation6], 0 }
   0x2   :  { %14 = vsyncpa [#allocation9], 0 }
   0x3   :  { %15 = vsyncpa [#allocation12], 0  ;;  %s32_s26 = sshll.u32 %s8535_s1, 4  ;;  %s33_s26 = int_to_ptr.hbm [resolvable:$true] %s32_s26 }
   0x4   :  { %16 = vsyncpa [#allocation4], 0  ;;  %s8188_s27 = smov [#allocation5]   ;;  %s56_s8 = sshll.u32 %s8537_s3, 4  ;;  %s57_s8 = int_to_ptr.hbm [resolvable:$true] %s56_s8 }
   0x5   :  { %s34_s28 = sshll.u32 %s8188_s27, 4  ;;  %s8189_s9 = smov 1024   ;;  %s35_s28 = int_to_ptr.vmem [resolvable:$true] %s34_s28 }
   0x6   :  { %s8190_s10 = smov 64   ;;  %s8191_s11 = smov [#allocation8]  }
   0x7   :  { %40 = dma.hbm_to_vmem [thread:$0]  %s33_s26, 4096, %s35_s28, [#allocation6], %s8189_s9, %s8189_s9, %s8190_s10  }
   0x8   :  { %s58_s12 = sshll.u32 %s8191_s11, 4  ;;  %s8192_s13 = smov 256   ;;  %s59_s12 = int_to_ptr.vmem [resolvable:$true] %s58_s12 }
   0x9   :  { %s8193_s14 = smov 16   ;;  %s80_s16 = sshll.u32 %s8539_s5, 4  ;;  %s81_s16 = int_to_ptr.hbm [resolvable:$true] %s80_s16 }
   0xa   :  { %64 = dma.hbm_to_vmem [thread:$0]  %s57_s8, 65536, %s59_s12, [#allocation9], %s8192_s13, %s8192_s13, %s8193_s14  }
   0xb   :  { %s8194_s17 = smov [#allocation11]   ;;  %s8195_s19 = smov 4  }
   0xc   :  { %s82_s18 = sshll.u32 %s8194_s17, 4  ;;  %s22_s21 = sshll.u32 %s8534_s0, 4  ;;  %s83_s18 = int_to_ptr.vmem [resolvable:$true] %s82_s18  ;;  %s23_s21 = int_to_ptr.hbm [resolvable:$true] %s22_s21 }
   0xd   :  { %88 = dma.hbm_to_vmem [thread:$0]  %s81_s16, 4096, %s83_s18, [#allocation12], %s8190_s10, %s8190_s10, %s8195_s19  }
   0xe   :  { %s8196_s22 = smov [#allocation2]   ;;  %s46_s26 = sshll.u32 %s8536_s2, 4  ;;  %s47_s26 = int_to_ptr.hbm [resolvable:$true] %s46_s26 }
   0xf   :  { %s24_s23 = sshll.u32 %s8196_s22, 4  ;;  %s8197_s5 = smov [#allocation7]   ;;  %s25_s23 = int_to_ptr.vmem [resolvable:$true] %s24_s23 }
  0x10   :  { %27 = dma.hbm_to_vmem [thread:$0]  %s23_s21, 128, %s25_s23, [#allocation3]  }
  0x11   :  { %s48_s27 = sshll.u32 %s8197_s5, 4  ;;  %s70_s30 = sshll.u32 %s8538_s4, 4  ;;  %s49_s27 = int_to_ptr.vmem [resolvable:$true] %s48_s27  ;;  %s71_s30 = int_to_ptr.hbm [resolvable:$true] %s70_s30 }
  0x12   :  { %51 = dma.hbm_to_vmem [thread:$0]  %s47_s26, 1024, %s49_s27, [#allocation6]  }
  0x13   :  { %s94_s9 = sshll.u32 %s8540_s6, 4  ;;  %s8198_s10 = smov [#allocation10]   ;;  %s95_s9 = int_to_ptr.hbm [resolvable:$true] %s94_s9 }
  0x14   :  { %s72_s11 = sshll.u32 %s8198_s10, 4  ;;  %s8199_s2 = smov [#allocation13]   ;;  %s73_s11 = int_to_ptr.vmem [resolvable:$true] %s72_s11 }
  0x15   :  { %75 = dma.hbm_to_vmem [thread:$0]  %s71_s30, 256, %s73_s11, [#allocation9]  }
  0x16   :  { %s96_s12 = sshll.u32 %s8199_s2, 4  ;;  %s97_s12 = int_to_ptr.vmem [resolvable:$true] %s96_s12 }
  0x17   :  { %99 = dma.hbm_to_vmem [thread:$0]  %s95_s9, 128, %s97_s12, [#allocation12]  }
  0x18   :  { %8178 = dma.done.wait [#allocation3], 128  }
  0x19   :  { %8179 = vsyncadd [#allocation3], 4294967168 }
  0x1a   :  { %8180 = dma.done.wait [#allocation6], 5120  }
  0x1b   :  { %8181 = vsyncadd [#allocation6], 4294962176 }
  0x1c   :  { %8182 = dma.done.wait [#allocation9], 65792  }
  0x1d   :  { %8183 = vsyncadd [#allocation9], 4294901504 }
  0x1e   :  { %8184 = dma.done.wait [#allocation12], 4224  }
  0x1f   :  { %8185 = vsyncadd [#allocation12], 4294963072  ;;  %v5130_v0 = vld [vmem:[#allocation5 + $0x80] sm:$0xf]  ;;  %v7401_v2 = vld [vmem:[#allocation5 + $0x84] sm:$0xf] }
  0x20   :  { %v7409_v1 = vld [vmem:[#allocation5 + $0xbc] sm:$0xf0]  ;;  %v5132_v4 = vld [vmem:[#allocation5 + $0xc0] sm:$0xf0]  ;;  %v5138_v5 = vld [vmem:[#allocation5 + $0x88] sm:$0xf] }
  0x21   :  { %v5131_v3 = vor.u32 %v7409_v1, %v5130_v0  ;;  %v7410_v6 = vld [vmem:[#allocation5 + $0xc4] sm:$0xf0]  ;;  %v5135_v7 = vor.u32 %v7401_v2, %v5132_v4  ;;  %v7402_v9 = vld [vmem:[#allocation5 + $0x8c] sm:$0xf]  ;;  %v5066_v11 = vld [vmem:[#allocation5] sm:$0xf] }
  0x22   :  { %v5139_v8 = vor.u32 %v7410_v6, %v5138_v5  ;;  %v5140_v10 = vld [vmem:[#allocation5 + $0xc8] sm:$0xf0]  ;;  %v7393_v13 = vld [vmem:[#allocation5 + $0x3c] sm:$0xf0]  ;;  %v7385_v14 = vld [vmem:[#allocation5 + $0x4] sm:$0xf] }
  0x23   :  { %370 = vmatpush.bf16.msra.mxu0 %v5131_v3  ;;  %v5143_v12 = vor.u32 %v7402_v9, %v5140_v10  ;;  %v5068_v15 = vld [vmem:[#allocation5 + $0x40] sm:$0xf0]  ;;  %383 = vmatpush.bf16.msra.mxu1 %v5135_v7  ;;  %v5067_v16 = vor.u32 %v7393_v13, %v5066_v11  ;;  %v5074_v18 = vld [vmem:[#allocation5 + $0x8] sm:$0xf]  ;;  %v7386_v20 = vld [vmem:[#allocation5 + $0xc] sm:$0xf] }
  0x24   :  { %396 = vmatpush.bf16.msra.mxu2 %v5139_v8  ;;  %v5071_v17 = vor.u32 %v7385_v14, %v5068_v15  ;;  %v7394_v19 = vld [vmem:[#allocation5 + $0x44] sm:$0xf0]  ;;  %v5076_v22 = vld [vmem:[#allocation5 + $0x48] sm:$0xf0]  ;;  %v129_v23 = vld [vmem:[#allocation2] sm:$0xff]  ;;  %vm360_vm0 = vcmask 261120  }
  0x25   :  { %409 = vmatpush.bf16.msra.mxu3 %v5143_v12  ;;  %v5075_v21 = vor.u32 %v7394_v19, %v5074_v18  ;;  %v5146_v24 = vld [vmem:[#allocation5 + $0x90] sm:$0xf]  ;;  %v5079_v25 = vor.u32 %v7386_v20, %v5076_v22  ;;  %v8263_v26 = vpack.c.bf16 %v129_v23, %v129_v23  ;;  %v5154_v28 = vld [vmem:[#allocation5 + $0x98] sm:$0xf]  ;;  %v7403_v32 = vld [vmem:[#allocation5 + $0x94] sm:$0xf] }
  0x26   :  { %v7411_v27 = vld [vmem:[#allocation5 + $0xcc] sm:$0xf0]  ;;  %v7412_v29 = vld [vmem:[#allocation5 + $0xd4] sm:$0xf0]  ;;  %v5148_v33 = vld [vmem:[#allocation5 + $0xd0] sm:$0xf0] }
  0x27   :  { %371 = vmatpush.bf16.msra.mxu0 %v5067_v16  ;;  %v5147_v30 = vor.u32 %v7411_v27, %v5146_v24  ;;  %v5155_v31 = vor.u32 %v7412_v29, %v5154_v28  ;;  %v7404_v34 = vld [vmem:[#allocation5 + $0x9c] sm:$0xf]  ;;  %384 = vmatpush.bf16.msra.mxu1 %v5071_v17  ;;  %v5151_v35 = vor.u32 %v7403_v32, %v5148_v33  ;;  %v5082_v37 = vld [vmem:[#allocation5 + $0x10] sm:$0xf]  ;;  %v5090_v41 = vld [vmem:[#allocation5 + $0x18] sm:$0xf] }
  0x28   :  { %397 = vmatpush.bf16.msra.mxu2 %v5075_v21  ;;  %v5156_v36 = vld [vmem:[#allocation5 + $0xd8] sm:$0xf0]  ;;  %v7395_v38 = vld [vmem:[#allocation5 + $0x4c] sm:$0xf0]  ;;  %v7396_v42 = vld [vmem:[#allocation5 + $0x54] sm:$0xf0] }
  0x29   :  { %410 = vmatpush.bf16.msra.mxu3 %v5079_v25  ;;  %v5159_v39 = vor.u32 %v7404_v34, %v5156_v36  ;;  %v5083_v40 = vor.u32 %v7395_v38, %v5082_v37  ;;  %v7387_v43 = vld [vmem:[#allocation5 + $0x14] sm:$0xf]  ;;  %v5091_v44 = vor.u32 %v7396_v42, %v5090_v41  ;;  %v7388_v46 = vld [vmem:[#allocation5 + $0x1c] sm:$0xf]  ;;  %v5162_v48 = vld [vmem:[#allocation5 + $0xa0] sm:$0xf] }
  0x2a   :  { %5192 = vmatmul.msk.bf16.vlgmr.msra.gmra.mxu0 %vm360_vm0, %v8263_v26  ;;  %v5084_v45 = vld [vmem:[#allocation5 + $0x50] sm:$0xf0]  ;;  %v5092_v47 = vld [vmem:[#allocation5 + $0x58] sm:$0xf0]  ;;  %5193 = vmatmul.msk.bf16.vlgmr.msra.gmra.mxu1 %vm360_vm0, %v8263_v26  ;;  %v7413_v49 = vld [vmem:[#allocation5 + $0xdc] sm:$0xf0] }
  0x2b   :  { %422 = vmatpush.bf16.msrb.mxu0 %v5147_v30  ;;  %5194 = vmatmul.msk.bf16.vlgmr.msra.gmra.mxu2 %vm360_vm0, %v8263_v26  ;;  %v5170_v50 = vld [vmem:[#allocation5 + $0xa8] sm:$0xf]  ;;  %v5087_v51 = vor.u32 %v7387_v43, %v5084_v45  ;;  %v5163_v52 = vor.u32 %v7413_v49, %v5162_v48  ;;  %v7405_v54 = vld [vmem:[#allocation5 + $0xa4] sm:$0xf]  ;;  %v5095_v56 = vor.u32 %v7388_v46, %v5092_v47  ;;  %v7406_v59 = vld [vmem:[#allocation5 + $0xac] sm:$0xf] }
  0x2c   :  { %448 = vmatpush.bf16.msrb.mxu2 %v5155_v31  ;;  %5195 = vmatmul.msk.bf16.vlgmr.msra.gmra.mxu3 %vm360_vm0, %v8263_v26  ;;  %v7414_v53 = vld [vmem:[#allocation5 + $0xe4] sm:$0xf0]  ;;  %v5164_v55 = vld [vmem:[#allocation5 + $0xe0] sm:$0xf0]  ;;  %v5172_v60 = vld [vmem:[#allocation5 + $0xe8] sm:$0xf0] }
  0x2d   :  { %435 = vmatpush.bf16.msrb.mxu1 %v5151_v35  ;;  %461 = vmatpush.bf16.msrb.mxu3 %v5159_v39  ;;  %v5171_v57 = vor.u32 %v7414_v53, %v5170_v50  ;;  %v5167_v58 = vor.u32 %v7405_v54, %v5164_v55  ;;  %v5098_v61 = vld [vmem:[#allocation5 + $0x20] sm:$0xf]  ;;  %v5175_v62 = vor.u32 %v7406_v59, %v5172_v60  ;;  %v5106_v0 = vld [vmem:[#allocation5 + $0x28] sm:$0xf]  ;;  %v7389_v4 = vld [vmem:[#allocation5 + $0x24] sm:$0xf] }
  0x2e   :  { %v7397_v63 = vld [vmem:[#allocation5 + $0x5c] sm:$0xf0]  ;;  %v7398_v1 = vld [vmem:[#allocation5 + $0x64] sm:$0xf0]  ;;  %v5100_v5 = vld [vmem:[#allocation5 + $0x60] sm:$0xf0] }
  0x2f   :  { %423 = vmatpush.bf16.msrb.mxu0 %v5083_v40  ;;  %v5099_v2 = vor.u32 %v7397_v63, %v5098_v61  ;;  %v5107_v3 = vor.u32 %v7398_v1, %v5106_v0  ;;  %v7390_v6 = vld [vmem:[#allocation5 + $0x2c] sm:$0xf]  ;;  %v5103_v8 = vor.u32 %v7389_v4, %v5100_v5  ;;  %v5178_v10 = vld [vmem:[#allocation5 + $0xb0] sm:$0xf]  ;;  %v5186_v12 = vld [vmem:[#allocation5 + $0xb8] sm:$0xf] }
  0x30   :  { %449 = vmatpush.bf16.msrb.mxu2 %v5091_v44  ;;  %v5108_v7 = vld [vmem:[#allocation5 + $0x68] sm:$0xf0]  ;;  %v7415_v11 = vld [vmem:[#allocation5 + $0xec] sm:$0xf0]  ;;  %v7416_v13 = vld [vmem:[#allocation5 + $0xf4] sm:$0xf0] }
  0x31   :  { %436 = vmatpush.bf16.msrb.mxu1 %v5087_v51  ;;  %462 = vmatpush.bf16.msrb.mxu3 %v5095_v56  ;;  %v5111_v9 = vor.u32 %v7390_v6, %v5108_v7  ;;  %v7407_v14 = vld [vmem:[#allocation5 + $0xb4] sm:$0xf]  ;;  %v7408_v16 = vld [vmem:[#allocation5 + $0xbc] sm:$0xf]  ;;  %v5179_v18 = vor.u32 %v7415_v11, %v5178_v10  ;;  %v5187_v19 = vor.u32 %v7416_v13, %v5186_v12  ;;  %v5114_v21 = vld [vmem:[#allocation5 + $0x30] sm:$0xf] }
  0x32   :  { %v5180_v15 = vld [vmem:[#allocation5 + $0xf0] sm:$0xf0]  ;;  %v5188_v17 = vld [vmem:[#allocation5 + $0xf8] sm:$0xf0]  ;;  %v7399_v22 = vld [vmem:[#allocation5 + $0x6c] sm:$0xf0] }
  0x33   :  { %474 = vmatpush.bf16.msra.mxu0 %v5163_v52  ;;  %v5183_v20 = vor.u32 %v7407_v14, %v5180_v15  ;;  %v5122_v23 = vld [vmem:[#allocation5 + $0x38] sm:$0xf]  ;;  %v5191_v24 = vor.u32 %v7408_v16, %v5188_v17  ;;  %v7391_v27 = vld [vmem:[#allocation5 + $0x34] sm:$0xf]  ;;  %v7392_v29 = vld [vmem:[#allocation5 + $0x3c] sm:$0xf]  ;;  %v5115_v31 = vor.u32 %v7399_v22, %v5114_v21 }
  0x34   :  { %500 = vmatpush.bf16.msra.mxu2 %v5171_v57  ;;  %v7400_v25 = vld [vmem:[#allocation5 + $0x74] sm:$0xf0]  ;;  %v5116_v28 = vld [vmem:[#allocation5 + $0x70] sm:$0xf0]  ;;  %v5124_v30 = vld [vmem:[#allocation5 + $0x78] sm:$0xf0] }
  0x35   :  { %487 = vmatpush.bf16.msra.mxu1 %v5167_v58  ;;  %513 = vmatpush.bf16.msra.mxu3 %v5175_v62  ;;  %v5123_v32 = vor.u32 %v7400_v25, %v5122_v23  ;;  %v5119_v33 = vor.u32 %v7391_v27, %v5116_v28  ;;  %v5127_v34 = vor.u32 %v7392_v29, %v5124_v30  ;;  %v5322_v35 = vld [vmem:[#allocation8 + $0xe0] sm:$0xf]  ;;  %v7447_v36 = vld [vmem:[#allocation8 + $0xec] sm:$0xf0]  ;;  %s8201_s4 = smov [#allocation14]   ;;  %s5051_s1 = sshll.u32 %s8541_s7, 4  ;;  %s5052_s1 = int_to_ptr.hbm [resolvable:$true] %s5051_s1 }
  0x36   :  { %v5450_v37 = vld [vmem:[#allocation8 + $0x1e0] sm:$0xf]  ;;  %v7479_v38 = vld [vmem:[#allocation8 + $0x1ec] sm:$0xf0]  ;;  %v5323_v43 = vor.u32 %v7447_v36, %v5322_v35  ;;  %s5049_s6 = sshll.u32 %s8201_s4, 4  ;;  %vm5042_vm5 = vcmask 57344   ;;  %s5050_s6 = int_to_ptr.vmem [resolvable:$true] %s5049_s6 }
  0x37   :  { %475 = vmatpush.bf16.msra.mxu0 %v5099_v2  ;;  %v5578_v39 = vld [vmem:[#allocation8 + $0x2e0] sm:$0xf]  ;;  %v7511_v40 = vld [vmem:[#allocation8 + $0x2ec] sm:$0xf0]  ;;  %v5451_v44 = vor.u32 %v7479_v38, %v5450_v37 }
  0x38   :  { %501 = vmatpush.bf16.msra.mxu2 %v5107_v3  ;;  %v5706_v41 = vld [vmem:[#allocation8 + $0x3e0] sm:$0xf]  ;;  %v7543_v42 = vld [vmem:[#allocation8 + $0x3ec] sm:$0xf0]  ;;  %v5579_v48 = vor.u32 %v7511_v40, %v5578_v39 }
  0x39   :  { %488 = vmatpush.bf16.msra.mxu1 %v5103_v8  ;;  %514 = vmatpush.bf16.msra.mxu3 %v5111_v9  ;;  %v5306_v45 = vld [vmem:[#allocation8 + $0xc0] sm:$0xf]  ;;  %v7443_v46 = vld [vmem:[#allocation8 + $0xcc] sm:$0xf0]  ;;  %v5707_v50 = vor.u32 %v7543_v42, %v5706_v41 }
  0x3a   :  { %5196 = vmatmul.msk.bf16.vlgmr.msrb.gmra.mxu0 %vm360_vm0, %v8263_v26  ;;  %5197 = vmatmul.msk.bf16.vlgmr.msrb.gmra.mxu1 %vm360_vm0, %v8263_v26  ;;  %v5434_v47 = vld [vmem:[#allocation8 + $0x1c0] sm:$0xf]  ;;  %v7475_v49 = vld [vmem:[#allocation8 + $0x1cc] sm:$0xf0]  ;;  %v5307_v55 = vor.u32 %v7443_v46, %v5306_v45 }
  0x3b   :  { %5198 = vmatmul.msk.bf16.vlgmr.msrb.gmra.mxu2 %vm360_vm0, %v8263_v26  ;;  %526 = vmatpush.bf16.msrb.mxu0 %v5179_v18  ;;  %v5562_v51 = vld [vmem:[#allocation8 + $0x2c0] sm:$0xf]  ;;  %v7507_v52 = vld [vmem:[#allocation8 + $0x2cc] sm:$0xf0]  ;;  %v5435_v56 = vor.u32 %v7475_v49, %v5434_v47 }
  0x3c   :  { %5199 = vmatmul.msk.bf16.vlgmr.msrb.gmra.mxu3 %vm360_vm0, %v8263_v26  ;;  %552 = vmatpush.bf16.msrb.mxu2 %v5187_v19  ;;  %v5690_v53 = vld [vmem:[#allocation8 + $0x3c0] sm:$0xf]  ;;  %v7539_v54 = vld [vmem:[#allocation8 + $0x3cc] sm:$0xf0]  ;;  %v5563_v60 = vor.u32 %v7507_v52, %v5562_v51 }
  0x3d   :  { %539 = vmatpush.bf16.msrb.mxu1 %v5183_v20  ;;  %565 = vmatpush.bf16.msrb.mxu3 %v5191_v24  ;;  %v5290_v57 = vld [vmem:[#allocation8 + $0xa0] sm:$0xf]  ;;  %v7439_v58 = vld [vmem:[#allocation8 + $0xac] sm:$0xf0]  ;;  %v5691_v62 = vor.u32 %v7539_v54, %v5690_v53 }
  0x3e   :  { %v5418_v59 = vld [vmem:[#allocation8 + $0x1a0] sm:$0xf]  ;;  %v7471_v61 = vld [vmem:[#allocation8 + $0x1ac] sm:$0xf0]  ;;  %v5291_v3 = vor.u32 %v7439_v58, %v5290_v57 }
  0x3f   :  { %527 = vmatpush.bf16.msrb.mxu0 %v5115_v31  ;;  %v5546_v63 = vld [vmem:[#allocation8 + $0x2a0] sm:$0xf]  ;;  %v7503_v0 = vld [vmem:[#allocation8 + $0x2ac] sm:$0xf0]  ;;  %v5419_v4 = vor.u32 %v7471_v61, %v5418_v59 }
  0x40   :  { %553 = vmatpush.bf16.msrb.mxu2 %v5123_v32  ;;  %v5674_v1 = vld [vmem:[#allocation8 + $0x3a0] sm:$0xf]  ;;  %v7535_v2 = vld [vmem:[#allocation8 + $0x3ac] sm:$0xf0]  ;;  %v5547_v8 = vor.u32 %v7503_v0, %v5546_v63 }
  0x41   :  { %540 = vmatpush.bf16.msrb.mxu1 %v5119_v33  ;;  %566 = vmatpush.bf16.msrb.mxu3 %v5127_v34  ;;  %v5274_v5 = vld [vmem:[#allocation8 + $0x80] sm:$0xf]  ;;  %v7435_v6 = vld [vmem:[#allocation8 + $0x8c] sm:$0xf0]  ;;  %v5675_v10 = vor.u32 %v7535_v2, %v5674_v1 }
  0x42   :  { %v5402_v7 = vld [vmem:[#allocation8 + $0x180] sm:$0xf]  ;;  %v7467_v9 = vld [vmem:[#allocation8 + $0x18c] sm:$0xf0]  ;;  %v5275_v15 = vor.u32 %v7435_v6, %v5274_v5 }
  0x43   :  { %v5530_v11 = vld [vmem:[#allocation8 + $0x280] sm:$0xf]  ;;  %v7499_v12 = vld [vmem:[#allocation8 + $0x28c] sm:$0xf0]  ;;  %v5403_v16 = vor.u32 %v7467_v9, %v5402_v7 }
  0x44   :  { %v5658_v13 = vld [vmem:[#allocation8 + $0x380] sm:$0xf]  ;;  %v7531_v14 = vld [vmem:[#allocation8 + $0x38c] sm:$0xf0]  ;;  %v5531_v20 = vor.u32 %v7499_v12, %v5530_v11 }
  0x45   :  { %v5258_v17 = vld [vmem:[#allocation8 + $0x60] sm:$0xf]  ;;  %v7431_v18 = vld [vmem:[#allocation8 + $0x6c] sm:$0xf0]  ;;  %v5659_v22 = vor.u32 %v7531_v14, %v5658_v13 }
  0x46   :  { %v5386_v19 = vld [vmem:[#allocation8 + $0x160] sm:$0xf]  ;;  %v7463_v21 = vld [vmem:[#allocation8 + $0x16c] sm:$0xf0]  ;;  %v5259_v28 = vor.u32 %v7431_v18, %v5258_v17 }
  0x47   :  { %v5514_v23 = vld [vmem:[#allocation8 + $0x260] sm:$0xf]  ;;  %v7495_v24 = vld [vmem:[#allocation8 + $0x26c] sm:$0xf0]  ;;  %v5387_v29 = vor.u32 %v7463_v21, %v5386_v19 }
  0x48   :  { %v5642_v25 = vld [vmem:[#allocation8 + $0x360] sm:$0xf]  ;;  %v7527_v27 = vld [vmem:[#allocation8 + $0x36c] sm:$0xf0]  ;;  %v5515_v33 = vor.u32 %v7495_v24, %v5514_v23 }
  0x49   :  { %v5242_v30 = vld [vmem:[#allocation8 + $0x40] sm:$0xf]  ;;  %v7427_v31 = vld [vmem:[#allocation8 + $0x4c] sm:$0xf0]  ;;  %v5643_v35 = vor.u32 %v7527_v27, %v5642_v25 }
  0x4a   :  { %5200 = vmatmul.msk.bf16.vlgmr.msra.gmra.mxu0 %vm360_vm0, %v8263_v26  ;;  %5201 = vmatmul.msk.bf16.vlgmr.msra.gmra.mxu1 %vm360_vm0, %v8263_v26  ;;  %v5370_v32 = vld [vmem:[#allocation8 + $0x140] sm:$0xf]  ;;  %v7459_v34 = vld [vmem:[#allocation8 + $0x14c] sm:$0xf0]  ;;  %v5243_v40 = vor.u32 %v7427_v31, %v5242_v30 }
  0x4b   :  { %5202 = vmatmul.msk.bf16.vlgmr.msra.gmra.mxu2 %vm360_vm0, %v8263_v26  ;;  %3810 = vmatpush.bf16.msra.mxu0 %v5323_v43  ;;  %v5498_v36 = vld [vmem:[#allocation8 + $0x240] sm:$0xf]  ;;  %v7491_v37 = vld [vmem:[#allocation8 + $0x24c] sm:$0xf0]  ;;  %v5371_v41 = vor.u32 %v7459_v34, %v5370_v32 }
  0x4c   :  { %5203 = vmatmul.msk.bf16.vlgmr.msra.gmra.mxu3 %vm360_vm0, %v8263_v26  ;;  %3823 = vmatpush.bf16.msra.mxu1 %v5451_v44  ;;  %v5626_v38 = vld [vmem:[#allocation8 + $0x340] sm:$0xf]  ;;  %v7523_v39 = vld [vmem:[#allocation8 + $0x34c] sm:$0xf0]  ;;  %v5499_v45 = vor.u32 %v7491_v37, %v5498_v36 }
  0x4d   :  { %3836 = vmatpush.bf16.msra.mxu2 %v5579_v48  ;;  %3849 = vmatpush.bf16.msra.mxu3 %v5707_v50  ;;  %v5226_v42 = vld [vmem:[#allocation8 + $0x20] sm:$0xf]  ;;  %v7423_v43 = vld [vmem:[#allocation8 + $0x2c] sm:$0xf0]  ;;  %v5627_v47 = vor.u32 %v7523_v39, %v5626_v38 }
  0x4e   :  { %v5354_v44 = vld [vmem:[#allocation8 + $0x120] sm:$0xf]  ;;  %v7455_v46 = vld [vmem:[#allocation8 + $0x12c] sm:$0xf0]  ;;  %v5227_v52 = vor.u32 %v7423_v43, %v5226_v42 }
  0x4f   :  { %3811 = vmatpush.bf16.msra.mxu0 %v5307_v55  ;;  %v5482_v48 = vld [vmem:[#allocation8 + $0x220] sm:$0xf]  ;;  %v7487_v49 = vld [vmem:[#allocation8 + $0x22c] sm:$0xf0]  ;;  %v5355_v54 = vor.u32 %v7455_v46, %v5354_v44 }
  0x50   :  { %3824 = vmatpush.bf16.msra.mxu1 %v5435_v56  ;;  %v5610_v50 = vld [vmem:[#allocation8 + $0x320] sm:$0xf]  ;;  %v7519_v51 = vld [vmem:[#allocation8 + $0x32c] sm:$0xf0]  ;;  %v5483_v58 = vor.u32 %v7487_v49, %v5482_v48 }
  0x51   :  { %3837 = vmatpush.bf16.msra.mxu2 %v5563_v60  ;;  %3850 = vmatpush.bf16.msra.mxu3 %v5691_v62  ;;  %v5210_v53 = vld [vmem:[#allocation8] sm:$0xf]  ;;  %v7451_v56 = vld [vmem:[#allocation8 + $0x10c] sm:$0xf0]  ;;  %v5611_v62 = vor.u32 %v7519_v51, %v5610_v50 }
  0x52   :  { %v5338_v55 = vld [vmem:[#allocation8 + $0x100] sm:$0xf]  ;;  %v7575_v59 = vld [vmem:[#allocation8 + $0x4ec] sm:$0xf0] }
  0x53   :  { %3812 = vmatpush.bf16.msra.mxu0 %v5291_v3  ;;  %v5834_v57 = vld [vmem:[#allocation8 + $0x4e0] sm:$0xf]  ;;  %v7607_v61 = vld [vmem:[#allocation8 + $0x5ec] sm:$0xf0]  ;;  %v5339_v6 = vor.u32 %v7451_v56, %v5338_v55 }
  0x54   :  { %3825 = vmatpush.bf16.msra.mxu1 %v5419_v4  ;;  %v5962_v60 = vld [vmem:[#allocation8 + $0x5e0] sm:$0xf]  ;;  %v7483_v0 = vld [vmem:[#allocation8 + $0x20c] sm:$0xf0]  ;;  %v5835_v7 = vor.u32 %v7575_v59, %v5834_v57 }
  0x55   :  { %3838 = vmatpush.bf16.msra.mxu2 %v5547_v8  ;;  %3851 = vmatpush.bf16.msra.mxu3 %v5675_v10  ;;  %v5466_v63 = vld [vmem:[#allocation8 + $0x200] sm:$0xf]  ;;  %v7515_v3 = vld [vmem:[#allocation8 + $0x30c] sm:$0xf0]  ;;  %v5963_v10 = vor.u32 %v7607_v61, %v5962_v60 }
  0x56   :  { %v5594_v1 = vld [vmem:[#allocation8 + $0x300] sm:$0xf]  ;;  %v7639_v5 = vld [vmem:[#allocation8 + $0x6ec] sm:$0xf0]  ;;  %v5467_v13 = vor.u32 %v7483_v0, %v5466_v63 }
  0x57   :  { %3813 = vmatpush.bf16.msra.mxu0 %v5275_v15  ;;  %v6090_v4 = vld [vmem:[#allocation8 + $0x6e0] sm:$0xf]  ;;  %v7671_v9 = vld [vmem:[#allocation8 + $0x7ec] sm:$0xf0] }
  0x58   :  { %3826 = vmatpush.bf16.msra.mxu1 %v5403_v16  ;;  %v6218_v8 = vld [vmem:[#allocation8 + $0x7e0] sm:$0xf]  ;;  %v7571_v12 = vld [vmem:[#allocation8 + $0x4cc] sm:$0xf0]  ;;  %v5595_v16 = vor.u32 %v7515_v3, %v5594_v1  ;;  %v6091_v17 = vor.u32 %v7639_v5, %v6090_v4 }
  0x59   :  { %3839 = vmatpush.bf16.msra.mxu2 %v5531_v20  ;;  %3852 = vmatpush.bf16.msra.mxu3 %v5659_v22  ;;  %v5818_v11 = vld [vmem:[#allocation8 + $0x4c0] sm:$0xf]  ;;  %v7603_v15 = vld [vmem:[#allocation8 + $0x5cc] sm:$0xf0]  ;;  %v6219_v18 = vor.u32 %v7671_v9, %v6218_v8 }
  0x5a   :  { %5204 = vmatmul.msk.bf16.vlgmr.msrb.gmra.mxu0 %vm360_vm0, %v8263_v26  ;;  %5205 = vmatmul.msk.bf16.vlgmr.msrb.gmra.mxu1 %vm360_vm0, %v8263_v26  ;;  %v5946_v14 = vld [vmem:[#allocation8 + $0x5c0] sm:$0xf]  ;;  %v7635_v20 = vld [vmem:[#allocation8 + $0x6cc] sm:$0xf0]  ;;  %v5819_v21 = vor.u32 %v7571_v12, %v5818_v11 }
  0x5b   :  { %5206 = vmatmul.msk.bf16.vlgmr.msrb.gmra.mxu2 %vm360_vm0, %v8263_v26  ;;  %3814 = vmatpush.bf16.msra.mxu0 %v5259_v28  ;;  %v6074_v19 = vld [vmem:[#allocation8 + $0x6c0] sm:$0xf]  ;;  %v7667_v23 = vld [vmem:[#allocation8 + $0x7cc] sm:$0xf0]  ;;  %v5947_v24 = vor.u32 %v7603_v15, %v5946_v14 }
  0x5c   :  { %5207 = vmatmul.msk.bf16.vlgmr.msrb.gmra.mxu3 %vm360_vm0, %v8263_v26  ;;  %3827 = vmatpush.bf16.msra.mxu1 %v5387_v29  ;;  %v7419_v26 = vld [vmem:[#allocation8 + $0xc] sm:$0xf0]  ;;  %v6202_v22 = vld [vmem:[#allocation8 + $0x7c0] sm:$0xf]  ;;  %v6075_v30 = vor.u32 %v7635_v20, %v6074_v19 }
  0x5d   :  { %3840 = vmatpush.bf16.msra.mxu2 %v5515_v33  ;;  %3853 = vmatpush.bf16.msra.mxu3 %v5643_v35  ;;  %v5211_v2 = vor.u32 %v7419_v26, %v5210_v53  ;;  %v5802_v25 = vld [vmem:[#allocation8 + $0x4a0] sm:$0xf]  ;;  %v7567_v27 = vld [vmem:[#allocation8 + $0x4ac] sm:$0xf0]  ;;  %v6203_v31 = vor.u32 %v7667_v23, %v6202_v22 }
  0x5e   :  { %v5930_v28 = vld [vmem:[#allocation8 + $0x5a0] sm:$0xf]  ;;  %v7599_v29 = vld [vmem:[#allocation8 + $0x5ac] sm:$0xf0]  ;;  %v5803_v34 = vor.u32 %v7567_v27, %v5802_v25 }
  0x5f   :  { %3815 = vmatpush.bf16.msra.mxu0 %v5243_v40  ;;  %v6058_v32 = vld [vmem:[#allocation8 + $0x6a0] sm:$0xf]  ;;  %v7631_v33 = vld [vmem:[#allocation8 + $0x6ac] sm:$0xf0]  ;;  %v5931_v37 = vor.u32 %v7599_v29, %v5930_v28 }
  0x60   :  { %3828 = vmatpush.bf16.msra.mxu1 %v5371_v41  ;;  %v6186_v35 = vld [vmem:[#allocation8 + $0x7a0] sm:$0xf]  ;;  %v7663_v36 = vld [vmem:[#allocation8 + $0x7ac] sm:$0xf0]  ;;  %v6059_v42 = vor.u32 %v7631_v33, %v6058_v32 }
  0x61   :  { %3841 = vmatpush.bf16.msra.mxu2 %v5499_v45  ;;  %3854 = vmatpush.bf16.msra.mxu3 %v5627_v47  ;;  %v5786_v38 = vld [vmem:[#allocation8 + $0x480] sm:$0xf]  ;;  %v7563_v39 = vld [vmem:[#allocation8 + $0x48c] sm:$0xf0]  ;;  %v6187_v43 = vor.u32 %v7663_v36, %v6186_v35 }
  0x62   :  { %v5914_v40 = vld [vmem:[#allocation8 + $0x580] sm:$0xf]  ;;  %v7595_v41 = vld [vmem:[#allocation8 + $0x58c] sm:$0xf0]  ;;  %v5787_v44 = vor.u32 %v7563_v39, %v5786_v38 }
  0x63   :  { %3816 = vmatpush.bf16.msra.mxu0 %v5227_v52  ;;  %v5915_v45 = vor.u32 %v7595_v41, %v5914_v40  ;;  %v5770_v46 = vld [vmem:[#allocation8 + $0x460] sm:$0xf]  ;;  %v7559_v47 = vld [vmem:[#allocation8 + $0x46c] sm:$0xf0] }
  0x64   :  { %3829 = vmatpush.bf16.msra.mxu1 %v5355_v54  ;;  %v5898_v48 = vld [vmem:[#allocation8 + $0x560] sm:$0xf]  ;;  %v5771_v49 = vor.u32 %v7559_v47, %v5770_v46  ;;  %v7591_v50 = vld [vmem:[#allocation8 + $0x56c] sm:$0xf0] }
  0x65   :  { %3842 = vmatpush.bf16.msra.mxu2 %v5483_v58  ;;  %3855 = vmatpush.bf16.msra.mxu3 %v5611_v62  ;;  %v5899_v51 = vor.u32 %v7591_v50, %v5898_v48  ;;  %v6042_v52 = vld [vmem:[#allocation8 + $0x680] sm:$0xf]  ;;  %v7627_v53 = vld [vmem:[#allocation8 + $0x68c] sm:$0xf0] }
  0x66   :  { %v6043_v26 = vor.u32 %v7627_v53, %v6042_v52  ;;  %v6170_v54 = vld [vmem:[#allocation8 + $0x780] sm:$0xf]  ;;  %v7659_v55 = vld [vmem:[#allocation8 + $0x78c] sm:$0xf0] }
  0x67   :  { %3817 = vmatpush.bf16.msra.mxu0 %v5211_v2  ;;  %v6171_v56 = vor.u32 %v7659_v55, %v6170_v54  ;;  %v5754_v57 = vld [vmem:[#allocation8 + $0x440] sm:$0xf]  ;;  %v7555_v58 = vld [vmem:[#allocation8 + $0x44c] sm:$0xf0] }
  0x68   :  { %3830 = vmatpush.bf16.msra.mxu1 %v5339_v6  ;;  %v5755_v59 = vor.u32 %v7555_v58, %v5754_v57  ;;  %v5882_v60 = vld [vmem:[#allocation8 + $0x540] sm:$0xf]  ;;  %v7587_v61 = vld [vmem:[#allocation8 + $0x54c] sm:$0xf0] }
  0x69   :  { %3843 = vmatpush.bf16.msra.mxu2 %v5467_v13  ;;  %3856 = vmatpush.bf16.msra.mxu3 %v5595_v16  ;;  %v5883_v62 = vor.u32 %v7587_v61, %v5882_v60  ;;  %v6026_v63 = vld [vmem:[#allocation8 + $0x660] sm:$0xf]  ;;  %v7623_v0 = vld [vmem:[#allocation8 + $0x66c] sm:$0xf0] }
  0x6a   :  { %v6154_v1 = vld [vmem:[#allocation8 + $0x760] sm:$0xf]  ;;  %v6027_v2 = vor.u32 %v7623_v0, %v6026_v63  ;;  %v7655_v3 = vld [vmem:[#allocation8 + $0x76c] sm:$0xf0] }
  0x6b   :  { %3862 = vmatpush.bf16.msrb.mxu0 %v5835_v7  ;;  %v6155_v4 = vor.u32 %v7655_v3, %v6154_v1  ;;  %v5738_v5 = vld [vmem:[#allocation8 + $0x420] sm:$0xf]  ;;  %v7551_v6 = vld [vmem:[#allocation8 + $0x42c] sm:$0xf0] }
  0x6c   :  { %3875 = vmatpush.bf16.msrb.mxu1 %v5963_v10  ;;  %v5866_v7 = vld [vmem:[#allocation8 + $0x520] sm:$0xf]  ;;  %v5739_v8 = vor.u32 %v7551_v6, %v5738_v5  ;;  %v7583_v9 = vld [vmem:[#allocation8 + $0x52c] sm:$0xf0] }
  0x6d   :  { %3888 = vmatpush.bf16.msrb.mxu2 %v6091_v17  ;;  %3901 = vmatpush.bf16.msrb.mxu3 %v6219_v18  ;;  %v6010_v10 = vld [vmem:[#allocation8 + $0x640] sm:$0xf]  ;;  %v7619_v11 = vld [vmem:[#allocation8 + $0x64c] sm:$0xf0]  ;;  %v5867_v12 = vor.u32 %v7583_v9, %v5866_v7 }
  0x6e   :  { %v6011_v13 = vor.u32 %v7619_v11, %v6010_v10  ;;  %v6138_v14 = vld [vmem:[#allocation8 + $0x740] sm:$0xf]  ;;  %v7651_v15 = vld [vmem:[#allocation8 + $0x74c] sm:$0xf0] }
  0x6f   :  { %3863 = vmatpush.bf16.msrb.mxu0 %v5819_v21  ;;  %v6139_v16 = vor.u32 %v7651_v15, %v6138_v14  ;;  %v5722_v17 = vld [vmem:[#allocation8 + $0x400] sm:$0xf]  ;;  %v7547_v18 = vld [vmem:[#allocation8 + $0x40c] sm:$0xf0] }
  0x70   :  { %3876 = vmatpush.bf16.msrb.mxu1 %v5947_v24  ;;  %v5723_v19 = vor.u32 %v7547_v18, %v5722_v17  ;;  %v5850_v20 = vld [vmem:[#allocation8 + $0x500] sm:$0xf]  ;;  %v7579_v21 = vld [vmem:[#allocation8 + $0x50c] sm:$0xf0] }
  0x71   :  { %3889 = vmatpush.bf16.msrb.mxu2 %v6075_v30  ;;  %3902 = vmatpush.bf16.msrb.mxu3 %v6203_v31  ;;  %v5851_v22 = vor.u32 %v7579_v21, %v5850_v20  ;;  %v5994_v23 = vld [vmem:[#allocation8 + $0x620] sm:$0xf]  ;;  %v7615_v24 = vld [vmem:[#allocation8 + $0x62c] sm:$0xf0] }
  0x72   :  { %v6122_v25 = vld [vmem:[#allocation8 + $0x720] sm:$0xf]  ;;  %v7647_v27 = vld [vmem:[#allocation8 + $0x72c] sm:$0xf0]  ;;  %v5995_v28 = vor.u32 %v7615_v24, %v5994_v23 }
  0x73   :  { %3864 = vmatpush.bf16.msrb.mxu0 %v5803_v34  ;;  %v6123_v29 = vor.u32 %v7647_v27, %v6122_v25  ;;  %v5978_v30 = vld [vmem:[#allocation8 + $0x600] sm:$0xf]  ;;  %v7611_v31 = vld [vmem:[#allocation8 + $0x60c] sm:$0xf0] }
  0x74   :  { %3877 = vmatpush.bf16.msrb.mxu1 %v5931_v37  ;;  %v6106_v32 = vld [vmem:[#allocation8 + $0x700] sm:$0xf]  ;;  %v7643_v33 = vld [vmem:[#allocation8 + $0x70c] sm:$0xf0]  ;;  %v5979_v34 = vor.u32 %v7611_v31, %v5978_v30 }
  0x75   :  { %3890 = vmatpush.bf16.msrb.mxu2 %v6059_v42  ;;  %3903 = vmatpush.bf16.msrb.mxu3 %v6187_v43  ;;  %v6107_v35 = vor.u32 %v7643_v33, %v6106_v32  ;;  %v8297_v36 = vld [vmem:[#allocation7] ss:$4 sm:$0xff]  ;;  %v8300_v38 = vld [vmem:[#allocation7 + $0x1] ss:$4 sm:$0xff]  ;;  %v8303_v41 = vld [vmem:[#allocation7 + $0x2] ss:$4 sm:$0xff] }
  0x76   :  { %v168_v37 = vperm.slane %v8297_v36, 0  ;;  %v169_v39 = vperm.slane %v8297_v36, 1  ;;  %v594_v43 = vperm.slane %v8300_v38, 0  ;;  %v595_v46 = vperm.slane %v8300_v38, 1  ;;  %v7703_v57 = vld [vmem:[#allocation8 + $0x8ec] sm:$0xf0] }
  0x77   :  { %3865 = vmatpush.bf16.msrb.mxu0 %v5787_v44  ;;  %v648_v48 = vperm.slane %v8303_v41, 0  ;;  %v649_v50 = vperm.slane %v8303_v41, 1  ;;  %v171_v53 = vperm.slane %v8297_v36, 3  ;;  %v596_v60 = vperm.slane %v8300_v38, 2  ;;  %v6474_v63 = vld [vmem:[#allocation8 + $0x9e0] sm:$0xf] }
  0x78   :  { %3878 = vmatpush.bf16.msrb.mxu1 %v5915_v45  ;;  %v7735_v0 = vld [vmem:[#allocation8 + $0x9ec] sm:$0xf0]  ;;  %v597_v3 = vperm.slane %v8300_v38, 3  ;;  %v650_v7 = vperm.slane %v8303_v41, 2  ;;  %v651_v11 = vperm.slane %v8303_v41, 3  ;;  %v172_v17 = vperm.slane %v8297_v36, 4 }
  0x79   :  { %3891 = vmatpush.bf16.msrb.mxu2 %v6043_v26  ;;  %3904 = vmatpush.bf16.msrb.mxu3 %v6171_v56  ;;  %v6346_v56 = vld [vmem:[#allocation8 + $0x8e0] sm:$0xf]  ;;  %v7699_v14 = vld [vmem:[#allocation8 + $0x8cc] sm:$0xf0]  ;;  %v173_v20 = vperm.slane %v8297_v36, 5  ;;  %v598_v33 = vperm.slane %v8300_v38, 4 }
  0x7a   :  { %v6458_v18 = vld [vmem:[#allocation8 + $0x9c0] sm:$0xf]  ;;  %v7767_v23 = vld [vmem:[#allocation8 + $0xaec] sm:$0xf0] }
  0x7b   :  { %3866 = vmatpush.bf16.msrb.mxu0 %v5771_v49  ;;  %v6730_v24 = vld [vmem:[#allocation8 + $0xbe0] sm:$0xf]  ;;  %v7695_v30 = vld [vmem:[#allocation8 + $0x8ac] sm:$0xf0] }
  0x7c   :  { %3879 = vmatpush.bf16.msrb.mxu1 %v5899_v51  ;;  %v170_v51 = vperm.slane %v8297_v36, 2 }
  0x7d   :  { %3892 = vmatpush.bf16.msrb.mxu2 %v6027_v2  ;;  %3905 = vmatpush.bf16.msrb.mxu3 %v6155_v4 }
  0x7f   :  { %3867 = vmatpush.bf16.msrb.mxu0 %v5755_v59 }
  0x80   :  { %3880 = vmatpush.bf16.msrb.mxu1 %v5883_v62 }
  0x81   :  { %3893 = vmatpush.bf16.msrb.mxu2 %v6011_v13  ;;  %3906 = vmatpush.bf16.msrb.mxu3 %v6139_v16  ;;  %v6330_v13 = vld [vmem:[#allocation8 + $0x8c0] sm:$0xf] }
  0x82   :  { %v6331_v27 = vor.u32 %v7699_v14, %v6330_v13  ;;  %v6282_v14 = vld [vmem:[#allocation8 + $0x860] sm:$0xf] }
  0x83   :  { %3868 = vmatpush.bf16.msrb.mxu0 %v5739_v8  ;;  %v6347_v8 = vor.u32 %v7703_v57, %v6346_v56  ;;  %v7795_v56 = vld [vmem:[#allocation8 + $0xbcc] sm:$0xf0] }
  0x84   :  { %3881 = vmatpush.bf16.msrb.mxu1 %v5867_v12  ;;  %v6475_v12 = vor.u32 %v7735_v0, %v6474_v63  ;;  %v175_v0 = vperm.slane %v8297_v36, 7 }
  0x85   :  { %3894 = vmatpush.bf16.msrb.mxu2 %v5995_v28  ;;  %3907 = vmatpush.bf16.msrb.mxu3 %v6123_v29  ;;  %v7799_v28 = vld [vmem:[#allocation8 + $0xbec] sm:$0xf0]  ;;  %v6314_v29 = vld [vmem:[#allocation8 + $0x8a0] sm:$0xf] }
  0x87   :  { %3869 = vmatpush.bf16.msrb.mxu0 %v5723_v19  ;;  %v7731_v19 = vld [vmem:[#allocation8 + $0x9cc] sm:$0xf0] }
  0x88   :  { %3882 = vmatpush.bf16.msrb.mxu1 %v5851_v22  ;;  %v6602_v22 = vld [vmem:[#allocation8 + $0xae0] sm:$0xf] }
  0x89   :  { %3895 = vmatpush.bf16.msrb.mxu2 %v5979_v34  ;;  %3908 = vmatpush.bf16.msrb.mxu3 %v6107_v35  ;;  %v6459_v34 = vor.u32 %v7731_v19, %v6458_v18  ;;  %v7687_v19 = vld [vmem:[#allocation8 + $0x86c] sm:$0xf0] }
  0xa7   :  { %v373_v40 = vpop.f32.mrf.mxu0  ;;  %v386_v44 = vpop.f32.mrf.mxu1 }
  0xa8   :  { %v374_v42 = vadd.f32 %v373_v40, %v168_v37  ;;  %v387_v45 = vadd.f32 %v386_v44, %v169_v39  ;;  %v652_v40 = vperm.slane %v8303_v41, 4  ;;  %v7727_v44 = vld [vmem:[#allocation8 + $0x9ac] sm:$0xf0] }
  0xaa   :  { %v572_v47 = vmax.f32 %v374_v42, 0.0  ;;  %v573_v49 = vmax.f32 %v387_v45, 0.0  ;;  %v6603_v42 = vor.u32 %v7767_v23, %v6602_v22 }
  0xac   :  { %v626_v52 = vmul.f32 %v594_v43, %v572_v47  ;;  %v627_v26 = vmul.f32 %v595_v46, %v573_v49  ;;  %v6442_v43 = vld [vmem:[#allocation8 + $0x9a0] sm:$0xf]  ;;  %v6315_v49 = vor.u32 %v7695_v30, %v6314_v29 }
  0xad   :  { %v8339_v29 = vld [vmem:[#allocation8 + $0xb80] sm:$0xf] }
  0xae   :  { %v680_v54 = vadd.f32 %v648_v48, %v626_v52  ;;  %v399_v55 = vpop.f32.mrf.mxu2  ;;  %v681_v58 = vadd.f32 %v649_v50, %v627_v26  ;;  %v6731_v48 = vor.u32 %v7799_v28, %v6730_v24  ;;  %v6586_v50 = vld [vmem:[#allocation8 + $0xac0] sm:$0xf]  ;;  %v599_v26 = vperm.slane %v8300_v38, 5  ;;  %v7755_v28 = vld [vmem:[#allocation8 + $0xa8c] sm:$0xf0] }
  0xaf   :  { %v400_v59 = vadd.f32 %v399_v55, %v170_v51  ;;  %v412_v61 = vpop.f32.mrf.mxu3  ;;  %v375_v62 = vpop.f32.mrf.mxu0  ;;  %v7763_v51 = vld [vmem:[#allocation8 + $0xacc] sm:$0xf0]  ;;  %v6714_v55 = vld [vmem:[#allocation8 + $0xbc0] sm:$0xf] }
  0xb0   :  { %v696_v1 = vmax.f32 %v680_v54, 0.0  ;;  %v413_v2 = vadd.f32 %v412_v61, %v171_v53  ;;  %v388_v4 = vpop.f32.mrf.mxu1  ;;  %v697_v5 = vmax.f32 %v681_v58, 0.0  ;;  %v174_v54 = vperm.slane %v8297_v36, 6  ;;  %v6298_v61 = vld [vmem:[#allocation8 + $0x880] sm:$0xf] }
  0xb1   :  { %v574_v6 = vmax.f32 %v400_v59, 0.0  ;;  %v653_v59 = vperm.slane %v8303_v41, 5  ;;  %v7691_v62 = vld [vmem:[#allocation8 + $0x88c] sm:$0xf0]  ;;  %v6587_v4 = vor.u32 %v7763_v51, %v6586_v50 }
  0xb2   :  { %v8314_v9 = vpack.c.bf16 %v696_v1, %v696_v1  ;;  %v575_v10 = vmax.f32 %v413_v2, 0.0  ;;  %v8317_v15 = vpack.c.bf16 %v697_v5, %v697_v5  ;;  %v6426_v1 = vld [vmem:[#allocation8 + $0x980] sm:$0xf]  ;;  %v7723_v2 = vld [vmem:[#allocation8 + $0x98c] sm:$0xf0]  ;;  %v6715_v5 = vor.u32 %v7795_v56, %v6714_v55 }
  0xb3   :  { %v628_v16 = vmul.f32 %v596_v60, %v574_v6  ;;  %v6443_v60 = vor.u32 %v7727_v44, %v6442_v43  ;;  %v6570_v6 = vld [vmem:[#allocation8 + $0xaa0] sm:$0xf]  ;;  %v6299_v13 = vor.u32 %v7691_v62, %v6298_v61  ;;  %v7791_v36 = vld [vmem:[#allocation8 + $0xbac] sm:$0xf0]  ;;  %v6427_v18 = vor.u32 %v7723_v2, %v6426_v1 }
  0xb4   :  { %v629_v21 = vmul.f32 %v597_v3, %v575_v10  ;;  %3818 = vmatmul.bf16.vlgmr.msra.gmra.mxu0 %v8314_v9  ;;  %3831 = vmatmul.bf16.vlgmr.msra.gmra.mxu1 %v8317_v15  ;;  %v6283_v43 = vor.u32 %v7687_v19, %v6282_v14  ;;  %v8344_v44 = vld [vmem:[#allocation7 + $0x21] ss:$4 sm:$0xff] }
  0xb5   :  { %v682_v25 = vadd.f32 %v650_v7, %v628_v16  ;;  %3914 = vmatpush.bf16.msra.mxu0 %v6347_v8  ;;  %3927 = vmatpush.bf16.msra.mxu1 %v6475_v12  ;;  %v7759_v7 = vld [vmem:[#allocation8 + $0xaac] sm:$0xf0]  ;;  %v6698_v8 = vld [vmem:[#allocation8 + $0xba0] sm:$0xf]  ;;  %v654_v12 = vperm.slane %v8303_v41, 6 }
  0xb6   :  { %v683_v31 = vadd.f32 %v651_v11, %v629_v21  ;;  %v401_v32 = vpop.f32.mrf.mxu2  ;;  %v600_v11 = vperm.slane %v8300_v38, 6  ;;  %v7719_v21 = vld [vmem:[#allocation8 + $0x96c] sm:$0xf0]  ;;  %v6666_v2 = vld [vmem:[#allocation8 + $0xb60] sm:$0xf] }
  0xb7   :  { %v698_v35 = vmax.f32 %v682_v25, 0.0  ;;  %v414_v37 = vpop.f32.mrf.mxu3  ;;  %v425_v39 = vpop.f32.mrf.mxu0  ;;  %v601_v32 = vperm.slane %v8300_v38, 7  ;;  %v7683_v50 = vld [vmem:[#allocation8 + $0x84c] sm:$0xf0] }
  0xb8   :  { %v699_v45 = vmax.f32 %v683_v31, 0.0  ;;  %v426_v46 = vadd.f32 %v425_v39, %v172_v17  ;;  %v438_v47 = vpop.f32.mrf.mxu1  ;;  %v8342_v37 = vld [vmem:[#allocation7 + $0x20] ss:$4 sm:$0xff] }
  0xb9   :  { %v8325_v52 = vpack.c.bf16 %v698_v35, %v698_v35  ;;  %3915 = vmatpush.bf16.msra.mxu0 %v6331_v27  ;;  %v439_v53 = vadd.f32 %v438_v47, %v173_v20  ;;  %3928 = vmatpush.bf16.msra.mxu1 %v6459_v34  ;;  %v6410_v20 = vld [vmem:[#allocation8 + $0x960] sm:$0xf]  ;;  %v6571_v34 = vor.u32 %v7759_v7, %v6570_v6  ;;  %v7787_v35 = vld [vmem:[#allocation8 + $0xb8c] sm:$0xf0]  ;;  %v177_v1 = vperm.slane %v8342_v37, 1 }
  0xba   :  { %v8329_v57 = vpack.c.bf16 %v699_v45, %v699_v45  ;;  %v576_v58 = vmax.f32 %v426_v46, 0.0  ;;  %v8337_v27 = vld [vmem:[#allocation8 + $0xa80] sm:$0xf]  ;;  %v6411_v38 = vor.u32 %v7719_v21, %v6410_v20  ;;  %v7715_v55 = vld [vmem:[#allocation8 + $0x94c] sm:$0xf0] }
  0xbb   :  { %v577_v63 = vmax.f32 %v439_v53, 0.0  ;;  %3844 = vmatmul.bf16.vlgmr.msra.gmra.mxu2 %v8325_v52  ;;  %v6266_v45 = vld [vmem:[#allocation8 + $0x840] sm:$0xf]  ;;  %v7751_v61 = vld [vmem:[#allocation8 + $0xa6c] sm:$0xf0] }
  0xbc   :  { %v630_v3 = vmul.f32 %v598_v33, %v576_v58  ;;  %3857 = vmatmul.bf16.vlgmr.msra.gmra.mxu3 %v8329_v57  ;;  %3940 = vmatpush.bf16.msra.mxu2 %v6603_v42  ;;  %v6699_v42 = vor.u32 %v7791_v36, %v6698_v8  ;;  %v6683_v58 = vor.u32 %v7787_v35, %v8339_v29  ;;  %v6250_v7 = vld [vmem:[#allocation8 + $0x820] sm:$0xf]  ;;  %v7679_v8 = vld [vmem:[#allocation8 + $0x82c] sm:$0xf0]  ;;  %v603_v36 = vperm.slane %v8344_v44, 1 }
  0xbd   :  { %v631_v10 = vmul.f32 %v599_v26, %v577_v63  ;;  %3953 = vmatpush.bf16.msra.mxu3 %v6731_v48  ;;  %3916 = vmatpush.bf16.msra.mxu0 %v6315_v49  ;;  %v655_v48 = vperm.slane %v8303_v41, 7  ;;  %v8349_v49 = vld [vmem:[#allocation7 + $0x22] ss:$4 sm:$0xff]  ;;  %v6555_v26 = vor.u32 %v7755_v28, %v8337_v27  ;;  %v176_v41 = vperm.slane %v8342_v37, 0 }
  0xbe   :  { %v684_v16 = vadd.f32 %v652_v40, %v630_v3  ;;  %3929 = vmatpush.bf16.msra.mxu1 %v6443_v60  ;;  %v451_v17 = vpop.f32.mrf.mxu2  ;;  %v6538_v60 = vld [vmem:[#allocation8 + $0xa60] sm:$0xf]  ;;  %v656_v63 = vperm.slane %v8349_v49, 0  ;;  %v7783_v3 = vld [vmem:[#allocation8 + $0xb6c] sm:$0xf0]  ;;  %v6251_v28 = vor.u32 %v7679_v8, %v6250_v7 }
  0xbf   :  { %v685_v22 = vadd.f32 %v653_v59, %v631_v10  ;;  %v452_v23 = vadd.f32 %v451_v17, %v174_v54  ;;  %v427_v24 = vpop.f32.mrf.mxu0  ;;  %v464_v25 = vpop.f32.mrf.mxu3  ;;  %v6394_v54 = vld [vmem:[#allocation8 + $0x940] sm:$0xf]  ;;  %v602_v59 = vperm.slane %v8344_v44, 0  ;;  %v6539_v14 = vor.u32 %v7751_v61, %v6538_v60  ;;  %v7779_v29 = vld [vmem:[#allocation8 + $0xb4c] sm:$0xf0] }
  0xc0   :  { %v700_v30 = vmax.f32 %v684_v16, 0.0  ;;  %3941 = vmatpush.bf16.msra.mxu2 %v6587_v4  ;;  %v465_v31 = vadd.f32 %v464_v25, %v175_v0  ;;  %v440_v33 = vpop.f32.mrf.mxu1  ;;  %v6267_v0 = vor.u32 %v7683_v50, %v6266_v45  ;;  %v6395_v6 = vor.u32 %v7715_v55, %v6394_v54  ;;  %v6378_v10 = vld [vmem:[#allocation8 + $0x920] sm:$0xf]  ;;  %v7711_v16 = vld [vmem:[#allocation8 + $0x92c] sm:$0xf0] }
  0xc1   :  { %v701_v39 = vmax.f32 %v685_v22, 0.0  ;;  %v578_v40 = vmax.f32 %v452_v23, 0.0  ;;  %3954 = vmatpush.bf16.msra.mxu3 %v6715_v5  ;;  %3917 = vmatpush.bf16.msra.mxu0 %v6299_v13  ;;  %v6522_v17 = vld [vmem:[#allocation8 + $0xa40] sm:$0xf]  ;;  %v6667_v21 = vor.u32 %v7783_v3, %v6666_v2  ;;  %v178_v22 = vperm.slane %v8342_v37, 2 }
  0xc2   :  { %v8346_v46 = vpack.c.bf16 %v700_v30, %v700_v30  ;;  %v579_v47 = vmax.f32 %v465_v31, 0.0  ;;  %3930 = vmatpush.bf16.msra.mxu1 %v6427_v18  ;;  %v7747_v23 = vld [vmem:[#allocation8 + $0xa4c] sm:$0xf0]  ;;  %v8363_v24 = vld [vmem:[#allocation8 + $0xb40] sm:$0xf]  ;;  %v6379_v35 = vor.u32 %v7711_v16, %v6378_v10  ;;  %v658_v50 = vperm.slane %v8349_v49, 2 }
  0xc3   :  { %v8351_v51 = vpack.c.bf16 %v701_v39, %v701_v39  ;;  %v632_v53 = vmul.f32 %v600_v11, %v578_v40  ;;  %v6234_v30 = vld [vmem:[#allocation8 + $0x800] sm:$0xf]  ;;  %v7675_v31 = vld [vmem:[#allocation8 + $0x80c] sm:$0xf0] }
  0xc4   :  { %v633_v56 = vmul.f32 %v601_v32, %v579_v47  ;;  %3942 = vmatpush.bf16.msra.mxu2 %v6571_v34  ;;  %3870 = vmatmul.bf16.vlgmr.msrb.gmra.mxu0 %v8346_v46  ;;  %v657_v34 = vperm.slane %v8349_v49, 1  ;;  %v6362_v39 = vld [vmem:[#allocation8 + $0x900] sm:$0xf]  ;;  %v7707_v40 = vld [vmem:[#allocation8 + $0x90c] sm:$0xf0] }
  0xc5   :  { %v686_v62 = vadd.f32 %v654_v12, %v632_v53  ;;  %3955 = vmatpush.bf16.msra.mxu3 %v6699_v42  ;;  %3918 = vmatpush.bf16.msra.mxu0 %v6283_v43  ;;  %v179_v43 = vperm.slane %v8342_v37, 3  ;;  %v6858_v45 = vld [vmem:[#allocation8 + $0xce0] sm:$0xf]  ;;  %v7831_v47 = vld [vmem:[#allocation8 + $0xcec] sm:$0xf0]  ;;  %v6523_v53 = vor.u32 %v7747_v23, %v6522_v17 }
  0xc6   :  { %v687_v4 = vadd.f32 %v655_v48, %v633_v56  ;;  %3931 = vmatpush.bf16.msra.mxu1 %v6411_v38  ;;  %v453_v5 = vpop.f32.mrf.mxu2  ;;  %v604_v38 = vperm.slane %v8344_v44, 2  ;;  %v7863_v54 = vld [vmem:[#allocation8 + $0xdec] sm:$0xf0]  ;;  %v6651_v56 = vor.u32 %v7779_v29, %v8363_v24  ;;  %v6634_v61 = vld [vmem:[#allocation8 + $0xb20] sm:$0xf]  ;;  %v659_v29 = vperm.slane %v8349_v49, 3 }
  0xc7   :  { %v702_v11 = vmax.f32 %v686_v62, 0.0  ;;  %3883 = vmatmul.bf16.vlgmr.msrb.gmra.mxu1 %v8351_v51  ;;  %v466_v12 = vpop.f32.mrf.mxu3  ;;  %v477_v13 = vpop.f32.mrf.mxu0  ;;  %v7743_v60 = vld [vmem:[#allocation8 + $0xa2c] sm:$0xf0]  ;;  %v6842_v3 = vld [vmem:[#allocation8 + $0xcc0] sm:$0xf] }
  0xc8   :  { %v703_v18 = vmax.f32 %v687_v4, 0.0  ;;  %3943 = vmatpush.bf16.msra.mxu2 %v6555_v26  ;;  %v478_v19 = vadd.f32 %v477_v13, %v176_v41  ;;  %v490_v20 = vpop.f32.mrf.mxu1  ;;  %v6986_v26 = vld [vmem:[#allocation8 + $0xde0] sm:$0xf]  ;;  %v7775_v2 = vld [vmem:[#allocation8 + $0xb2c] sm:$0xf0] }
  0xc9   :  { %v8365_v25 = vpack.c.bf16 %v702_v11, %v702_v11  ;;  %3956 = vmatpush.bf16.msra.mxu3 %v6683_v58  ;;  %3919 = vmatpush.bf16.msra.mxu0 %v6267_v0  ;;  %v491_v27 = vadd.f32 %v490_v20, %v177_v1  ;;  %v6235_v58 = vor.u32 %v7675_v31, %v6234_v30  ;;  %v6506_v41 = vld [vmem:[#allocation8 + $0xa20] sm:$0xf]  ;;  %v7827_v4 = vld [vmem:[#allocation8 + $0xccc] sm:$0xf0] }
  0xca   :  { %v8367_v32 = vpack.c.bf16 %v703_v18, %v703_v18  ;;  %v580_v33 = vmax.f32 %v478_v19, 0.0  ;;  %3932 = vmatpush.bf16.msra.mxu1 %v6395_v6  ;;  %v6363_v0 = vor.u32 %v7707_v40, %v6362_v39  ;;  %v6859_v1 = vor.u32 %v7831_v47, %v6858_v45  ;;  %v6970_v10 = vld [vmem:[#allocation8 + $0xdc0] sm:$0xf]  ;;  %v7859_v11 = vld [vmem:[#allocation8 + $0xdcc] sm:$0xf0] }
  0xcb   :  { %v581_v42 = vmax.f32 %v491_v27, 0.0  ;;  %3896 = vmatmul.bf16.vlgmr.msrb.gmra.mxu2 %v8365_v25  ;;  %v6987_v8 = vor.u32 %v7863_v54, %v6986_v26  ;;  %v6490_v12 = vld [vmem:[#allocation8 + $0xa00] sm:$0xf]  ;;  %v6507_v16 = vor.u32 %v7743_v60, %v6506_v41  ;;  %v7739_v17 = vld [vmem:[#allocation8 + $0xa0c] sm:$0xf0]  ;;  %v6843_v30 = vor.u32 %v7827_v4, %v6842_v3 }
  0xcc   :  { %v634_v48 = vmul.f32 %v602_v59, %v580_v33  ;;  %3944 = vmatpush.bf16.msra.mxu2 %v6539_v14  ;;  %3909 = vmatmul.bf16.vlgmr.msrb.gmra.mxu3 %v8367_v32  ;;  %v6618_v18 = vld [vmem:[#allocation8 + $0xb00] sm:$0xf]  ;;  %v7771_v23 = vld [vmem:[#allocation8 + $0xb0c] sm:$0xf0]  ;;  %v6491_v47 = vor.u32 %v7739_v17, %v6490_v12 }
  0xcd   :  { %v635_v55 = vmul.f32 %v603_v36, %v581_v42  ;;  %3957 = vmatpush.bf16.msra.mxu3 %v6667_v21  ;;  %3920 = vmatpush.bf16.msra.mxu0 %v6251_v28  ;;  %v7114_v24 = vld [vmem:[#allocation8 + $0xee0] sm:$0xf]  ;;  %v7895_v31 = vld [vmem:[#allocation8 + $0xeec] sm:$0xf0]  ;;  %v6619_v54 = vor.u32 %v7771_v23, %v6618_v18 }
  0xce   :  { %v688_v59 = vadd.f32 %v656_v63, %v634_v48  ;;  %3933 = vmatpush.bf16.msra.mxu1 %v6379_v35  ;;  %v503_v62 = vpop.f32.mrf.mxu2  ;;  %v605_v63 = vperm.slane %v8344_v44, 3  ;;  %v7242_v33 = vld [vmem:[#allocation8 + $0xfe0] sm:$0xf]  ;;  %v6971_v35 = vor.u32 %v7859_v11, %v6970_v10  ;;  %v7927_v39 = vld [vmem:[#allocation8 + $0xfec] sm:$0xf0] }
  0xcf   :  { %v689_v5 = vadd.f32 %v657_v34, %v635_v55  ;;  %v504_v6 = vadd.f32 %v503_v62, %v178_v22  ;;  %v516_v7 = vpop.f32.mrf.mxu3  ;;  %v479_v13 = vpop.f32.mrf.mxu0  ;;  %v6635_v22 = vor.u32 %v7775_v2, %v6634_v61  ;;  %v6826_v40 = vld [vmem:[#allocation8 + $0xca0] sm:$0xf]  ;;  %v7823_v42 = vld [vmem:[#allocation8 + $0xcac] sm:$0xf0]  ;;  %v7243_v60 = vor.u32 %v7927_v39, %v7242_v33 }
  0xd0   :  { %v704_v36 = vmax.f32 %v688_v59, 0.0  ;;  %3945 = vmatpush.bf16.msra.mxu2 %v6523_v53  ;;  %v517_v14 = vadd.f32 %v516_v7, %v179_v43  ;;  %v492_v19 = vpop.f32.mrf.mxu1  ;;  %v6954_v48 = vld [vmem:[#allocation8 + $0xda0] sm:$0xf]  ;;  %v7855_v53 = vld [vmem:[#allocation8 + $0xdac] sm:$0xf0]  ;;  %v6827_v61 = vor.u32 %v7823_v42, %v6826_v40  ;;  %v183_v39 = vperm.slane %v8342_v37, 7 }
  0xd1   :  { %v705_v20 = vmax.f32 %v689_v5, 0.0  ;;  %v582_v21 = vmax.f32 %v504_v6, 0.0  ;;  %3958 = vmatpush.bf16.msra.mxu3 %v6651_v56  ;;  %3921 = vmatpush.bf16.msra.mxu0 %v6235_v58  ;;  %v7098_v55 = vld [vmem:[#allocation8 + $0xec0] sm:$0xf]  ;;  %v7891_v56 = vld [vmem:[#allocation8 + $0xecc] sm:$0xf0]  ;;  %v6955_v3 = vor.u32 %v7855_v53, %v6954_v48 }
  0xd2   :  { %v8379_v27 = vpack.c.bf16 %v704_v36, %v704_v36  ;;  %v583_v28 = vmax.f32 %v517_v14, 0.0  ;;  %3934 = vmatpush.bf16.msra.mxu1 %v6363_v0  ;;  %v180_v58 = vperm.slane %v8342_v37, 4  ;;  %v7226_v59 = vld [vmem:[#allocation8 + $0xfc0] sm:$0xf]  ;;  %v7923_v62 = vld [vmem:[#allocation8 + $0xfcc] sm:$0xf0] }
  0xd3   :  { %v636_v34 = vmul.f32 %v604_v38, %v582_v21  ;;  %v8382_v43 = vpack.c.bf16 %v705_v20, %v705_v20  ;;  %v7115_v38 = vor.u32 %v7895_v31, %v7114_v24  ;;  %v7819_v4 = vld [vmem:[#allocation8 + $0xc8c] sm:$0xf0]  ;;  %v6938_v10 = vld [vmem:[#allocation8 + $0xd80] sm:$0xf]  ;;  %v7227_v36 = vor.u32 %v7923_v62, %v7226_v59 }
  0xd4   :  { %v637_v45 = vmul.f32 %v605_v63, %v583_v28  ;;  %3946 = vmatpush.bf16.msra.mxu2 %v6507_v16  ;;  %3922 = vmatmul.bf16.vlgmr.msra.gmra.mxu0 %v8379_v27  ;;  %v7851_v11 = vld [vmem:[#allocation8 + $0xd8c] sm:$0xf0]  ;;  %v7082_v17 = vld [vmem:[#allocation8 + $0xea0] sm:$0xf]  ;;  %v607_v53 = vperm.slane %v8344_v44, 5 }
  0xd5   :  { %3966 = vmatpush.bf16.msrb.mxu0 %v6859_v1  ;;  %v690_v26 = vadd.f32 %v658_v50, %v636_v34  ;;  %3959 = vmatpush.bf16.msra.mxu3 %v6635_v22  ;;  %v181_v1 = vperm.slane %v8342_v37, 5  ;;  %v6810_v50 = vld [vmem:[#allocation8 + $0xc80] sm:$0xf]  ;;  %v7887_v18 = vld [vmem:[#allocation8 + $0xeac] sm:$0xf0]  ;;  %v6939_v21 = vor.u32 %v7851_v11, %v6938_v10  ;;  %v606_v34 = vperm.slane %v8344_v44, 4 }
  0xd6   :  { %3979 = vmatpush.bf16.msrb.mxu1 %v6987_v8  ;;  %v691_v41 = vadd.f32 %v659_v29, %v637_v45  ;;  %v505_v0 = vpop.f32.mrf.mxu2  ;;  %v7099_v8 = vor.u32 %v7891_v56, %v7098_v55  ;;  %v6811_v16 = vor.u32 %v7819_v4, %v6810_v50  ;;  %v7210_v19 = vld [vmem:[#allocation8 + $0xfa0] sm:$0xf]  ;;  %v7919_v22 = vld [vmem:[#allocation8 + $0xfac] sm:$0xf0]  ;;  %v7083_v31 = vor.u32 %v7887_v18, %v7082_v17 }
  0xd7   :  { %v706_v2 = vmax.f32 %v690_v26, 0.0  ;;  %v518_v5 = vpop.f32.mrf.mxu3  ;;  %v529_v6 = vpop.f32.mrf.mxu0  ;;  %3935 = vmatmul.bf16.vlgmr.msra.gmra.mxu1 %v8382_v43  ;;  %v6794_v23 = vld [vmem:[#allocation8 + $0xc60] sm:$0xf]  ;;  %v7815_v24 = vld [vmem:[#allocation8 + $0xc6c] sm:$0xf0]  ;;  %v7211_v40 = vor.u32 %v7919_v22, %v7210_v19  ;;  %v660_v0 = vperm.slane %v8349_v49, 4 }
  0xd8   :  { %v707_v7 = vmax.f32 %v691_v41, 0.0  ;;  %3947 = vmatpush.bf16.msra.mxu2 %v6491_v47  ;;  %v542_v12 = vpop.f32.mrf.mxu1  ;;  %v530_v14 = vadd.f32 %v529_v6, %v180_v58  ;;  %v6922_v28 = vld [vmem:[#allocation8 + $0xd60] sm:$0xf]  ;;  %v7847_v29 = vld [vmem:[#allocation8 + $0xd6c] sm:$0xf0]  ;;  %v6795_v42 = vor.u32 %v7815_v24, %v6794_v23  ;;  %v661_v6 = vperm.slane %v8349_v49, 5 }
  0xd9   :  { %3967 = vmatpush.bf16.msrb.mxu0 %v6843_v30  ;;  %v8390_v13 = vpack.c.bf16 %v706_v2, %v706_v2  ;;  %3960 = vmatpush.bf16.msra.mxu3 %v6619_v54  ;;  %v543_v20 = vadd.f32 %v542_v12, %v181_v1  ;;  %v182_v30 = vperm.slane %v8342_v37, 6  ;;  %v7883_v45 = vld [vmem:[#allocation8 + $0xe8c] sm:$0xf0]  ;;  %v7194_v47 = vld [vmem:[#allocation8 + $0xf80] sm:$0xf]  ;;  %v6923_v54 = vor.u32 %v7847_v29, %v6922_v28 }
  0xda   :  { %3980 = vmatpush.bf16.msrb.mxu1 %v6971_v35  ;;  %v8392_v63 = vpack.c.bf16 %v707_v7, %v707_v7  ;;  %v584_v33 = vmax.f32 %v530_v14, 0.0  ;;  %v7066_v35 = vld [vmem:[#allocation8 + $0xe80] sm:$0xf]  ;;  %v7811_v56 = vld [vmem:[#allocation8 + $0xc4c] sm:$0xf0]  ;;  %v608_v17 = vperm.slane %v8344_v44, 6 }
  0xdb   :  { %3948 = vmatmul.bf16.vlgmr.msra.gmra.mxu2 %v8390_v13  ;;  %v585_v48 = vmax.f32 %v543_v20, 0.0  ;;  %v6778_v55 = vld [vmem:[#allocation8 + $0xc40] sm:$0xf]  ;;  %v7067_v1 = vor.u32 %v7883_v45, %v7066_v35  ;;  %v7911_v11 = vld [vmem:[#allocation8 + $0xf6c] sm:$0xf0]  ;;  %v609_v23 = vperm.slane %v8344_v44, 7 }
  0xdc   :  { %3992 = vmatpush.bf16.msrb.mxu2 %v7115_v38  ;;  %3961 = vmatmul.bf16.vlgmr.msra.gmra.mxu3 %v8392_v63  ;;  %v7915_v38 = vld [vmem:[#allocation8 + $0xf8c] sm:$0xf0]  ;;  %v638_v62 = vmul.f32 %v606_v34, %v584_v33  ;;  %v7050_v2 = vld [vmem:[#allocation8 + $0xe60] sm:$0xf]  ;;  %v6779_v7 = vor.u32 %v7811_v56, %v6778_v55  ;;  %v5324_v44 = vld [vmem:[#allocation8 + $0xf0] sm:$0xf0] }
  0xdd   :  { %4005 = vmatpush.bf16.msrb.mxu3 %v7243_v60  ;;  %3968 = vmatpush.bf16.msrb.mxu0 %v6827_v61  ;;  %v6906_v60 = vld [vmem:[#allocation8 + $0xd40] sm:$0xf]  ;;  %v7843_v61 = vld [vmem:[#allocation8 + $0xd4c] sm:$0xf0]  ;;  %v7195_v4 = vor.u32 %v7915_v38, %v7194_v47  ;;  %v639_v5 = vmul.f32 %v607_v53, %v585_v48  ;;  %v663_v55 = vperm.slane %v8349_v49, 7 }
  0xde   :  { %3981 = vmatpush.bf16.msrb.mxu1 %v6955_v3  ;;  %v555_v26 = vpop.f32.mrf.mxu2  ;;  %v7879_v3 = vld [vmem:[#allocation8 + $0xe6c] sm:$0xf0]  ;;  %v6907_v10 = vor.u32 %v7843_v61, %v6906_v60  ;;  %v6762_v12 = vld [vmem:[#allocation8 + $0xc20] sm:$0xf]  ;;  %v692_v20 = vadd.f32 %v660_v0, %v638_v62 }
  0xdf   :  { %v568_v58 = vpop.f32.mrf.mxu3  ;;  %v531_v41 = vpop.f32.mrf.mxu0  ;;  %v556_v37 = vadd.f32 %v555_v26, %v182_v30  ;;  %v7051_v14 = vor.u32 %v7879_v3, %v7050_v2  ;;  %v6890_v18 = vld [vmem:[#allocation8 + $0xd20] sm:$0xf]  ;;  %v7839_v19 = vld [vmem:[#allocation8 + $0xd2c] sm:$0xf0]  ;;  %v693_v28 = vadd.f32 %v661_v6, %v639_v5  ;;  %v7445_v26 = vld [vmem:[#allocation8 + $0xe4] sm:$0xf] }
  0xe0   :  { %3993 = vmatpush.bf16.msrb.mxu2 %v7099_v8  ;;  %v544_v59 = vpop.f32.mrf.mxu1  ;;  %v569_v50 = vadd.f32 %v568_v58, %v183_v39  ;;  %v7178_v8 = vld [vmem:[#allocation8 + $0xf60] sm:$0xf]  ;;  %v7907_v34 = vld [vmem:[#allocation8 + $0xf4c] sm:$0xf0]  ;;  %v6891_v39 = vor.u32 %v7839_v19, %v6890_v18  ;;  %v7477_v58 = vld [vmem:[#allocation8 + $0x1e4] sm:$0xf] }
  0xe1   :  { %4006 = vmatpush.bf16.msrb.mxu3 %v7227_v36  ;;  %3969 = vmatpush.bf16.msrb.mxu0 %v6811_v16  ;;  %v7807_v36 = vld [vmem:[#allocation8 + $0xc2c] sm:$0xf0]  ;;  %v586_v16 = vmax.f32 %v556_v37, 0.0  ;;  %v7034_v24 = vld [vmem:[#allocation8 + $0xe40] sm:$0xf]  ;;  %v7179_v29 = vor.u32 %v7911_v11, %v7178_v8  ;;  %v709_v60 = vmax.f32 %v693_v28, 0.0 }
  0xe2   :  { %3982 = vmatpush.bf16.msrb.mxu1 %v6939_v21  ;;  %v662_v21 = vperm.slane %v8349_v49, 6  ;;  %v587_v22 = vmax.f32 %v569_v50, 0.0  ;;  %v6763_v30 = vor.u32 %v7807_v36, %v6762_v12  ;;  %v7162_v33 = vld [vmem:[#allocation8 + $0xf40] sm:$0xf]  ;;  %v7835_v53 = vld [vmem:[#allocation8 + $0xd0c] sm:$0xf0] }
  0xe3   :  { %v6874_v45 = vld [vmem:[#allocation8 + $0xd00] sm:$0xf]  ;;  %v640_v48 = vmul.f32 %v608_v17, %v586_v16  ;;  %v5452_v41 = vld [vmem:[#allocation8 + $0x1f0] sm:$0xf0]  ;;  %v7163_v61 = vor.u32 %v7907_v34, %v7162_v33  ;;  %v7871_v62 = vld [vmem:[#allocation8 + $0xe2c] sm:$0xf0] }
  0xe4   :  { %3994 = vmatpush.bf16.msrb.mxu2 %v7083_v31  ;;  %v7875_v31 = vld [vmem:[#allocation8 + $0xe4c] sm:$0xf0]  ;;  %v641_v38 = vmul.f32 %v609_v23, %v587_v22  ;;  %v7018_v59 = vld [vmem:[#allocation8 + $0xe20] sm:$0xf]  ;;  %v6875_v0 = vor.u32 %v7835_v53, %v6874_v45  ;;  %v7441_v5 = vld [vmem:[#allocation8 + $0xc4] sm:$0xf] }
  0xe5   :  { %4007 = vmatpush.bf16.msrb.mxu3 %v7211_v40  ;;  %3970 = vmatpush.bf16.msrb.mxu0 %v6795_v42  ;;  %v6746_v40 = vld [vmem:[#allocation8 + $0xc00] sm:$0xf]  ;;  %v7803_v42 = vld [vmem:[#allocation8 + $0xc0c] sm:$0xf0]  ;;  %v7035_v56 = vor.u32 %v7875_v31, %v7034_v24  ;;  %v694_v50 = vadd.f32 %v662_v21, %v640_v48  ;;  %v5308_v6 = vld [vmem:[#allocation8 + $0xd0] sm:$0xf0] }
  0xe6   :  { %3983 = vmatpush.bf16.msrb.mxu1 %v6923_v54  ;;  %v557_v35 = vpop.f32.mrf.mxu2  ;;  %v708_v54 = vmax.f32 %v692_v20, 0.0  ;;  %v6747_v37 = vor.u32 %v7803_v42, %v6746_v40  ;;  %v7146_v2 = vld [vmem:[#allocation8 + $0xf20] sm:$0xf]  ;;  %v7903_v3 = vld [vmem:[#allocation8 + $0xf2c] sm:$0xf0]  ;;  %v695_v8 = vadd.f32 %v663_v55, %v641_v38  ;;  %v5311_v20 = vor.u32 %v7441_v5, %v5308_v6 }
  0xe7   :  { %v570_v47 = vpop.f32.mrf.mxu3  ;;  %v7473_v49 = vld [vmem:[#allocation8 + $0x1c4] sm:$0xf]  ;;  %v5436_v11 = vld [vmem:[#allocation8 + $0x1d0] sm:$0xf0]  ;;  %v7002_v12 = vld [vmem:[#allocation8 + $0xe00] sm:$0xf]  ;;  %v7147_v16 = vor.u32 %v7903_v3, %v7146_v2 }
  0xe8   :  { %3995 = vmatpush.bf16.msrb.mxu2 %v7067_v1  ;;  %v5327_v1 = vor.u32 %v7445_v26, %v5324_v44  ;;  %v7867_v36 = vld [vmem:[#allocation8 + $0xe0c] sm:$0xf0]  ;;  %v7130_v17 = vld [vmem:[#allocation8 + $0xf00] sm:$0xf]  ;;  %v7509_v19 = vld [vmem:[#allocation8 + $0x2e4] sm:$0xf]  ;;  %v5439_v28 = vor.u32 %v7473_v49, %v5436_v11 }
  0xe9   :  { %4008 = vmatpush.bf16.msrb.mxu3 %v7195_v4  ;;  %3971 = vmatpush.bf16.msrb.mxu0 %v6779_v7  ;;  %v5455_v4 = vor.u32 %v7477_v58, %v5452_v41  ;;  %v8406_v7 = vpack.c.bf16 %v708_v54, %v708_v54  ;;  %v7899_v18 = vld [vmem:[#allocation8 + $0xf0c] sm:$0xf0]  ;;  %v5580_v21 = vld [vmem:[#allocation8 + $0x2f0] sm:$0xf0]  ;;  %v7541_v22 = vld [vmem:[#allocation8 + $0x3e4] sm:$0xf]  ;;  %v7003_v33 = vor.u32 %v7867_v36, %v7002_v12 }
  0xea   :  { %3984 = vmatpush.bf16.msrb.mxu1 %v6907_v10  ;;  %v7019_v10 = vor.u32 %v7871_v62, %v7018_v59  ;;  %v5708_v23 = vld [vmem:[#allocation8 + $0x3f0] sm:$0xf0]  ;;  %v710_v24 = vmax.f32 %v694_v50, 0.0  ;;  %v711_v31 = vmax.f32 %v695_v8, 0.0  ;;  %v7469_v34 = vld [vmem:[#allocation8 + $0x1a4] sm:$0xf]  ;;  %v5583_v40 = vor.u32 %v7509_v19, %v5580_v21 }
  0xeb   :  { %v5420_v35 = vld [vmem:[#allocation8 + $0x1b0] sm:$0xf0]  ;;  %v5711_v42 = vor.u32 %v7541_v22, %v5708_v23  ;;  %v7505_v47 = vld [vmem:[#allocation8 + $0x2c4] sm:$0xf] }
  0xec   :  { %3996 = vmatpush.bf16.msrb.mxu2 %v7051_v14  ;;  %v8408_v14 = vpack.c.bf16 %v709_v60, %v709_v60  ;;  %v5564_v48 = vld [vmem:[#allocation8 + $0x2d0] sm:$0xf0]  ;;  %v7537_v53 = vld [vmem:[#allocation8 + $0x3c4] sm:$0xf]  ;;  %v8412_v26 = vpack.c.bf16 %v710_v24, %v710_v24  ;;  %v5423_v44 = vor.u32 %v7469_v34, %v5420_v35 }
  0xed   :  { %4009 = vmatpush.bf16.msrb.mxu3 %v7179_v29  ;;  %3972 = vmatpush.bf16.msrb.mxu0 %v6763_v30  ;;  %v7437_v29 = vld [vmem:[#allocation8 + $0xa4] sm:$0xf]  ;;  %v5292_v30 = vld [vmem:[#allocation8 + $0xb0] sm:$0xf0]  ;;  %v5567_v60 = vor.u32 %v7505_v47, %v5564_v48 }
  0xee   :  { %3985 = vmatpush.bf16.msrb.mxu1 %v6891_v39  ;;  %v7131_v39 = vor.u32 %v7899_v18, %v7130_v17  ;;  %v5295_v45 = vor.u32 %v7437_v29, %v5292_v30  ;;  %v5692_v54 = vld [vmem:[#allocation8 + $0x3d0] sm:$0xf0]  ;;  %v7433_v38 = vld [vmem:[#allocation8 + $0x84] sm:$0xf] }
  0xef   :  { %v5276_v55 = vld [vmem:[#allocation8 + $0x90] sm:$0xf0]  ;;  %v7465_v58 = vld [vmem:[#allocation8 + $0x184] sm:$0xf] }
  0xf0   :  { %3997 = vmatpush.bf16.msrb.mxu2 %v7035_v56  ;;  %v8414_v56 = vpack.c.bf16 %v711_v31, %v711_v31  ;;  %v5404_v41 = vld [vmem:[#allocation8 + $0x190] sm:$0xf0]  ;;  %v7501_v59 = vld [vmem:[#allocation8 + $0x2a4] sm:$0xf] }
  0xf1   :  { %4010 = vmatpush.bf16.msrb.mxu3 %v7163_v61  ;;  %3973 = vmatpush.bf16.msrb.mxu0 %v6747_v37  ;;  %v5695_v61 = vor.u32 %v7537_v53, %v5692_v54  ;;  %v5279_v37 = vor.u32 %v7433_v38, %v5276_v55  ;;  %v5548_v62 = vld [vmem:[#allocation8 + $0x2b0] sm:$0xf0]  ;;  %v7429_v3 = vld [vmem:[#allocation8 + $0x64] sm:$0xf] }
  0xf2   :  { %3986 = vmatpush.bf16.msrb.mxu1 %v6875_v0  ;;  %v7533_v0 = vld [vmem:[#allocation8 + $0x3a4] sm:$0xf]  ;;  %v5676_v2 = vld [vmem:[#allocation8 + $0x3b0] sm:$0xf0]  ;;  %v5551_v6 = vor.u32 %v7501_v59, %v5548_v62 }
  0xf3   :  { %v5260_v50 = vld [vmem:[#allocation8 + $0x70] sm:$0xf0]  ;;  %v5679_v49 = vor.u32 %v7533_v0, %v5676_v2  ;;  %v7529_v12 = vld [vmem:[#allocation8 + $0x384] sm:$0xf] }
  0xf4   :  { %3998 = vmatpush.bf16.msrb.mxu2 %v7019_v10  ;;  %3974 = vmatmul.bf16.vlgmr.msrb.gmra.mxu0 %v8406_v7  ;;  %v5388_v5 = vld [vmem:[#allocation8 + $0x170] sm:$0xf0]  ;;  %v5263_v8 = vor.u32 %v7429_v3, %v5260_v50  ;;  %v7497_v10 = vld [vmem:[#allocation8 + $0x284] sm:$0xf] }
  0xf5   :  { %4018 = vmatpush.bf16.msra.mxu0 %v5327_v1  ;;  %4011 = vmatpush.bf16.msrb.mxu3 %v7147_v16  ;;  %v5407_v1 = vor.u32 %v7465_v58, %v5404_v41  ;;  %v5532_v11 = vld [vmem:[#allocation8 + $0x290] sm:$0xf0]  ;;  %v7425_v17 = vld [vmem:[#allocation8 + $0x44] sm:$0xf] }
  0xf6   :  { %4031 = vmatpush.bf16.msra.mxu1 %v5455_v4  ;;  %v7461_v4 = vld [vmem:[#allocation8 + $0x164] sm:$0xf]  ;;  %v5660_v16 = vld [vmem:[#allocation8 + $0x390] sm:$0xf0]  ;;  %v5535_v21 = vor.u32 %v7497_v10, %v5532_v11 }
  0xf7   :  { %3987 = vmatmul.bf16.vlgmr.msrb.gmra.mxu1 %v8408_v14  ;;  %v5391_v36 = vor.u32 %v7461_v4, %v5388_v5  ;;  %v5244_v18 = vld [vmem:[#allocation8 + $0x50] sm:$0xf0]  ;;  %v7457_v19 = vld [vmem:[#allocation8 + $0x144] sm:$0xf]  ;;  %v5663_v22 = vor.u32 %v7529_v12, %v5660_v16 }
  0xf8   :  { %3999 = vmatpush.bf16.msrb.mxu2 %v7003_v33  ;;  %v5247_v23 = vor.u32 %v7425_v17, %v5244_v18  ;;  %v7493_v24 = vld [vmem:[#allocation8 + $0x264] sm:$0xf]  ;;  %v5644_v31 = vld [vmem:[#allocation8 + $0x370] sm:$0xf0] }
  0xf9   :  { %4019 = vmatpush.bf16.msra.mxu0 %v5311_v20  ;;  %4012 = vmatpush.bf16.msrb.mxu3 %v7131_v39  ;;  %v5372_v20 = vld [vmem:[#allocation8 + $0x150] sm:$0xf0]  ;;  %v7525_v29 = vld [vmem:[#allocation8 + $0x364] sm:$0xf] }
  0xfa   :  { %4032 = vmatpush.bf16.msra.mxu1 %v5439_v28  ;;  %v5516_v28 = vld [vmem:[#allocation8 + $0x270] sm:$0xf0]  ;;  %v5375_v30 = vor.u32 %v7457_v19, %v5372_v20  ;;  %v7421_v33 = vld [vmem:[#allocation8 + $0x24] sm:$0xf] }
  0xfb   :  { %4000 = vmatmul.bf16.vlgmr.msrb.gmra.mxu2 %v8412_v26  ;;  %v5228_v34 = vld [vmem:[#allocation8 + $0x30] sm:$0xf0]  ;;  %v7453_v35 = vld [vmem:[#allocation8 + $0x124] sm:$0xf] }
  0xfc   :  { %4044 = vmatpush.bf16.msra.mxu2 %v5583_v40  ;;  %4013 = vmatmul.bf16.vlgmr.msrb.gmra.mxu3 %v8414_v56  ;;  %v5356_v39 = vld [vmem:[#allocation8 + $0x130] sm:$0xf0]  ;;  %v5519_v40 = vor.u32 %v7493_v24, %v5516_v28  ;;  %v5231_v47 = vor.u32 %v7421_v33, %v5228_v34  ;;  %v7521_v53 = vld [vmem:[#allocation8 + $0x344] sm:$0xf] }
  0xfd   :  { %4057 = vmatpush.bf16.msra.mxu3 %v5711_v42  ;;  %4020 = vmatpush.bf16.msra.mxu0 %v5295_v45  ;;  %v7489_v42 = vld [vmem:[#allocation8 + $0x244] sm:$0xf]  ;;  %v5647_v45 = vor.u32 %v7525_v29, %v5644_v31  ;;  %v5500_v48 = vld [vmem:[#allocation8 + $0x250] sm:$0xf0]  ;;  %v5359_v54 = vor.u32 %v7453_v35, %v5356_v39 }
  0xfe   :  { %4033 = vmatpush.bf16.msra.mxu1 %v5423_v44  ;;  %v5628_v44 = vld [vmem:[#allocation8 + $0x350] sm:$0xf0]  ;;  %v7417_v38 = vld [vmem:[#allocation8 + $0x4] sm:$0xf] }
  0xff   :  { %v5212_v55 = vld [vmem:[#allocation8 + $0x10] sm:$0xf0]  ;;  %v7449_v58 = vld [vmem:[#allocation8 + $0x104] sm:$0xf]  ;;  %v5631_v0 = vor.u32 %v7521_v53, %v5628_v44 }
 0x100   :  { %4045 = vmatpush.bf16.msra.mxu2 %v5567_v60  ;;  %v5340_v41 = vld [vmem:[#allocation8 + $0x110] sm:$0xf0]  ;;  %v7573_v60 = vld [vmem:[#allocation8 + $0x4e4] sm:$0xf] }
 0x101   :  { %4058 = vmatpush.bf16.msra.mxu3 %v5695_v61  ;;  %4021 = vmatpush.bf16.msra.mxu0 %v5279_v37  ;;  %v5836_v61 = vld [vmem:[#allocation8 + $0x4f0] sm:$0xf0]  ;;  %v5503_v37 = vor.u32 %v7489_v42, %v5500_v48  ;;  %v7605_v59 = vld [vmem:[#allocation8 + $0x5e4] sm:$0xf]  ;;  %v5343_v50 = vor.u32 %v7449_v58, %v5340_v41 }
 0x102   :  { %4034 = vmatpush.bf16.msra.mxu1 %v5407_v1  ;;  %v5964_v62 = vld [vmem:[#allocation8 + $0x5f0] sm:$0xf0]  ;;  %v5215_v1 = vor.u32 %v7417_v38, %v5212_v55  ;;  %v7485_v2 = vld [vmem:[#allocation8 + $0x224] sm:$0xf]  ;;  %v5839_v4 = vor.u32 %v7573_v60, %v5836_v61 }
 0x103   :  { %v5484_v3 = vld [vmem:[#allocation8 + $0x230] sm:$0xf0]  ;;  %v7517_v5 = vld [vmem:[#allocation8 + $0x324] sm:$0xf] }
 0x104   :  { %4046 = vmatpush.bf16.msra.mxu2 %v5551_v6  ;;  %v5612_v6 = vld [vmem:[#allocation8 + $0x330] sm:$0xf0]  ;;  %v5487_v11 = vor.u32 %v7485_v2, %v5484_v3  ;;  %v7601_v12 = vld [vmem:[#allocation8 + $0x5c4] sm:$0xf] }
 0x105   :  { %4059 = vmatpush.bf16.msra.mxu3 %v5679_v49  ;;  %4022 = vmatpush.bf16.msra.mxu0 %v5263_v8  ;;  %v5967_v49 = vor.u32 %v7605_v59, %v5964_v62  ;;  %v7569_v8 = vld [vmem:[#allocation8 + $0x4c4] sm:$0xf]  ;;  %v5820_v10 = vld [vmem:[#allocation8 + $0x4d0] sm:$0xf0]  ;;  %v5615_v17 = vor.u32 %v7517_v5, %v5612_v6 }
 0x106   :  { %4035 = vmatpush.bf16.msra.mxu1 %v5391_v36  ;;  %v5948_v36 = vld [vmem:[#allocation8 + $0x5d0] sm:$0xf0]  ;;  %v7481_v16 = vld [vmem:[#allocation8 + $0x204] sm:$0xf] }
 0x107   :  { %v5468_v18 = vld [vmem:[#allocation8 + $0x210] sm:$0xf0]  ;;  %v7513_v19 = vld [vmem:[#allocation8 + $0x304] sm:$0xf]  ;;  %v5951_v28 = vor.u32 %v7601_v12, %v5948_v36 }
 0x108   :  { %4047 = vmatpush.bf16.msra.mxu2 %v5535_v21  ;;  %v5596_v20 = vld [vmem:[#allocation8 + $0x310] sm:$0xf0]  ;;  %v5823_v21 = vor.u32 %v7569_v8, %v5820_v10  ;;  %v7669_v24 = vld [vmem:[#allocation8 + $0x7e4] sm:$0xf]  ;;  %v5471_v33 = vor.u32 %v7481_v16, %v5468_v18 }
 0x109   :  { %4060 = vmatpush.bf16.msra.mxu3 %v5663_v22  ;;  %4023 = vmatpush.bf16.msra.mxu0 %v5247_v23  ;;  %v7637_v22 = vld [vmem:[#allocation8 + $0x6e4] sm:$0xf]  ;;  %v6092_v23 = vld [vmem:[#allocation8 + $0x6f0] sm:$0xf0]  ;;  %v5599_v39 = vor.u32 %v7513_v19, %v5596_v20 }
 0x10a   :  { %4036 = vmatpush.bf16.msra.mxu1 %v5375_v30  ;;  %v6220_v29 = vld [vmem:[#allocation8 + $0x7f0] sm:$0xf0]  ;;  %v7565_v30 = vld [vmem:[#allocation8 + $0x4a4] sm:$0xf] }
 0x10b   :  { %v5804_v31 = vld [vmem:[#allocation8 + $0x4b0] sm:$0xf0]  ;;  %v7597_v34 = vld [vmem:[#allocation8 + $0x5a4] sm:$0xf]  ;;  %v6223_v42 = vor.u32 %v7669_v24, %v6220_v29 }
 0x10c   :  { %4048 = vmatpush.bf16.msra.mxu2 %v5519_v40  ;;  %v5932_v35 = vld [vmem:[#allocation8 + $0x5b0] sm:$0xf0]  ;;  %v6095_v40 = vor.u32 %v7637_v22, %v6092_v23  ;;  %v7665_v53 = vld [vmem:[#allocation8 + $0x7c4] sm:$0xf] }
 0x10d   :  { %4061 = vmatpush.bf16.msra.mxu3 %v5647_v45  ;;  %4024 = vmatpush.bf16.msra.mxu0 %v5231_v47  ;;  %v5807_v45 = vor.u32 %v7565_v30, %v5804_v31  ;;  %v7633_v47 = vld [vmem:[#allocation8 + $0x6c4] sm:$0xf]  ;;  %v6076_v48 = vld [vmem:[#allocation8 + $0x6d0] sm:$0xf0]  ;;  %v5935_v44 = vor.u32 %v7597_v34, %v5932_v35 }
 0x10e   :  { %4037 = vmatpush.bf16.msra.mxu1 %v5359_v54  ;;  %v6204_v54 = vld [vmem:[#allocation8 + $0x7d0] sm:$0xf0]  ;;  %v7561_v38 = vld [vmem:[#allocation8 + $0x484] sm:$0xf]  ;;  %v6079_v60 = vor.u32 %v7633_v47, %v6076_v48 }
 0x10f   :  { %v5788_v55 = vld [vmem:[#allocation8 + $0x490] sm:$0xf0]  ;;  %v7593_v58 = vld [vmem:[#allocation8 + $0x584] sm:$0xf]  ;;  %v6207_v61 = vor.u32 %v7665_v53, %v6204_v54 }
 0x110   :  { %4049 = vmatpush.bf16.msra.mxu2 %v5503_v37  ;;  %v5916_v41 = vld [vmem:[#allocation8 + $0x590] sm:$0xf0]  ;;  %v5791_v37 = vor.u32 %v7561_v38, %v5788_v55  ;;  %v7629_v59 = vld [vmem:[#allocation8 + $0x6a4] sm:$0xf] }
 0x111   :  { %4062 = vmatpush.bf16.msra.mxu3 %v5631_v0  ;;  %4025 = vmatpush.bf16.msra.mxu0 %v5215_v1  ;;  %v6060_v62 = vld [vmem:[#allocation8 + $0x6b0] sm:$0xf0]  ;;  %v7661_v0 = vld [vmem:[#allocation8 + $0x7a4] sm:$0xf]  ;;  %v5919_v1 = vor.u32 %v7593_v58, %v5916_v41 }
 0x112   :  { %4038 = vmatpush.bf16.msra.mxu1 %v5343_v50  ;;  %v6188_v2 = vld [vmem:[#allocation8 + $0x7b0] sm:$0xf0]  ;;  %v7557_v3 = vld [vmem:[#allocation8 + $0x464] sm:$0xf]  ;;  %v6063_v6 = vor.u32 %v7629_v59, %v6060_v62 }
 0x113   :  { %v5772_v50 = vld [vmem:[#allocation8 + $0x470] sm:$0xf0]  ;;  %v7625_v10 = vld [vmem:[#allocation8 + $0x684] sm:$0xf] }
 0x114   :  { %4050 = vmatpush.bf16.msra.mxu2 %v5487_v11  ;;  %4026 = vmatmul.bf16.vlgmr.msra.gmra.mxu0 %v8314_v9  ;;  %v5900_v5 = vld [vmem:[#allocation8 + $0x570] sm:$0xf0]  ;;  %v5775_v8 = vor.u32 %v7557_v3, %v5772_v50  ;;  %v7657_v12 = vld [vmem:[#allocation8 + $0x784] sm:$0xf] }
 0x115   :  { %4070 = vmatpush.bf16.msrb.mxu0 %v5839_v4  ;;  %4063 = vmatpush.bf16.msra.mxu3 %v5615_v17  ;;  %v7589_v4 = vld [vmem:[#allocation8 + $0x564] sm:$0xf]  ;;  %v6044_v11 = vld [vmem:[#allocation8 + $0x690] sm:$0xf0] }
 0x116   :  { %4083 = vmatpush.bf16.msrb.mxu1 %v5967_v49  ;;  %v6191_v49 = vor.u32 %v7661_v0, %v6188_v2  ;;  %v5903_v36 = vor.u32 %v7589_v4, %v5900_v5  ;;  %v6172_v16 = vld [vmem:[#allocation8 + $0x790] sm:$0xf0]  ;;  %v7553_v17 = vld [vmem:[#allocation8 + $0x444] sm:$0xf] }
 0x117   :  { %4039 = vmatmul.bf16.vlgmr.msra.gmra.mxu1 %v8317_v15  ;;  %v5756_v18 = vld [vmem:[#allocation8 + $0x450] sm:$0xf0]  ;;  %v7585_v19 = vld [vmem:[#allocation8 + $0x544] sm:$0xf]  ;;  %v6175_v22 = vor.u32 %v7657_v12, %v6172_v16 }
 0x118   :  { %4051 = vmatpush.bf16.msra.mxu2 %v5471_v33  ;;  %v5884_v20 = vld [vmem:[#allocation8 + $0x550] sm:$0xf0]  ;;  %v5759_v23 = vor.u32 %v7553_v17, %v5756_v18  ;;  %v7621_v24 = vld [vmem:[#allocation8 + $0x664] sm:$0xf] }
 0x119   :  { %4071 = vmatpush.bf16.msrb.mxu0 %v5823_v21  ;;  %4064 = vmatpush.bf16.msra.mxu3 %v5599_v39  ;;  %v6047_v21 = vor.u32 %v7625_v10, %v6044_v11  ;;  %v7653_v29 = vld [vmem:[#allocation8 + $0x764] sm:$0xf]  ;;  %v5887_v30 = vor.u32 %v7585_v19, %v5884_v20  ;;  %v6156_v31 = vld [vmem:[#allocation8 + $0x770] sm:$0xf0] }
 0x11a   :  { %4084 = vmatpush.bf16.msrb.mxu1 %v5951_v28  ;;  %v6028_v28 = vld [vmem:[#allocation8 + $0x670] sm:$0xf0]  ;;  %v7549_v33 = vld [vmem:[#allocation8 + $0x424] sm:$0xf] }
 0x11b   :  { %4052 = vmatmul.bf16.vlgmr.msra.gmra.mxu2 %v8325_v52  ;;  %v5740_v34 = vld [vmem:[#allocation8 + $0x430] sm:$0xf0]  ;;  %v7581_v35 = vld [vmem:[#allocation8 + $0x524] sm:$0xf] }
 0x11c   :  { %4096 = vmatpush.bf16.msrb.mxu2 %v6095_v40  ;;  %4065 = vmatmul.bf16.vlgmr.msra.gmra.mxu3 %v8329_v57  ;;  %v5868_v39 = vld [vmem:[#allocation8 + $0x530] sm:$0xf0]  ;;  %v6031_v40 = vor.u32 %v7621_v24, %v6028_v28  ;;  %v5743_v47 = vor.u32 %v7549_v33, %v5740_v34  ;;  %v7649_v53 = vld [vmem:[#allocation8 + $0x744] sm:$0xf] }
 0x11d   :  { %4109 = vmatpush.bf16.msrb.mxu3 %v6223_v42  ;;  %4072 = vmatpush.bf16.msrb.mxu0 %v5807_v45  ;;  %v7617_v42 = vld [vmem:[#allocation8 + $0x644] sm:$0xf]  ;;  %v6159_v45 = vor.u32 %v7653_v29, %v6156_v31  ;;  %v6012_v48 = vld [vmem:[#allocation8 + $0x650] sm:$0xf0]  ;;  %v5871_v54 = vor.u32 %v7581_v35, %v5868_v39 }
 0x11e   :  { %4085 = vmatpush.bf16.msrb.mxu1 %v5935_v44  ;;  %v6140_v44 = vld [vmem:[#allocation8 + $0x750] sm:$0xf0]  ;;  %v7545_v38 = vld [vmem:[#allocation8 + $0x404] sm:$0xf] }
 0x11f   :  { %v5724_v55 = vld [vmem:[#allocation8 + $0x410] sm:$0xf0]  ;;  %v7577_v58 = vld [vmem:[#allocation8 + $0x504] sm:$0xf]  ;;  %v6143_v0 = vor.u32 %v7649_v53, %v6140_v44 }
 0x120   :  { %4097 = vmatpush.bf16.msrb.mxu2 %v6079_v60  ;;  %v5852_v41 = vld [vmem:[#allocation8 + $0x510] sm:$0xf0]  ;;  %v7701_v60 = vld [vmem:[#allocation8 + $0x8e4] sm:$0xf] }
 0x121   :  { %4110 = vmatpush.bf16.msrb.mxu3 %v6207_v61  ;;  %4073 = vmatpush.bf16.msrb.mxu0 %v5791_v37  ;;  %v6348_v61 = vld [vmem:[#allocation8 + $0x8f0] sm:$0xf0]  ;;  %v6015_v37 = vor.u32 %v7617_v42, %v6012_v48  ;;  %v7733_v59 = vld [vmem:[#allocation8 + $0x9e4] sm:$0xf]  ;;  %v5855_v50 = vor.u32 %v7577_v58, %v5852_v41 }
 0x122   :  { %4086 = vmatpush.bf16.msrb.mxu1 %v5919_v1  ;;  %v6476_v62 = vld [vmem:[#allocation8 + $0x9f0] sm:$0xf0]  ;;  %v5727_v1 = vor.u32 %v7545_v38, %v5724_v55  ;;  %v7613_v2 = vld [vmem:[#allocation8 + $0x624] sm:$0xf]  ;;  %v6351_v4 = vor.u32 %v7701_v60, %v6348_v61 }
 0x123   :  { %v5996_v3 = vld [vmem:[#allocation8 + $0x630] sm:$0xf0]  ;;  %v7645_v5 = vld [vmem:[#allocation8 + $0x724] sm:$0xf] }
 0x124   :  { %4098 = vmatpush.bf16.msrb.mxu2 %v6063_v6  ;;  %v6124_v6 = vld [vmem:[#allocation8 + $0x730] sm:$0xf0]  ;;  %v7729_v11 = vld [vmem:[#allocation8 + $0x9c4] sm:$0xf]  ;;  %v5999_v12 = vor.u32 %v7613_v2, %v5996_v3 }
 0x125   :  { %4111 = vmatpush.bf16.msrb.mxu3 %v6191_v49  ;;  %4074 = vmatpush.bf16.msrb.mxu0 %v5775_v8  ;;  %v6479_v49 = vor.u32 %v7733_v59, %v6476_v62  ;;  %v7697_v8 = vld [vmem:[#allocation8 + $0x8c4] sm:$0xf]  ;;  %v6332_v10 = vld [vmem:[#allocation8 + $0x8d0] sm:$0xf0]  ;;  %v6127_v18 = vor.u32 %v7645_v5, %v6124_v6 }
 0x126   :  { %4087 = vmatpush.bf16.msrb.mxu1 %v5903_v36  ;;  %v6460_v36 = vld [vmem:[#allocation8 + $0x9d0] sm:$0xf0]  ;;  %v7609_v16 = vld [vmem:[#allocation8 + $0x604] sm:$0xf] }
 0x127   :  { %v5980_v17 = vld [vmem:[#allocation8 + $0x610] sm:$0xf0]  ;;  %v7641_v19 = vld [vmem:[#allocation8 + $0x704] sm:$0xf]  ;;  %v6463_v29 = vor.u32 %v7729_v11, %v6460_v36 }
 0x128   :  { %4099 = vmatpush.bf16.msrb.mxu2 %v6047_v21  ;;  %v6108_v20 = vld [vmem:[#allocation8 + $0x710] sm:$0xf0]  ;;  %v7765_v21 = vld [vmem:[#allocation8 + $0xae4] sm:$0xf]  ;;  %v5983_v34 = vor.u32 %v7609_v16, %v5980_v17 }
 0x129   :  { %4112 = vmatpush.bf16.msrb.mxu3 %v6175_v22  ;;  %4075 = vmatpush.bf16.msrb.mxu0 %v5759_v23  ;;  %v6335_v22 = vor.u32 %v7697_v8, %v6332_v10  ;;  %v6604_v23 = vld [vmem:[#allocation8 + $0xaf0] sm:$0xf0]  ;;  %v7797_v24 = vld [vmem:[#allocation8 + $0xbe4] sm:$0xf] }
 0x12a   :  { %4088 = vmatpush.bf16.msrb.mxu1 %v5887_v30  ;;  %v6732_v28 = vld [vmem:[#allocation8 + $0xbf0] sm:$0xf0]  ;;  %v7693_v30 = vld [vmem:[#allocation8 + $0x8a4] sm:$0xf]  ;;  %v6607_v42 = vor.u32 %v7765_v21, %v6604_v23 }
 0x12b   :  { %v6316_v31 = vld [vmem:[#allocation8 + $0x8b0] sm:$0xf0]  ;;  %v7725_v33 = vld [vmem:[#allocation8 + $0x9a4] sm:$0xf] }
 0x12c   :  { %4100 = vmatpush.bf16.msrb.mxu2 %v6031_v40  ;;  %v6444_v35 = vld [vmem:[#allocation8 + $0x9b0] sm:$0xf0]  ;;  %v8423_v39 = vld [vmem:[#allocation10] ss:$4 sm:$0xf]  ;;  %v6111_v40 = vor.u32 %v7641_v19, %v6108_v20  ;;  %v6319_v48 = vor.u32 %v7693_v30, %v6316_v31 }
 0x12d   :  { %4113 = vmatpush.bf16.msrb.mxu3 %v6159_v45  ;;  %4076 = vmatpush.bf16.msrb.mxu0 %v5743_v47  ;;  %v7761_v45 = vld [vmem:[#allocation8 + $0xac4] sm:$0xf]  ;;  %v6735_v47 = vor.u32 %v7797_v24, %v6732_v28  ;;  %v6588_v53 = vld [vmem:[#allocation8 + $0xad0] sm:$0xf0]  ;;  %v6447_v38 = vor.u32 %v7725_v33, %v6444_v35  ;;  %v1242_v55 = vperm.slane %v8423_v39, 0 }
 0x12e   :  { %4089 = vmatpush.bf16.msrb.mxu1 %v5871_v54  ;;  %v7793_v44 = vld [vmem:[#allocation8 + $0xbc4] sm:$0xf]  ;;  %v6716_v54 = vld [vmem:[#allocation8 + $0xbd0] sm:$0xf0] }
 0x12f   :  { %v7689_v58 = vld [vmem:[#allocation8 + $0x884] sm:$0xf]  ;;  %v6300_v41 = vld [vmem:[#allocation8 + $0x890] sm:$0xf0]  ;;  %v6719_v62 = vor.u32 %v7793_v44, %v6716_v54 }
 0x130   :  { %4101 = vmatpush.bf16.msrb.mxu2 %v6015_v37  ;;  %v7721_v60 = vld [vmem:[#allocation8 + $0x984] sm:$0xf]  ;;  %v6428_v61 = vld [vmem:[#allocation8 + $0x990] sm:$0xf0]  ;;  %v6591_v37 = vor.u32 %v7761_v45, %v6588_v53 }
 0x131   :  { %4114 = vmatpush.bf16.msrb.mxu3 %v6143_v0  ;;  %4077 = vmatpush.bf16.msrb.mxu0 %v5727_v1  ;;  %v3819_v59 = vpop.f32.mrf.mxu0  ;;  %v6303_v0 = vor.u32 %v7689_v58, %v6300_v41  ;;  %v7757_v1 = vld [vmem:[#allocation8 + $0xaa4] sm:$0xf]  ;;  %v6572_v2 = vld [vmem:[#allocation8 + $0xab0] sm:$0xf0]  ;;  %v6431_v5 = vor.u32 %v7721_v60, %v6428_v61 }
 0x132   :  { %4090 = vmatpush.bf16.msrb.mxu1 %v5855_v50  ;;  %v7789_v3 = vld [vmem:[#allocation8 + $0xba4] sm:$0xf]  ;;  %v3820_v50 = vadd.f32 %v3819_v59, %v1242_v55  ;;  %v6700_v6 = vld [vmem:[#allocation8 + $0xbb0] sm:$0xf0]  ;;  %v6575_v36 = vor.u32 %v7757_v1, %v6572_v2 }
 0x133   :  { %v6284_v8 = vld [vmem:[#allocation8 + $0x870] sm:$0xf0]  ;;  %v7717_v10 = vld [vmem:[#allocation8 + $0x964] sm:$0xf]  ;;  %v6703_v16 = vor.u32 %v7789_v3, %v6700_v6 }
 0x134   :  { %4102 = vmatpush.bf16.msrb.mxu2 %v5999_v12  ;;  %4078 = vmatmul.bf16.vlgmr.msrb.gmra.mxu0 %v8346_v46  ;;  %v6412_v11 = vld [vmem:[#allocation8 + $0x970] sm:$0xf0]  ;;  %v7785_v20 = vld [vmem:[#allocation8 + $0xb84] sm:$0xf] }
 0x135   :  { %4122 = vmatpush.bf16.msra.mxu0 %v6351_v4  ;;  %4115 = vmatpush.bf16.msrb.mxu3 %v6127_v18  ;;  %v3832_v4 = vpop.f32.mrf.mxu1  ;;  %v7753_v18 = vld [vmem:[#allocation8 + $0xa84] sm:$0xf]  ;;  %v6556_v19 = vld [vmem:[#allocation8 + $0xa90] sm:$0xf0]  ;;  %v6415_v21 = vor.u32 %v7717_v10, %v6412_v11 }
 0x136   :  { %4135 = vmatpush.bf16.msra.mxu1 %v6479_v49  ;;  %v7685_v49 = vld [vmem:[#allocation8 + $0x864] sm:$0xf]  ;;  %v3833_v12 = vadd.f32 %v3832_v4, %v3820_v50  ;;  %v6268_v24 = vld [vmem:[#allocation8 + $0x850] sm:$0xf0]  ;;  %v6559_v30 = vor.u32 %v7753_v18, %v6556_v19 }
 0x137   :  { %4091 = vmatmul.bf16.vlgmr.msrb.gmra.mxu1 %v8351_v51  ;;  %v6287_v17 = vor.u32 %v7685_v49, %v6284_v8  ;;  %v7681_v23 = vld [vmem:[#allocation8 + $0x844] sm:$0xf]  ;;  %v6252_v44 = vld [vmem:[#allocation8 + $0x830] sm:$0xf0] }
 0x138   :  { %4103 = vmatpush.bf16.msrb.mxu2 %v5983_v34  ;;  %v7713_v28 = vld [vmem:[#allocation8 + $0x944] sm:$0xf]  ;;  %v6271_v34 = vor.u32 %v7681_v23, %v6268_v24  ;;  %v6524_v61 = vld [vmem:[#allocation8 + $0xa50] sm:$0xf0] }
 0x139   :  { %4123 = vmatpush.bf16.msra.mxu0 %v6335_v22  ;;  %4116 = vmatpush.bf16.msrb.mxu3 %v6111_v40  ;;  %v6684_v22 = vld [vmem:[#allocation8 + $0xb90] sm:$0xf0]  ;;  %v3821_v31 = vpop.f32.mrf.mxu0  ;;  %v7749_v35 = vld [vmem:[#allocation8 + $0xa64] sm:$0xf] }
 0x13a   :  { %4136 = vmatpush.bf16.msra.mxu1 %v6463_v29  ;;  %v6396_v29 = vld [vmem:[#allocation8 + $0x950] sm:$0xf0]  ;;  %v6687_v33 = vor.u32 %v7785_v20, %v6684_v22  ;;  %v7677_v53 = vld [vmem:[#allocation8 + $0x824] sm:$0xf] }
 0x13b   :  { %4104 = vmatmul.bf16.vlgmr.msrb.gmra.mxu2 %v8365_v25  ;;  %v6540_v40 = vld [vmem:[#allocation8 + $0xa70] sm:$0xf0]  ;;  %v7709_v54 = vld [vmem:[#allocation8 + $0x924] sm:$0xf]  ;;  %v6255_v60 = vor.u32 %v7677_v53, %v6252_v44 }
 0x13c   :  { %4148 = vmatpush.bf16.msra.mxu2 %v6607_v42  ;;  %4117 = vmatmul.bf16.vlgmr.msrb.gmra.mxu3 %v8367_v32  ;;  %v7781_v42 = vld [vmem:[#allocation8 + $0xb64] sm:$0xf]  ;;  %v6543_v55 = vor.u32 %v7749_v35, %v6540_v40  ;;  %v6652_v59 = vld [vmem:[#allocation8 + $0xb50] sm:$0xf0] }
 0x13d   :  { %4161 = vmatpush.bf16.msra.mxu3 %v6735_v47  ;;  %4124 = vmatpush.bf16.msra.mxu0 %v6319_v48  ;;  %v3834_v45 = vpop.f32.mrf.mxu1  ;;  %v6399_v47 = vor.u32 %v7713_v28, %v6396_v29  ;;  %v6668_v48 = vld [vmem:[#allocation8 + $0xb70] sm:$0xf0]  ;;  %v7745_v58 = vld [vmem:[#allocation8 + $0xa44] sm:$0xf] }
 0x13e   :  { %4137 = vmatpush.bf16.msra.mxu1 %v6447_v38  ;;  %v6380_v38 = vld [vmem:[#allocation8 + $0x930] sm:$0xf0]  ;;  %v6671_v41 = vor.u32 %v7781_v42, %v6668_v48  ;;  %v7673_v1 = vld [vmem:[#allocation8 + $0x804] sm:$0xf]  ;;  %v6527_v8 = vor.u32 %v7745_v58, %v6524_v61 }
 0x13f   :  { %v6236_v2 = vld [vmem:[#allocation8 + $0x810] sm:$0xf0]  ;;  %v7705_v3 = vld [vmem:[#allocation8 + $0x904] sm:$0xf]  ;;  %v3858_v4 = vpop.f32.mrf.mxu3 }
 0x140   :  { %4149 = vmatpush.bf16.msra.mxu2 %v6591_v37  ;;  %v7777_v37 = vld [vmem:[#allocation8 + $0xb44] sm:$0xf]  ;;  %v6860_v49 = vld [vmem:[#allocation8 + $0xcf0] sm:$0xf0]  ;;  %v6239_v18 = vor.u32 %v7673_v1, %v6236_v2 }
 0x141   :  { %4162 = vmatpush.bf16.msra.mxu3 %v6719_v62  ;;  %4125 = vmatpush.bf16.msra.mxu0 %v6303_v0  ;;  %v3845_v62 = vpop.f32.mrf.mxu2  ;;  %v6383_v0 = vor.u32 %v7709_v54, %v6380_v38  ;;  %v7829_v6 = vld [vmem:[#allocation8 + $0xce4] sm:$0xf]  ;;  %v6988_v11 = vld [vmem:[#allocation8 + $0xdf0] sm:$0xf0] }
 0x142   :  { %4138 = vmatpush.bf16.msra.mxu1 %v6431_v5  ;;  %v3846_v50 = vadd.f32 %v3845_v62, %v3833_v12  ;;  %v6364_v5 = vld [vmem:[#allocation8 + $0x910] sm:$0xf0]  ;;  %v7861_v10 = vld [vmem:[#allocation8 + $0xde4] sm:$0xf]  ;;  %v6863_v22 = vor.u32 %v7829_v6, %v6860_v49 }
 0x143   :  { %v7741_v19 = vld [vmem:[#allocation8 + $0xa24] sm:$0xf]  ;;  %v6508_v20 = vld [vmem:[#allocation8 + $0xa30] sm:$0xf0]  ;;  %v6991_v28 = vor.u32 %v7861_v10, %v6988_v11 }
 0x144   :  { %4150 = vmatpush.bf16.msra.mxu2 %v6575_v36  ;;  %v3859_v36 = vadd.f32 %v3858_v4, %v3846_v50  ;;  %v7773_v12 = vld [vmem:[#allocation8 + $0xb24] sm:$0xf]  ;;  %v6636_v23 = vld [vmem:[#allocation8 + $0xb30] sm:$0xf0] }
 0x145   :  { %4163 = vmatpush.bf16.msra.mxu3 %v6703_v16  ;;  %4126 = vmatpush.bf16.msra.mxu0 %v6287_v17  ;;  %v3871_v16 = vpop.f32.mrf.mxu0  ;;  %v6655_v17 = vor.u32 %v7777_v37, %v6652_v59  ;;  %v7825_v29 = vld [vmem:[#allocation8 + $0xcc4] sm:$0xf]  ;;  %v3884_v31 = vpop.f32.mrf.mxu1  ;;  %v6972_v35 = vld [vmem:[#allocation8 + $0xdd0] sm:$0xf0]  ;;  %v6639_v45 = vor.u32 %v7773_v12, %v6636_v23 }
 0x146   :  { %4139 = vmatpush.bf16.msra.mxu1 %v6415_v21  ;;  %v6367_v21 = vor.u32 %v7705_v3, %v6364_v5  ;;  %v3872_v24 = vadd.f32 %v3871_v16, %v3859_v36  ;;  %v7737_v40 = vld [vmem:[#allocation8 + $0xa04] sm:$0xf]  ;;  %v6620_v53 = vld [vmem:[#allocation8 + $0xb10] sm:$0xf0] }
 0x147   :  { %v7769_v48 = vld [vmem:[#allocation8 + $0xb04] sm:$0xf]  ;;  %v7244_v61 = vld [vmem:[#allocation8 + $0xff0] sm:$0xf0] }
 0x148   :  { %4151 = vmatpush.bf16.msra.mxu2 %v6559_v30  ;;  %v6844_v30 = vld [vmem:[#allocation8 + $0xcd0] sm:$0xf0]  ;;  %v3885_v42 = vadd.f32 %v3884_v31, %v3872_v24  ;;  %v7893_v38 = vld [vmem:[#allocation8 + $0xee4] sm:$0xf]  ;;  %v6623_v3 = vor.u32 %v7769_v48, %v6620_v53 }
 0x149   :  { %4164 = vmatpush.bf16.msra.mxu3 %v6687_v33  ;;  %4127 = vmatpush.bf16.msra.mxu0 %v6271_v34  ;;  %v6511_v33 = vor.u32 %v7741_v19, %v6508_v20  ;;  %v7857_v34 = vld [vmem:[#allocation8 + $0xdc4] sm:$0xf]  ;;  %v3847_v44 = vpop.f32.mrf.mxu2  ;;  %v6847_v54 = vor.u32 %v7825_v29, %v6844_v30  ;;  %v6828_v59 = vld [vmem:[#allocation8 + $0xcb0] sm:$0xf0] }
 0x14a   :  { %4140 = vmatpush.bf16.msra.mxu1 %v6399_v47  ;;  %v6492_v47 = vld [vmem:[#allocation8 + $0xa10] sm:$0xf0]  ;;  %v7925_v58 = vld [vmem:[#allocation8 + $0xfe4] sm:$0xf] }
 0x14b   :  { %v7821_v37 = vld [vmem:[#allocation8 + $0xca4] sm:$0xf]  ;;  %v6495_v62 = vor.u32 %v7737_v40, %v6492_v47  ;;  %v6956_v1 = vld [vmem:[#allocation8 + $0xdb0] sm:$0xf0]  ;;  %v7247_v4 = vor.u32 %v7925_v58, %v7244_v61 }
 0x14c   :  { %4152 = vmatpush.bf16.msra.mxu2 %v6543_v55  ;;  %v7116_v55 = vld [vmem:[#allocation8 + $0xef0] sm:$0xf0]  ;;  %v6831_v5 = vor.u32 %v7821_v37, %v6828_v59  ;;  %v7889_v6 = vld [vmem:[#allocation8 + $0xec4] sm:$0xf] }
 0x14d   :  { %4165 = vmatpush.bf16.msra.mxu3 %v6671_v41  ;;  %4128 = vmatpush.bf16.msra.mxu0 %v6255_v60  ;;  %v3860_v41 = vpop.f32.mrf.mxu3  ;;  %v6975_v60 = vor.u32 %v7857_v34, %v6972_v35  ;;  %v3873_v2 = vpop.f32.mrf.mxu0  ;;  %v7119_v50 = vor.u32 %v7893_v38, %v7116_v55  ;;  %v7100_v49 = vld [vmem:[#allocation8 + $0xed0] sm:$0xf0]  ;;  %v7817_v36 = vld [vmem:[#allocation8 + $0xc84] sm:$0xf] }
 0x14e   :  { %4141 = vmatpush.bf16.msra.mxu1 %v6383_v0  ;;  %v7853_v0 = vld [vmem:[#allocation8 + $0xda4] sm:$0xf]  ;;  %v7228_v11 = vld [vmem:[#allocation8 + $0xfd0] sm:$0xf0]  ;;  %v7103_v20 = vor.u32 %v7889_v6, %v7100_v49 }
 0x14f   :  { %v6959_v10 = vor.u32 %v7853_v0, %v6956_v1  ;;  %v6812_v16 = vld [vmem:[#allocation8 + $0xc90] sm:$0xf0]  ;;  %v7885_v23 = vld [vmem:[#allocation8 + $0xea4] sm:$0xf] }
 0x150   :  { %4153 = vmatpush.bf16.msra.mxu2 %v6527_v8  ;;  %v7921_v8 = vld [vmem:[#allocation8 + $0xfc4] sm:$0xf]  ;;  %v6940_v19 = vld [vmem:[#allocation8 + $0xd90] sm:$0xf0]  ;;  %v6815_v12 = vor.u32 %v7817_v36, %v6812_v16 }
 0x151   :  { %4166 = vmatpush.bf16.msra.mxu3 %v6655_v17  ;;  %4129 = vmatpush.bf16.msra.mxu0 %v6239_v18  ;;  %v3886_v17 = vpop.f32.mrf.mxu1  ;;  %v7849_v18 = vld [vmem:[#allocation8 + $0xd84] sm:$0xf]  ;;  %v7084_v24 = vld [vmem:[#allocation8 + $0xeb0] sm:$0xf0] }
 0x152   :  { %4142 = vmatpush.bf16.msra.mxu1 %v6367_v21  ;;  %v3897_v21 = vpop.f32.mrf.mxu2  ;;  %v6943_v31 = vor.u32 %v7849_v18, %v6940_v19  ;;  %v7813_v34 = vld [vmem:[#allocation8 + $0xc64] sm:$0xf]  ;;  %v6796_v35 = vld [vmem:[#allocation8 + $0xc70] sm:$0xf0]  ;;  %v7087_v53 = vor.u32 %v7885_v23, %v7084_v24 }
 0x153   :  { %v3898_v29 = vadd.f32 %v3897_v21, %v3885_v42  ;;  %v7845_v40 = vld [vmem:[#allocation8 + $0xd64] sm:$0xf]  ;;  %v6799_v42 = vor.u32 %v7813_v34, %v6796_v35  ;;  %v7068_v38 = vld [vmem:[#allocation8 + $0xe90] sm:$0xf0]  ;;  %v5330_v35 = vld [vmem:[#allocation8 + $0xe8] sm:$0xf] }
 0x154   :  { %4154 = vmatpush.bf16.msra.mxu2 %v6511_v33  ;;  %4130 = vmatmul.bf16.vlgmr.msra.gmra.mxu0 %v8379_v27  ;;  %v7212_v33 = vld [vmem:[#allocation8 + $0xfb0] sm:$0xf0]  ;;  %v7913_v55 = vld [vmem:[#allocation8 + $0xf84] sm:$0xf] }
 0x155   :  { %4174 = vmatpush.bf16.msrb.mxu0 %v6863_v22  ;;  %4167 = vmatpush.bf16.msra.mxu3 %v6639_v45  ;;  %v7231_v22 = vor.u32 %v7921_v8, %v7228_v11  ;;  %v3910_v30 = vpop.f32.mrf.mxu3  ;;  %v6924_v45 = vld [vmem:[#allocation8 + $0xd70] sm:$0xf0]  ;;  %v3923_v48 = vpop.f32.mrf.mxu0  ;;  %v7809_v61 = vld [vmem:[#allocation8 + $0xc44] sm:$0xf] }
 0x156   :  { %4187 = vmatpush.bf16.msrb.mxu1 %v6991_v28  ;;  %v7917_v28 = vld [vmem:[#allocation8 + $0xfa4] sm:$0xf]  ;;  %v3911_v47 = vadd.f32 %v3910_v30, %v3898_v29  ;;  %v6927_v41 = vor.u32 %v7845_v40, %v6924_v45  ;;  %v6780_v37 = vld [vmem:[#allocation8 + $0xc50] sm:$0xf0]  ;;  %v7448_v40 = vld [vmem:[#allocation8 + $0xf4] sm:$0xf0] }
 0x157   :  { %4143 = vmatmul.bf16.vlgmr.msra.gmra.mxu1 %v8382_v43  ;;  %v7215_v44 = vor.u32 %v7917_v28, %v7212_v33  ;;  %v7841_v59 = vld [vmem:[#allocation8 + $0xd44] sm:$0xf]  ;;  %v7052_v6 = vld [vmem:[#allocation8 + $0xe70] sm:$0xf0] }
 0x158   :  { %4155 = vmatpush.bf16.msra.mxu2 %v6495_v62  ;;  %v3924_v58 = vadd.f32 %v3923_v48, %v3911_v47  ;;  %v6908_v62 = vld [vmem:[#allocation8 + $0xd50] sm:$0xf0]  ;;  %v7909_v49 = vld [vmem:[#allocation8 + $0xf64] sm:$0xf]  ;;  %v5458_v47 = vld [vmem:[#allocation8 + $0x1e8] sm:$0xf] }
 0x159   :  { %4175 = vmatpush.bf16.msrb.mxu0 %v6847_v54  ;;  %4168 = vmatpush.bf16.msra.mxu3 %v6623_v3  ;;  %v7881_v54 = vld [vmem:[#allocation8 + $0xe84] sm:$0xf]  ;;  %v3936_v0 = vpop.f32.mrf.mxu1  ;;  %v7180_v11 = vld [vmem:[#allocation8 + $0xf70] sm:$0xf0]  ;;  %v7480_v48 = vld [vmem:[#allocation8 + $0x1f4] sm:$0xf0] }
 0x15a   :  { %4188 = vmatpush.bf16.msrb.mxu1 %v6975_v60  ;;  %v7196_v60 = vld [vmem:[#allocation8 + $0xf90] sm:$0xf0]  ;;  %v7071_v1 = vor.u32 %v7881_v54, %v7068_v38  ;;  %v3937_v2 = vadd.f32 %v3936_v0, %v3924_v58  ;;  %v3899_v3 = vpop.f32.mrf.mxu2  ;;  %v7805_v36 = vld [vmem:[#allocation8 + $0xc24] sm:$0xf]  ;;  %v5314_v0 = vld [vmem:[#allocation8 + $0xc8] sm:$0xf] }
 0x15b   :  { %4156 = vmatmul.bf16.vlgmr.msra.gmra.mxu2 %v8390_v13  ;;  %v6764_v16 = vld [vmem:[#allocation8 + $0xc30] sm:$0xf0]  ;;  %v7837_v17 = vld [vmem:[#allocation8 + $0xd24] sm:$0xf] }
 0x15c   :  { %4200 = vmatpush.bf16.msrb.mxu2 %v7119_v50  ;;  %4169 = vmatmul.bf16.vlgmr.msra.gmra.mxu3 %v8392_v63  ;;  %v7199_v50 = vor.u32 %v7913_v55, %v7196_v60  ;;  %v6892_v18 = vld [vmem:[#allocation8 + $0xd30] sm:$0xf0]  ;;  %v7905_v24 = vld [vmem:[#allocation8 + $0xf44] sm:$0xf] }
 0x15d   :  { %4213 = vmatpush.bf16.msrb.mxu3 %v7247_v4  ;;  %4176 = vmatpush.bf16.msrb.mxu0 %v6831_v5  ;;  %v6783_v4 = vor.u32 %v7809_v61, %v6780_v37  ;;  %v7877_v5 = vld [vmem:[#allocation8 + $0xe64] sm:$0xf]  ;;  %v3912_v8 = vpop.f32.mrf.mxu3  ;;  %v3925_v21 = vpop.f32.mrf.mxu0  ;;  %v7036_v23 = vld [vmem:[#allocation8 + $0xe50] sm:$0xf0]  ;;  %v6895_v29 = vor.u32 %v7837_v17, %v6892_v18  ;;  %v5331_v61 = vor.u32 %v7448_v40, %v5330_v35  ;;  %v5714_v17 = vld [vmem:[#allocation8 + $0x3e8] sm:$0xf] }
 0x15e   :  { %4189 = vmatpush.bf16.msrb.mxu1 %v6959_v10  ;;  %v6911_v10 = vor.u32 %v7841_v59, %v6908_v62  ;;  %v7055_v19 = vor.u32 %v7877_v5, %v7052_v6  ;;  %v7164_v28 = vld [vmem:[#allocation8 + $0xf50] sm:$0xf0]  ;;  %v7801_v30 = vld [vmem:[#allocation8 + $0xc04] sm:$0xf]  ;;  %v5459_v62 = vor.u32 %v7480_v48, %v5458_v47  ;;  %v7476_v5 = vld [vmem:[#allocation8 + $0x1d4] sm:$0xf0] }
 0x15f   :  { %v7833_v33 = vld [vmem:[#allocation8 + $0xd04] sm:$0xf]  ;;  %v6876_v34 = vld [vmem:[#allocation8 + $0xd10] sm:$0xf0]  ;;  %v7440_v21 = vld [vmem:[#allocation8 + $0xb4] sm:$0xf0] }
 0x160   :  { %4201 = vmatpush.bf16.msrb.mxu2 %v7103_v20  ;;  %v7873_v20 = vld [vmem:[#allocation8 + $0xe44] sm:$0xf]  ;;  %v7020_v55 = vld [vmem:[#allocation8 + $0xe30] sm:$0xf0]  ;;  %v6879_v60 = vor.u32 %v7833_v33, %v6876_v34  ;;  %v5570_v33 = vld [vmem:[#allocation8 + $0x2c8] sm:$0xf] }
 0x161   :  { %4214 = vmatpush.bf16.msrb.mxu3 %v7231_v22  ;;  %4177 = vmatpush.bf16.msrb.mxu0 %v6815_v12  ;;  %v7183_v22 = vor.u32 %v7909_v49, %v7180_v11  ;;  %v6767_v12 = vor.u32 %v7805_v36, %v6764_v16  ;;  %v7039_v45 = vor.u32 %v7873_v20, %v7036_v23  ;;  %v7869_v38 = vld [vmem:[#allocation8 + $0xe24] sm:$0xf]  ;;  %v7148_v59 = vld [vmem:[#allocation8 + $0xf30] sm:$0xf0]  ;;  %v5586_v36 = vld [vmem:[#allocation8 + $0x2e8] sm:$0xf] }
 0x162   :  { %4190 = vmatpush.bf16.msrb.mxu1 %v6943_v31  ;;  %v6748_v31 = vld [vmem:[#allocation8 + $0xc10] sm:$0xf0]  ;;  %v7901_v37 = vld [vmem:[#allocation8 + $0xf24] sm:$0xf]  ;;  %v7512_v16 = vld [vmem:[#allocation8 + $0x2f4] sm:$0xf0] }
 0x163   :  { %v6751_v54 = vor.u32 %v7801_v30, %v6748_v31  ;;  %v7865_v6 = vld [vmem:[#allocation8 + $0xe04] sm:$0xf]  ;;  %v7151_v49 = vor.u32 %v7901_v37, %v7148_v59  ;;  %v5298_v20 = vld [vmem:[#allocation8 + $0xa8] sm:$0xf]  ;;  %v7472_v23 = vld [vmem:[#allocation8 + $0x1b4] sm:$0xf0] }
 0x164   :  { %4202 = vmatpush.bf16.msrb.mxu2 %v7087_v53  ;;  %v3938_v53 = vpop.f32.mrf.mxu1  ;;  %v7897_v8 = vld [vmem:[#allocation8 + $0xf04] sm:$0xf]  ;;  %v5299_v31 = vor.u32 %v7440_v21, %v5298_v20  ;;  %v7508_v34 = vld [vmem:[#allocation8 + $0x2d4] sm:$0xf0]  ;;  %v5698_v35 = vld [vmem:[#allocation8 + $0x3c8] sm:$0xf] }
 0x165   :  { %4215 = vmatpush.bf16.msrb.mxu3 %v7215_v44  ;;  %4178 = vmatpush.bf16.msrb.mxu0 %v6799_v42  ;;  %v3949_v44 = vpop.f32.mrf.mxu2  ;;  %v7167_v42 = vor.u32 %v7905_v24, %v7164_v28  ;;  %v5587_v28 = vor.u32 %v7512_v16, %v5586_v36  ;;  %v7540_v47 = vld [vmem:[#allocation8 + $0x3d4] sm:$0xf0]  ;;  %v5282_v48 = vld [vmem:[#allocation8 + $0x88] sm:$0xf] }
 0x166   :  { %4191 = vmatpush.bf16.msrb.mxu1 %v6927_v41  ;;  %v3950_v58 = vadd.f32 %v3949_v44, %v3937_v2  ;;  %v3962_v41 = vpop.f32.mrf.mxu3  ;;  %v7004_v2 = vld [vmem:[#allocation8 + $0xe10] sm:$0xf0]  ;;  %v7436_v53 = vld [vmem:[#allocation8 + $0x94] sm:$0xf0]  ;;  %v5410_v44 = vld [vmem:[#allocation8 + $0x188] sm:$0xf] }
 0x167   :  { %v7536_v37 = vld [vmem:[#allocation8 + $0x3b4] sm:$0xf0]  ;;  %v5266_v59 = vld [vmem:[#allocation8 + $0x68] sm:$0xf] }
 0x168   :  { %4203 = vmatpush.bf16.msrb.mxu2 %v7071_v1  ;;  %v7444_v1 = vld [vmem:[#allocation8 + $0xd4] sm:$0xf0]  ;;  %v8433_v3 = vadd.f32 %v3962_v41, %v3950_v58  ;;  %v5554_v58 = vld [vmem:[#allocation8 + $0x2a8] sm:$0xf] }
 0x169   :  { %4216 = vmatpush.bf16.msrb.mxu3 %v7199_v50  ;;  %4179 = vmatpush.bf16.msrb.mxu0 %v6783_v4  ;;  %v7023_v50 = vor.u32 %v7869_v38, %v7020_v55  ;;  %v5442_v4 = vld [vmem:[#allocation8 + $0x1c8] sm:$0xf]  ;;  %v5315_v11 = vor.u32 %v7444_v1, %v5314_v0  ;;  %v5699_v38 = vor.u32 %v7540_v47, %v5698_v35  ;;  %v7504_v41 = vld [vmem:[#allocation8 + $0x2b4] sm:$0xf0] }
 0x16a   :  { %4192 = vmatpush.bf16.msrb.mxu1 %v6911_v10  ;;  %v7132_v10 = vld [vmem:[#allocation8 + $0xf10] sm:$0xf0]  ;;  %v5443_v18 = vor.u32 %v7476_v5, %v5442_v4  ;;  %v5283_v55 = vor.u32 %v7436_v53, %v5282_v48  ;;  %v5394_v0 = vld [vmem:[#allocation8 + $0x168] sm:$0xf]  ;;  %v7464_v1 = vld [vmem:[#allocation8 + $0x174] sm:$0xf0]  ;;  %v5555_v4 = vor.u32 %v7504_v41, %v5554_v58 }
 0x16b   :  { %v7135_v24 = vor.u32 %v7897_v8, %v7132_v10  ;;  %v5538_v8 = vld [vmem:[#allocation8 + $0x288] sm:$0xf]  ;;  %v7500_v10 = vld [vmem:[#allocation8 + $0x294] sm:$0xf0]  ;;  %v5395_v36 = vor.u32 %v7464_v1, %v5394_v0 }
 0x16c   :  { %4204 = vmatpush.bf16.msrb.mxu2 %v7055_v19  ;;  %v7544_v19 = vld [vmem:[#allocation8 + $0x3f4] sm:$0xf0]  ;;  %v5378_v20 = vld [vmem:[#allocation8 + $0x148] sm:$0xf] }
 0x16d   :  { %4217 = vmatpush.bf16.msrb.mxu3 %v7183_v22  ;;  %4180 = vmatpush.bf16.msrb.mxu0 %v6767_v12  ;;  %v7007_v22 = vor.u32 %v7865_v6, %v7004_v2  ;;  %v5426_v12 = vld [vmem:[#allocation8 + $0x1a8] sm:$0xf]  ;;  %v5715_v30 = vor.u32 %v7544_v19, %v5714_v17  ;;  %v7532_v16 = vld [vmem:[#allocation8 + $0x394] sm:$0xf0] }
 0x16e   :  { %4193 = vmatpush.bf16.msrb.mxu1 %v6895_v29  ;;  %v3951_v29 = vpop.f32.mrf.mxu2  ;;  %v3964_v40 = vpop.f32.mrf.mxu3  ;;  %v5250_v17 = vld [vmem:[#allocation8 + $0x48] sm:$0xf]  ;;  %v7460_v21 = vld [vmem:[#allocation8 + $0x154] sm:$0xf0] }
 0x16f   :  { %v5379_v29 = vor.u32 %v7460_v21, %v5378_v20  ;;  %v7456_v35 = vld [vmem:[#allocation8 + $0x134] sm:$0xf0]  ;;  %v5218_v58 = vld [vmem:[#allocation8 + $0x8] sm:$0xf] }
 0x170   :  { %4205 = vmatpush.bf16.msrb.mxu2 %v7039_v45  ;;  %v5427_v45 = vor.u32 %v7472_v23, %v5426_v12  ;;  %v5522_v23 = vld [vmem:[#allocation8 + $0x268] sm:$0xf]  ;;  %v7420_v41 = vld [vmem:[#allocation8 + $0x14] sm:$0xf0] }
 0x171   :  { %4218 = vmatpush.bf16.msrb.mxu3 %v7167_v42  ;;  %4181 = vmatpush.bf16.msrb.mxu0 %v6751_v54  ;;  %v7468_v42 = vld [vmem:[#allocation8 + $0x194] sm:$0xf0]  ;;  %v5571_v54 = vor.u32 %v7508_v34, %v5570_v33  ;;  %v5362_v34 = vld [vmem:[#allocation8 + $0x128] sm:$0xf] }
 0x172   :  { %4194 = vmatpush.bf16.msrb.mxu1 %v6879_v60  ;;  %v5682_v60 = vld [vmem:[#allocation8 + $0x3a8] sm:$0xf]  ;;  %v7424_v33 = vld [vmem:[#allocation8 + $0x34] sm:$0xf0] }
 0x173   :  { %v5970_v0 = vld [vmem:[#allocation8 + $0x5e8] sm:$0xf]  ;;  %v7608_v1 = vld [vmem:[#allocation8 + $0x5f4] sm:$0xf0] }
 0x174   :  { %4206 = vmatpush.bf16.msrb.mxu2 %v7023_v50  ;;  %4182 = vmatmul.bf16.vlgmr.msrb.gmra.mxu0 %v8406_v7  ;;  %v3975_v50 = vpop.f32.mrf.mxu0  ;;  %v3988_v6 = vpop.f32.mrf.mxu1  ;;  %v7572_v20 = vld [vmem:[#allocation8 + $0x4d4] sm:$0xf0] }
 0x175   :  { %4226 = vmatpush.bf16.msra.mxu0 %v5331_v61  ;;  %4219 = vmatpush.bf16.msrb.mxu3 %v7151_v49  ;;  %v5411_v61 = vor.u32 %v7468_v42, %v5410_v44  ;;  %v3976_v5 = vadd.f32 %v3975_v50, %v8433_v3  ;;  %v5683_v49 = vor.u32 %v7536_v37, %v5682_v60  ;;  %v7492_v44 = vld [vmem:[#allocation8 + $0x254] sm:$0xf0]  ;;  %v5634_v42 = vld [vmem:[#allocation8 + $0x348] sm:$0xf] }
 0x176   :  { %4239 = vmatpush.bf16.msra.mxu1 %v5459_v62  ;;  %v7432_v62 = vld [vmem:[#allocation8 + $0x74] sm:$0xf0]  ;;  %v5346_v60 = vld [vmem:[#allocation8 + $0x108] sm:$0xf] }
 0x177   :  { %4195 = vmatmul.bf16.vlgmr.msrb.gmra.mxu1 %v8408_v14  ;;  %v5267_v2 = vor.u32 %v7432_v62, %v5266_v59  ;;  %v3989_v19 = vadd.f32 %v3988_v6, %v3976_v5  ;;  %v5842_v37 = vld [vmem:[#allocation8 + $0x4e8] sm:$0xf]  ;;  %v7576_v59 = vld [vmem:[#allocation8 + $0x4f4] sm:$0xf0]  ;;  %v5219_v5 = vor.u32 %v7420_v41, %v5218_v58 }
 0x178   :  { %4207 = vmatpush.bf16.msrb.mxu2 %v7007_v22  ;;  %v5539_v22 = vor.u32 %v7500_v10, %v5538_v8  ;;  %v5490_v6 = vld [vmem:[#allocation8 + $0x228] sm:$0xf] }
 0x179   :  { %4227 = vmatpush.bf16.msra.mxu0 %v5315_v11  ;;  %4220 = vmatpush.bf16.msrb.mxu3 %v7135_v24  ;;  %v5666_v11 = vld [vmem:[#allocation8 + $0x388] sm:$0xf]  ;;  %v7496_v24 = vld [vmem:[#allocation8 + $0x274] sm:$0xf0] }
 0x17a   :  { %4240 = vmatpush.bf16.msra.mxu1 %v5443_v18  ;;  %v7428_v18 = vld [vmem:[#allocation8 + $0x54] sm:$0xf0]  ;;  %v5667_v3 = vor.u32 %v7532_v16, %v5666_v11  ;;  %v5523_v40 = vor.u32 %v7496_v24, %v5522_v23  ;;  %v5843_v11 = vor.u32 %v7576_v59, %v5842_v37  ;;  %v5474_v23 = vld [vmem:[#allocation8 + $0x208] sm:$0xf] }
 0x17b   :  { %4208 = vmatmul.bf16.vlgmr.msrb.gmra.mxu2 %v8412_v26  ;;  %v5251_v12 = vor.u32 %v7428_v18, %v5250_v17  ;;  %v7520_v16 = vld [vmem:[#allocation8 + $0x334] sm:$0xf0]  ;;  %v5971_v17 = vor.u32 %v7608_v1, %v5970_v0  ;;  %v5826_v18 = vld [vmem:[#allocation8 + $0x4c8] sm:$0xf] }
 0x17c   :  { %4252 = vmatpush.bf16.msra.mxu2 %v5587_v28  ;;  %4221 = vmatmul.bf16.vlgmr.msrb.gmra.mxu3 %v8414_v56  ;;  %v5650_v28 = vld [vmem:[#allocation8 + $0x368] sm:$0xf]  ;;  %v3977_v47 = vpop.f32.mrf.mxu0  ;;  %v7564_v1 = vld [vmem:[#allocation8 + $0x494] sm:$0xf0] }
 0x17d   :  { %4265 = vmatpush.bf16.msra.mxu3 %v5715_v30  ;;  %4228 = vmatpush.bf16.msra.mxu0 %v5299_v31  ;;  %v7528_v30 = vld [vmem:[#allocation8 + $0x374] sm:$0xf0]  ;;  %v5234_v31 = vld [vmem:[#allocation8 + $0x28] sm:$0xf] }
 0x17e   :  { %4241 = vmatpush.bf16.msra.mxu1 %v5427_v45  ;;  %v5506_v45 = vld [vmem:[#allocation8 + $0x248] sm:$0xf]  ;;  %v5651_v48 = vor.u32 %v7528_v30, %v5650_v28  ;;  %v5235_v53 = vor.u32 %v7424_v33, %v5234_v31  ;;  %v4001_v50 = vpop.f32.mrf.mxu2  ;;  %v5827_v30 = vor.u32 %v7572_v20, %v5826_v18  ;;  %v7640_v33 = vld [vmem:[#allocation8 + $0x6f4] sm:$0xf0] }
 0x17f   :  { %v5507_v62 = vor.u32 %v7492_v44, %v5506_v45  ;;  %v4014_v8 = vpop.f32.mrf.mxu3  ;;  %v5602_v28 = vld [vmem:[#allocation8 + $0x308] sm:$0xf]  ;;  %v7568_v47 = vld [vmem:[#allocation8 + $0x4b4] sm:$0xf0] }
 0x180   :  { %4253 = vmatpush.bf16.msra.mxu2 %v5571_v54  ;;  %v7524_v54 = vld [vmem:[#allocation8 + $0x354] sm:$0xf0]  ;;  %v6098_v31 = vld [vmem:[#allocation8 + $0x6e8] sm:$0xf] }
 0x181   :  { %4266 = vmatpush.bf16.msra.mxu3 %v5699_v38  ;;  %4229 = vmatpush.bf16.msra.mxu0 %v5283_v55  ;;  %v3990_v38 = vpop.f32.mrf.mxu1  ;;  %v5363_v55 = vor.u32 %v7456_v35, %v5362_v34  ;;  %v6226_v34 = vld [vmem:[#allocation8 + $0x7e8] sm:$0xf]  ;;  %v7600_v44 = vld [vmem:[#allocation8 + $0x5b4] sm:$0xf0] }
 0x182   :  { %4242 = vmatpush.bf16.msra.mxu1 %v5411_v61  ;;  %v7452_v61 = vld [vmem:[#allocation8 + $0x114] sm:$0xf0]  ;;  %v5810_v45 = vld [vmem:[#allocation8 + $0x4a8] sm:$0xf] }
 0x183   :  { %v5347_v10 = vor.u32 %v7452_v61, %v5346_v60  ;;  %v5811_v58 = vor.u32 %v7568_v47, %v5810_v45  ;;  %v6082_v41 = vld [vmem:[#allocation8 + $0x6c8] sm:$0xf]  ;;  %v7636_v60 = vld [vmem:[#allocation8 + $0x6d4] sm:$0xf0] }
 0x184   :  { %4254 = vmatpush.bf16.msra.mxu2 %v5555_v4  ;;  %v5635_v4 = vor.u32 %v7524_v54, %v5634_v42  ;;  %v6099_v54 = vor.u32 %v7640_v33, %v6098_v31  ;;  %v6210_v61 = vld [vmem:[#allocation8 + $0x7c8] sm:$0xf]  ;;  %v7560_v18 = vld [vmem:[#allocation8 + $0x474] sm:$0xf0] }
 0x185   :  { %4267 = vmatpush.bf16.msra.mxu3 %v5683_v49  ;;  %4230 = vmatpush.bf16.msra.mxu0 %v5267_v2  ;;  %v7488_v49 = vld [vmem:[#allocation8 + $0x234] sm:$0xf0]  ;;  %v4002_v2 = vadd.f32 %v4001_v50, %v3989_v19  ;;  %v5794_v0 = vld [vmem:[#allocation8 + $0x488] sm:$0xf] }
 0x186   :  { %4243 = vmatpush.bf16.msra.mxu1 %v5395_v36  ;;  %v5618_v36 = vld [vmem:[#allocation8 + $0x328] sm:$0xf]  ;;  %v7484_v19 = vld [vmem:[#allocation8 + $0x214] sm:$0xf0]  ;;  %v4003_v38 = vpop.f32.mrf.mxu2 }
 0x187   :  { %v8440_v21 = vadd.f32 %v4014_v8, %v4002_v2  ;;  %v5619_v24 = vor.u32 %v7520_v16, %v5618_v36  ;;  %v4016_v37 = vpop.f32.mrf.mxu3  ;;  %v5922_v50 = vld [vmem:[#allocation8 + $0x588] sm:$0xf]  ;;  %v5795_v2 = vor.u32 %v7564_v1, %v5794_v0  ;;  %v7664_v16 = vld [vmem:[#allocation8 + $0x7b4] sm:$0xf0] }
 0x188   :  { %4255 = vmatpush.bf16.msra.mxu2 %v5539_v22  ;;  %v5491_v22 = vor.u32 %v7488_v49, %v5490_v6  ;;  %v1243_v6 = vperm.slane %v8423_v39, 1  ;;  %v6066_v8 = vld [vmem:[#allocation8 + $0x6a8] sm:$0xf]  ;;  %v7660_v33 = vld [vmem:[#allocation8 + $0x794] sm:$0xf0] }
 0x189   :  { %4268 = vmatpush.bf16.msra.mxu3 %v5667_v3  ;;  %4231 = vmatpush.bf16.msra.mxu0 %v5251_v12  ;;  %v5954_v3 = vld [vmem:[#allocation8 + $0x5c8] sm:$0xf]  ;;  %v7604_v12 = vld [vmem:[#allocation8 + $0x5d4] sm:$0xf0] }
 0x18a   :  { %4244 = vmatpush.bf16.msra.mxu1 %v5379_v29  ;;  %v7516_v29 = vld [vmem:[#allocation8 + $0x314] sm:$0xf0]  ;;  %v5955_v35 = vor.u32 %v7604_v12, %v5954_v3  ;;  %v5906_v20 = vld [vmem:[#allocation8 + $0x568] sm:$0xf] }
 0x18b   :  { %v5603_v42 = vor.u32 %v7516_v29, %v5602_v28  ;;  %v6050_v28 = vld [vmem:[#allocation8 + $0x688] sm:$0xf]  ;;  %v7628_v29 = vld [vmem:[#allocation8 + $0x694] sm:$0xf0] }
 0x18c   :  { %4256 = vmatpush.bf16.msra.mxu2 %v5523_v40  ;;  %v7672_v40 = vld [vmem:[#allocation8 + $0x7f4] sm:$0xf0]  ;;  %v5890_v45 = vld [vmem:[#allocation8 + $0x548] sm:$0xf] }
 0x18d   :  { %4269 = vmatpush.bf16.msra.mxu3 %v5651_v48  ;;  %4232 = vmatpush.bf16.msra.mxu0 %v5235_v53  ;;  %v5475_v48 = vor.u32 %v7484_v19, %v5474_v23  ;;  %v5938_v53 = vld [vmem:[#allocation8 + $0x5a8] sm:$0xf]  ;;  %v7588_v47 = vld [vmem:[#allocation8 + $0x554] sm:$0xf0] }
 0x18e   :  { %4245 = vmatpush.bf16.msra.mxu1 %v5363_v55  ;;  %v6227_v55 = vor.u32 %v7672_v40, %v6226_v34  ;;  %v5939_v59 = vor.u32 %v7600_v44, %v5938_v53  ;;  %v5762_v34 = vld [vmem:[#allocation8 + $0x448] sm:$0xf]  ;;  %v7584_v37 = vld [vmem:[#allocation8 + $0x534] sm:$0xf0] }
 0x18f   :  { %v6162_v38 = vld [vmem:[#allocation8 + $0x768] sm:$0xf] }
 0x190   :  { %4257 = vmatpush.bf16.msra.mxu2 %v5507_v62  ;;  %v7668_v62 = vld [vmem:[#allocation8 + $0x7d4] sm:$0xf0]  ;;  %v6018_v0 = vld [vmem:[#allocation8 + $0x648] sm:$0xf] }
 0x191   :  { %4270 = vmatpush.bf16.msra.mxu3 %v5635_v4  ;;  %4233 = vmatpush.bf16.msra.mxu0 %v5219_v5  ;;  %v7596_v4 = vld [vmem:[#allocation8 + $0x594] sm:$0xf0]  ;;  %v6083_v5 = vor.u32 %v7636_v60, %v6082_v41  ;;  %v6211_v49 = vor.u32 %v7668_v62, %v6210_v61  ;;  %v4027_v39 = vpop.f32.mrf.mxu0  ;;  %v5746_v41 = vld [vmem:[#allocation8 + $0x428] sm:$0xf] }
 0x192   :  { %4246 = vmatpush.bf16.msra.mxu1 %v5347_v10  ;;  %v7632_v10 = vld [vmem:[#allocation8 + $0x6b4] sm:$0xf0]  ;;  %v5923_v36 = vor.u32 %v7596_v4, %v5922_v50  ;;  %v4028_v12 = vadd.f32 %v4027_v39, %v1243_v6  ;;  %v5874_v61 = vld [vmem:[#allocation8 + $0x528] sm:$0xf] }
 0x193   :  { %v6067_v3 = vor.u32 %v7632_v10, %v6066_v8  ;;  %v7552_v60 = vld [vmem:[#allocation8 + $0x434] sm:$0xf0]  ;;  %v6146_v6 = vld [vmem:[#allocation8 + $0x748] sm:$0xf] }
 0x194   :  { %4258 = vmatpush.bf16.msra.mxu2 %v5491_v22  ;;  %4234 = vmatmul.bf16.vlgmr.msra.gmra.mxu0 %v8314_v9  ;;  %v7592_v22 = vld [vmem:[#allocation8 + $0x574] sm:$0xf0]  ;;  %v4040_v23 = vpop.f32.mrf.mxu1  ;;  %v5747_v4 = vor.u32 %v7552_v60, %v5746_v41  ;;  %v5730_v8 = vld [vmem:[#allocation8 + $0x408] sm:$0xf] }
 0x195   :  { %4278 = vmatpush.bf16.msrb.mxu0 %v5843_v11  ;;  %4271 = vmatpush.bf16.msra.mxu3 %v5619_v24  ;;  %v6194_v11 = vld [vmem:[#allocation8 + $0x7a8] sm:$0xf]  ;;  %v5907_v31 = vor.u32 %v7592_v22, %v5906_v20  ;;  %v4041_v40 = vadd.f32 %v4040_v23, %v4028_v12  ;;  %v7548_v10 = vld [vmem:[#allocation8 + $0x414] sm:$0xf0] }
 0x196   :  { %4291 = vmatpush.bf16.msrb.mxu1 %v5971_v17  ;;  %v5778_v17 = vld [vmem:[#allocation8 + $0x468] sm:$0xf]  ;;  %v6195_v24 = vor.u32 %v7664_v16, %v6194_v11  ;;  %v7736_v22 = vld [vmem:[#allocation8 + $0x9f4] sm:$0xf0]  ;;  %v5731_v12 = vor.u32 %v7548_v10, %v5730_v8 }
 0x197   :  { %4247 = vmatmul.bf16.vlgmr.msra.gmra.mxu1 %v8317_v15  ;;  %v5779_v19 = vor.u32 %v7560_v18, %v5778_v17  ;;  %v5858_v11 = vld [vmem:[#allocation8 + $0x508] sm:$0xf]  ;;  %v7704_v17 = vld [vmem:[#allocation8 + $0x8f4] sm:$0xf0] }
 0x198   :  { %4259 = vmatpush.bf16.msra.mxu2 %v5475_v48  ;;  %v6051_v48 = vor.u32 %v7628_v29, %v6050_v28  ;;  %v6354_v16 = vld [vmem:[#allocation8 + $0x8e8] sm:$0xf]  ;;  %v7768_v60 = vld [vmem:[#allocation8 + $0xaf4] sm:$0xf0] }
 0x199   :  { %4279 = vmatpush.bf16.msrb.mxu0 %v5827_v30  ;;  %4272 = vmatpush.bf16.msra.mxu3 %v5603_v42  ;;  %v6178_v30 = vld [vmem:[#allocation8 + $0x788] sm:$0xf] }
 0x19a   :  { %4292 = vmatpush.bf16.msrb.mxu1 %v5955_v35  ;;  %v7556_v35 = vld [vmem:[#allocation8 + $0x454] sm:$0xf0]  ;;  %v6179_v53 = vor.u32 %v7660_v33, %v6178_v30  ;;  %v6034_v42 = vld [vmem:[#allocation8 + $0x668] sm:$0xf]  ;;  %v6355_v30 = vor.u32 %v7704_v17, %v6354_v16 }
 0x19b   :  { %4260 = vmatmul.bf16.vlgmr.msra.gmra.mxu2 %v8325_v52  ;;  %v5763_v44 = vor.u32 %v7556_v35, %v5762_v34  ;;  %v6482_v20 = vld [vmem:[#allocation8 + $0x9e8] sm:$0xf]  ;;  %v7648_v33 = vld [vmem:[#allocation8 + $0x734] sm:$0xf0] }
 0x19c   :  { %4304 = vmatpush.bf16.msrb.mxu2 %v6099_v54  ;;  %4273 = vmatmul.bf16.vlgmr.msra.gmra.mxu3 %v8329_v57  ;;  %v7624_v54 = vld [vmem:[#allocation8 + $0x674] sm:$0xf0]  ;;  %v4042_v1 = vpop.f32.mrf.mxu1  ;;  %v6002_v23 = vld [vmem:[#allocation8 + $0x628] sm:$0xf]  ;;  %v6483_v34 = vor.u32 %v7736_v22, %v6482_v20 }
 0x19d   :  { %4317 = vmatpush.bf16.msrb.mxu3 %v6227_v55  ;;  %4280 = vmatpush.bf16.msrb.mxu0 %v5811_v58  ;;  %v5891_v55 = vor.u32 %v7588_v47, %v5890_v45  ;;  %v7656_v58 = vld [vmem:[#allocation8 + $0x774] sm:$0xf0]  ;;  %v6035_v62 = vor.u32 %v7624_v54, %v6034_v42  ;;  %v6338_v35 = vld [vmem:[#allocation8 + $0x8c8] sm:$0xf] }
 0x19e   :  { %4293 = vmatpush.bf16.msrb.mxu1 %v5939_v59  ;;  %v4029_v59 = vpop.f32.mrf.mxu0  ;;  %v6163_v50 = vor.u32 %v7656_v58, %v6162_v38  ;;  %v4053_v39 = vpop.f32.mrf.mxu2  ;;  %v7700_v45 = vld [vmem:[#allocation8 + $0x8d4] sm:$0xf0]  ;;  %v5986_v42 = vld [vmem:[#allocation8 + $0x608] sm:$0xf] }
 0x19f   :  { %v4066_v28 = vpop.f32.mrf.mxu3  ;;  %v6114_v38 = vld [vmem:[#allocation8 + $0x708] sm:$0xf]  ;;  %v6339_v58 = vor.u32 %v7700_v45, %v6338_v35  ;;  %v7800_v59 = vld [vmem:[#allocation8 + $0xbf4] sm:$0xf0] }
 0x1a0   :  { %4305 = vmatpush.bf16.msrb.mxu2 %v6083_v5  ;;  %v7620_v5 = vld [vmem:[#allocation8 + $0x654] sm:$0xf0]  ;;  %v6610_v41 = vld [vmem:[#allocation8 + $0xae8] sm:$0xf] }
 0x1a1   :  { %4318 = vmatpush.bf16.msrb.mxu3 %v6211_v49  ;;  %4281 = vmatpush.bf16.msrb.mxu0 %v5795_v2  ;;  %v7652_v49 = vld [vmem:[#allocation8 + $0x754] sm:$0xf0]  ;;  %v5875_v2 = vor.u32 %v7584_v37, %v5874_v61  ;;  %v6019_v18 = vor.u32 %v7620_v5, %v6018_v0  ;;  %v6738_v61 = vld [vmem:[#allocation8 + $0xbe8] sm:$0xf] }
 0x1a2   :  { %4294 = vmatpush.bf16.msrb.mxu1 %v5923_v36  ;;  %v7580_v36 = vld [vmem:[#allocation8 + $0x514] sm:$0xf0]  ;;  %v6739_v8 = vor.u32 %v7800_v59, %v6738_v61  ;;  %v6722_v16 = vld [vmem:[#allocation8 + $0xbc8] sm:$0xf] }
 0x1a3   :  { %v5859_v29 = vor.u32 %v7580_v36, %v5858_v11  ;;  %v7696_v0 = vld [vmem:[#allocation8 + $0x8b4] sm:$0xf0]  ;;  %v6594_v11 = vld [vmem:[#allocation8 + $0xac8] sm:$0xf] }
 0x1a4   :  { %4306 = vmatpush.bf16.msrb.mxu2 %v6067_v3  ;;  %v6147_v3 = vor.u32 %v7652_v49, %v6146_v6  ;;  %v6611_v49 = vor.u32 %v7768_v60, %v6610_v41  ;;  %v7764_v36 = vld [vmem:[#allocation8 + $0xad4] sm:$0xf0]  ;;  %v6306_v20 = vld [vmem:[#allocation8 + $0x888] sm:$0xf] }
 0x1a5   :  { %4319 = vmatpush.bf16.msrb.mxu3 %v6195_v24  ;;  %4282 = vmatpush.bf16.msrb.mxu0 %v5779_v19  ;;  %v7616_v24 = vld [vmem:[#allocation8 + $0x634] sm:$0xf0]  ;;  %v4054_v19 = vadd.f32 %v4053_v39, %v4041_v40  ;;  %v6434_v39 = vld [vmem:[#allocation8 + $0x988] sm:$0xf] }
 0x1a6   :  { %4295 = vmatpush.bf16.msrb.mxu1 %v5907_v31  ;;  %v6130_v31 = vld [vmem:[#allocation8 + $0x728] sm:$0xf]  ;;  %v7612_v40 = vld [vmem:[#allocation8 + $0x614] sm:$0xf0]  ;;  %v4055_v5 = vpop.f32.mrf.mxu2 }
 0x1a7   :  { %v8447_v47 = vadd.f32 %v4066_v28, %v4054_v19  ;;  %v6131_v54 = vor.u32 %v7648_v33, %v6130_v31  ;;  %v5987_v1 = vor.u32 %v7612_v40, %v5986_v42  ;;  %v7692_v22 = vld [vmem:[#allocation8 + $0x894] sm:$0xf0]  ;;  %v6578_v19 = vld [vmem:[#allocation8 + $0xaa8] sm:$0xf] }
 0x1a8   :  { %4307 = vmatpush.bf16.msrb.mxu2 %v6051_v48  ;;  %v6003_v48 = vor.u32 %v7616_v24, %v6002_v23  ;;  %v6307_v24 = vor.u32 %v7692_v22, %v6306_v20  ;;  %v7760_v28 = vld [vmem:[#allocation8 + $0xab4] sm:$0xf0]  ;;  %v6290_v33 = vld [vmem:[#allocation8 + $0x868] sm:$0xf] }
 0x1a9   :  { %4320 = vmatpush.bf16.msrb.mxu3 %v6179_v53  ;;  %4283 = vmatpush.bf16.msrb.mxu0 %v5763_v44  ;;  %v6466_v53 = vld [vmem:[#allocation8 + $0x9c8] sm:$0xf]  ;;  %v7732_v44 = vld [vmem:[#allocation8 + $0x9d4] sm:$0xf0] }
 0x1aa   :  { %4296 = vmatpush.bf16.msrb.mxu1 %v5891_v55  ;;  %v7644_v55 = vld [vmem:[#allocation8 + $0x714] sm:$0xf0]  ;;  %v6467_v37 = vor.u32 %v7732_v44, %v6466_v53  ;;  %v6418_v35 = vld [vmem:[#allocation8 + $0x968] sm:$0xf]  ;;  %v6579_v53 = vor.u32 %v7760_v28, %v6578_v19 }
 0x1ab   :  { %v6115_v6 = vor.u32 %v7644_v55, %v6114_v38  ;;  %v7792_v31 = vld [vmem:[#allocation8 + $0xbb4] sm:$0xf0]  ;;  %v6562_v38 = vld [vmem:[#allocation8 + $0xa88] sm:$0xf] }
 0x1ac   :  { %4308 = vmatpush.bf16.msrb.mxu2 %v6035_v62  ;;  %v6322_v62 = vld [vmem:[#allocation8 + $0x8a8] sm:$0xf]  ;;  %v7720_v45 = vld [vmem:[#allocation8 + $0x974] sm:$0xf0] }
 0x1ad   :  { %4321 = vmatpush.bf16.msrb.mxu3 %v6163_v50  ;;  %4284 = vmatpush.bf16.msrb.mxu0 %v5747_v4  ;;  %v6450_v50 = vld [vmem:[#allocation8 + $0x9a8] sm:$0xf]  ;;  %v7728_v4 = vld [vmem:[#allocation8 + $0x9b4] sm:$0xf0]  ;;  %v6323_v10 = vor.u32 %v7696_v0, %v6322_v62  ;;  %v6419_v41 = vor.u32 %v7720_v45, %v6418_v35 }
 0x1ae   :  { %4297 = vmatpush.bf16.msrb.mxu1 %v5875_v2  ;;  %v4068_v2 = vpop.f32.mrf.mxu3  ;;  %v6451_v17 = vor.u32 %v7728_v4, %v6450_v50  ;;  %v7756_v55 = vld [vmem:[#allocation8 + $0xa94] sm:$0xf0]  ;;  %v6274_v61 = vld [vmem:[#allocation8 + $0x848] sm:$0xf] }
 0x1af   :  { %v7788_v60 = vld [vmem:[#allocation8 + $0xb94] sm:$0xf0]  ;;  %v6402_v62 = vld [vmem:[#allocation8 + $0x948] sm:$0xf] }
 0x1b0   :  { %4309 = vmatpush.bf16.msrb.mxu2 %v6019_v18  ;;  %v7796_v18 = vld [vmem:[#allocation8 + $0xbd4] sm:$0xf0]  ;;  %v6546_v4 = vld [vmem:[#allocation8 + $0xa68] sm:$0xf] }
 0x1b1   :  { %4322 = vmatpush.bf16.msrb.mxu3 %v6147_v3  ;;  %4285 = vmatpush.bf16.msrb.mxu0 %v5731_v12  ;;  %v7724_v3 = vld [vmem:[#allocation8 + $0x994] sm:$0xf0]  ;;  %v6595_v12 = vor.u32 %v7764_v36, %v6594_v11  ;;  %v6723_v23 = vor.u32 %v7796_v18, %v6722_v16  ;;  %v6386_v11 = vld [vmem:[#allocation8 + $0x928] sm:$0xf] }
 0x1b2   :  { %4298 = vmatpush.bf16.msrb.mxu1 %v5859_v29  ;;  %v6706_v29 = vld [vmem:[#allocation8 + $0xba8] sm:$0xf]  ;;  %v7716_v0 = vld [vmem:[#allocation8 + $0x954] sm:$0xf0] }
 0x1b3   :  { %v7752_v5 = vld [vmem:[#allocation8 + $0xa74] sm:$0xf0]  ;;  %v6530_v18 = vld [vmem:[#allocation8 + $0xa48] sm:$0xf] }
 0x1b4   :  { %4310 = vmatpush.bf16.msrb.mxu2 %v6003_v48  ;;  %4286 = vmatmul.bf16.vlgmr.msrb.gmra.mxu0 %v8346_v46  ;;  %v4079_v48 = vpop.f32.mrf.mxu0  ;;  %v4092_v42 = vpop.f32.mrf.mxu1  ;;  %v7784_v2 = vld [vmem:[#allocation8 + $0xb74] sm:$0xf0]  ;;  %v6242_v19 = vld [vmem:[#allocation8 + $0x808] sm:$0xf] }
 0x1b5   :  { %4330 = vmatpush.bf16.msra.mxu0 %v6355_v30  ;;  %4323 = vmatpush.bf16.msrb.mxu3 %v6131_v54  ;;  %v6435_v30 = vor.u32 %v7724_v3, %v6434_v39  ;;  %v4080_v44 = vadd.f32 %v4079_v48, %v8447_v47  ;;  %v6707_v54 = vor.u32 %v7792_v31, %v6706_v29  ;;  %v7712_v36 = vld [vmem:[#allocation8 + $0x934] sm:$0xf0]  ;;  %v6370_v29 = vld [vmem:[#allocation8 + $0x908] sm:$0xf] }
 0x1b6   :  { %4343 = vmatpush.bf16.msra.mxu1 %v6483_v34  ;;  %v7688_v34 = vld [vmem:[#allocation8 + $0x874] sm:$0xf0]  ;;  %v6866_v31 = vld [vmem:[#allocation8 + $0xce8] sm:$0xf] }
 0x1b7   :  { %4299 = vmatmul.bf16.vlgmr.msrb.gmra.mxu1 %v8351_v51  ;;  %v6291_v40 = vor.u32 %v7688_v34, %v6290_v33  ;;  %v4093_v59 = vadd.f32 %v4092_v42, %v4080_v44  ;;  %v7748_v3 = vld [vmem:[#allocation8 + $0xa54] sm:$0xf0]  ;;  %v6994_v35 = vld [vmem:[#allocation8 + $0xde8] sm:$0xf] }
 0x1b8   :  { %4311 = vmatpush.bf16.msrb.mxu2 %v5987_v1  ;;  %v6563_v1 = vor.u32 %v7756_v55, %v6562_v38  ;;  %v7676_v28 = vld [vmem:[#allocation8 + $0x814] sm:$0xf0]  ;;  %v6531_v34 = vor.u32 %v7748_v3, %v6530_v18  ;;  %v6514_v42 = vld [vmem:[#allocation8 + $0xa28] sm:$0xf] }
 0x1b9   :  { %4331 = vmatpush.bf16.msra.mxu0 %v6339_v58  ;;  %4324 = vmatpush.bf16.msrb.mxu3 %v6115_v6  ;;  %v6690_v58 = vld [vmem:[#allocation8 + $0xb88] sm:$0xf]  ;;  %v7832_v33 = vld [vmem:[#allocation8 + $0xcf4] sm:$0xf0]  ;;  %v6243_v44 = vor.u32 %v7676_v28, %v6242_v19 }
 0x1ba   :  { %4344 = vmatpush.bf16.msra.mxu1 %v6467_v37  ;;  %v7684_v37 = vld [vmem:[#allocation8 + $0x854] sm:$0xf0]  ;;  %v6691_v47 = vor.u32 %v7788_v60, %v6690_v58  ;;  %v6674_v6 = vld [vmem:[#allocation8 + $0xb68] sm:$0xf]  ;;  %v6867_v58 = vor.u32 %v7832_v33, %v6866_v31 }
 0x1bb   :  { %4312 = vmatmul.bf16.vlgmr.msrb.gmra.mxu2 %v8365_v25  ;;  %v6275_v50 = vor.u32 %v7684_v37, %v6274_v61  ;;  %v6675_v22 = vor.u32 %v7784_v2, %v6674_v6  ;;  %v7864_v45 = vld [vmem:[#allocation8 + $0xdf4] sm:$0xf0]  ;;  %v6850_v37 = vld [vmem:[#allocation8 + $0xcc8] sm:$0xf] }
 0x1bc   :  { %4356 = vmatpush.bf16.msra.mxu2 %v6611_v49  ;;  %4325 = vmatmul.bf16.vlgmr.msrb.gmra.mxu3 %v8367_v32  ;;  %v6403_v49 = vor.u32 %v7716_v0, %v6402_v62  ;;  %v4081_v16 = vpop.f32.mrf.mxu0  ;;  %v4094_v20 = vpop.f32.mrf.mxu1  ;;  %v7776_v60 = vld [vmem:[#allocation8 + $0xb34] sm:$0xf0]  ;;  %v6995_v61 = vor.u32 %v7864_v45, %v6994_v35  ;;  %v6626_v6 = vld [vmem:[#allocation8 + $0xb08] sm:$0xf] }
 0x1bd   :  { %4369 = vmatpush.bf16.msra.mxu3 %v6739_v8  ;;  %4332 = vmatpush.bf16.msra.mxu0 %v6323_v10  ;;  %v6258_v8 = vld [vmem:[#allocation8 + $0x828] sm:$0xf]  ;;  %v7680_v10 = vld [vmem:[#allocation8 + $0x834] sm:$0xf0] }
 0x1be   :  { %4345 = vmatpush.bf16.msra.mxu1 %v6451_v17  ;;  %v6547_v17 = vor.u32 %v7752_v5, %v6546_v4  ;;  %v6259_v39 = vor.u32 %v7680_v10, %v6258_v8  ;;  %v4105_v48 = vpop.f32.mrf.mxu2  ;;  %v7828_v62 = vld [vmem:[#allocation8 + $0xcd4] sm:$0xf0]  ;;  %v6498_v4 = vld [vmem:[#allocation8 + $0xa08] sm:$0xf] }
 0x1bf   :  { %v4118_v38 = vpop.f32.mrf.mxu3  ;;  %v6851_v2 = vor.u32 %v7828_v62, %v6850_v37  ;;  %v7122_v8 = vld [vmem:[#allocation8 + $0xee8] sm:$0xf]  ;;  %v7896_v10 = vld [vmem:[#allocation8 + $0xef4] sm:$0xf0] }
 0x1c0   :  { %4357 = vmatpush.bf16.msra.mxu2 %v6595_v12  ;;  %v6658_v12 = vld [vmem:[#allocation8 + $0xb48] sm:$0xf]  ;;  %v7928_v16 = vld [vmem:[#allocation8 + $0xff4] sm:$0xf0] }
 0x1c1   :  { %4370 = vmatpush.bf16.msra.mxu3 %v6723_v23  ;;  %4333 = vmatpush.bf16.msra.mxu0 %v6307_v24  ;;  %v7780_v23 = vld [vmem:[#allocation8 + $0xb54] sm:$0xf0]  ;;  %v6387_v24 = vor.u32 %v7712_v36, %v6386_v11  ;;  %v7250_v11 = vld [vmem:[#allocation8 + $0xfe8] sm:$0xf] }
 0x1c2   :  { %4346 = vmatpush.bf16.msra.mxu1 %v6435_v30  ;;  %v7708_v30 = vld [vmem:[#allocation8 + $0x914] sm:$0xf0]  ;;  %v7251_v19 = vor.u32 %v7928_v16, %v7250_v11  ;;  %v7234_v31 = vld [vmem:[#allocation8 + $0xfc8] sm:$0xf] }
 0x1c3   :  { %v6371_v55 = vor.u32 %v7708_v30, %v6370_v29  ;;  %v7824_v18 = vld [vmem:[#allocation8 + $0xcb4] sm:$0xf0]  ;;  %v7106_v29 = vld [vmem:[#allocation8 + $0xec8] sm:$0xf] }
 0x1c4   :  { %4358 = vmatpush.bf16.msra.mxu2 %v6579_v53  ;;  %v6659_v53 = vor.u32 %v7780_v23, %v6658_v12  ;;  %v7123_v23 = vor.u32 %v7896_v10, %v7122_v8  ;;  %v7892_v30 = vld [vmem:[#allocation8 + $0xed4] sm:$0xf0]  ;;  %v6818_v35 = vld [vmem:[#allocation8 + $0xc88] sm:$0xf] }
 0x1c5   :  { %4371 = vmatpush.bf16.msra.mxu3 %v6707_v54  ;;  %4334 = vmatpush.bf16.msra.mxu0 %v6291_v40  ;;  %v7744_v54 = vld [vmem:[#allocation8 + $0xa34] sm:$0xf0]  ;;  %v4106_v40 = vadd.f32 %v4105_v48, %v4093_v59  ;;  %v6946_v48 = vld [vmem:[#allocation8 + $0xd88] sm:$0xf] }
 0x1c6   :  { %4347 = vmatpush.bf16.msra.mxu1 %v6419_v41  ;;  %v6642_v41 = vld [vmem:[#allocation8 + $0xb28] sm:$0xf]  ;;  %v7740_v59 = vld [vmem:[#allocation8 + $0xa14] sm:$0xf0]  ;;  %v4107_v3 = vpop.f32.mrf.mxu2 }
 0x1c7   :  { %v8454_v0 = vadd.f32 %v4118_v38, %v4106_v40  ;;  %v6643_v5 = vor.u32 %v7776_v60, %v6642_v41  ;;  %v6499_v20 = vor.u32 %v7740_v59, %v6498_v4  ;;  %v7820_v45 = vld [vmem:[#allocation8 + $0xc94] sm:$0xf0]  ;;  %v7090_v40 = vld [vmem:[#allocation8 + $0xea8] sm:$0xf] }
 0x1c8   :  { %4359 = vmatpush.bf16.msra.mxu2 %v6563_v1  ;;  %v6515_v1 = vor.u32 %v7744_v54, %v6514_v42  ;;  %v6819_v54 = vor.u32 %v7820_v45, %v6818_v35  ;;  %v7888_v38 = vld [vmem:[#allocation8 + $0xeb4] sm:$0xf0]  ;;  %v6802_v60 = vld [vmem:[#allocation8 + $0xc68] sm:$0xf] }
 0x1c9   :  { %4372 = vmatpush.bf16.msra.mxu3 %v6691_v47  ;;  %4335 = vmatpush.bf16.msra.mxu0 %v6275_v50  ;;  %v6978_v47 = vld [vmem:[#allocation8 + $0xdc8] sm:$0xf]  ;;  %v7860_v50 = vld [vmem:[#allocation8 + $0xdd4] sm:$0xf0] }
 0x1ca   :  { %4348 = vmatpush.bf16.msra.mxu1 %v6403_v49  ;;  %v7772_v49 = vld [vmem:[#allocation8 + $0xb14] sm:$0xf0]  ;;  %v6979_v36 = vor.u32 %v7860_v50, %v6978_v47  ;;  %v6930_v37 = vld [vmem:[#allocation8 + $0xd68] sm:$0xf]  ;;  %v7091_v47 = vor.u32 %v7888_v38, %v7090_v40 }
 0x1cb   :  { %v6627_v12 = vor.u32 %v7772_v49, %v6626_v6  ;;  %v7920_v41 = vld [vmem:[#allocation8 + $0xfb4] sm:$0xf0]  ;;  %v7074_v6 = vld [vmem:[#allocation8 + $0xe88] sm:$0xf] }
 0x1cc   :  { %4360 = vmatpush.bf16.msra.mxu2 %v6547_v17  ;;  %v6834_v17 = vld [vmem:[#allocation8 + $0xca8] sm:$0xf]  ;;  %v7848_v62 = vld [vmem:[#allocation8 + $0xd74] sm:$0xf0] }
 0x1cd   :  { %4373 = vmatpush.bf16.msra.mxu3 %v6675_v22  ;;  %4336 = vmatpush.bf16.msra.mxu0 %v6259_v39  ;;  %v6962_v22 = vld [vmem:[#allocation8 + $0xda8] sm:$0xf]  ;;  %v7856_v39 = vld [vmem:[#allocation8 + $0xdb4] sm:$0xf0]  ;;  %v6835_v28 = vor.u32 %v7824_v18, %v6834_v17  ;;  %v6931_v8 = vor.u32 %v7848_v62, %v6930_v37  ;;  %v7478_v37 = vld [vmem:[#allocation8 + $0x1ec] sm:$0xf] }
 0x1ce   :  { %4349 = vmatpush.bf16.msra.mxu1 %v6387_v24  ;;  %v4120_v24 = vpop.f32.mrf.mxu3  ;;  %v6963_v33 = vor.u32 %v7856_v39, %v6962_v22  ;;  %v7884_v49 = vld [vmem:[#allocation8 + $0xe94] sm:$0xf0]  ;;  %v6786_v11 = vld [vmem:[#allocation8 + $0xc48] sm:$0xf]  ;;  %v5460_v62 = vld [vmem:[#allocation8 + $0x1f8] sm:$0xf0] }
 0x1cf   :  { %v7916_v10 = vld [vmem:[#allocation8 + $0xf94] sm:$0xf0]  ;;  %v6914_v17 = vld [vmem:[#allocation8 + $0xd48] sm:$0xf] }
 0x1d0   :  { %4361 = vmatpush.bf16.msra.mxu2 %v6531_v34  ;;  %v7924_v34 = vld [vmem:[#allocation8 + $0xfd4] sm:$0xf0]  ;;  %v7058_v39 = vld [vmem:[#allocation8 + $0xe68] sm:$0xf] }
 0x1d1   :  { %4374 = vmatpush.bf16.msra.mxu3 %v6659_v53  ;;  %4337 = vmatpush.bf16.msra.mxu0 %v6243_v44  ;;  %v7852_v53 = vld [vmem:[#allocation8 + $0xd94] sm:$0xf0]  ;;  %v7107_v44 = vor.u32 %v7892_v30, %v7106_v29  ;;  %v7235_v42 = vor.u32 %v7924_v34, %v7234_v31  ;;  %v6898_v29 = vld [vmem:[#allocation8 + $0xd28] sm:$0xf] }
 0x1d2   :  { %4350 = vmatpush.bf16.msra.mxu1 %v6371_v55  ;;  %v7218_v55 = vld [vmem:[#allocation8 + $0xfa8] sm:$0xf]  ;;  %v7844_v18 = vld [vmem:[#allocation8 + $0xd54] sm:$0xf0] }
 0x1d3   :  { %v7880_v3 = vld [vmem:[#allocation8 + $0xe74] sm:$0xf0]  ;;  %v7042_v34 = vld [vmem:[#allocation8 + $0xe48] sm:$0xf] }
 0x1d4   :  { %4362 = vmatpush.bf16.msra.mxu2 %v6515_v1  ;;  %4338 = vmatmul.bf16.vlgmr.msra.gmra.mxu0 %v8379_v27  ;;  %v4131_v1 = vpop.f32.mrf.mxu0  ;;  %v4144_v4 = vpop.f32.mrf.mxu1  ;;  %v7912_v24 = vld [vmem:[#allocation8 + $0xf74] sm:$0xf0]  ;;  %v6754_v40 = vld [vmem:[#allocation8 + $0xc08] sm:$0xf] }
 0x1d5   :  { %4382 = vmatpush.bf16.msrb.mxu0 %v6867_v58  ;;  %4375 = vmatpush.bf16.msra.mxu3 %v6643_v5  ;;  %v6947_v58 = vor.u32 %v7852_v53, %v6946_v48  ;;  %v4132_v50 = vadd.f32 %v4131_v1, %v8454_v0  ;;  %v7219_v5 = vor.u32 %v7920_v41, %v7218_v55  ;;  %v7840_v30 = vld [vmem:[#allocation8 + $0xd34] sm:$0xf0]  ;;  %v6882_v55 = vld [vmem:[#allocation8 + $0xd08] sm:$0xf]  ;;  %v7446_v41 = vld [vmem:[#allocation8 + $0xec] sm:$0xf] }
 0x1d6   :  { %4395 = vmatpush.bf16.msrb.mxu1 %v6995_v61  ;;  %v7816_v61 = vld [vmem:[#allocation8 + $0xc74] sm:$0xf0] }
 0x1d7   :  { %4351 = vmatmul.bf16.vlgmr.msra.gmra.mxu1 %v8382_v43  ;;  %v6803_v59 = vor.u32 %v7816_v61, %v6802_v60  ;;  %v4145_v16 = vadd.f32 %v4144_v4, %v4132_v50  ;;  %v7876_v53 = vld [vmem:[#allocation8 + $0xe54] sm:$0xf0]  ;;  %v5332_v60 = vld [vmem:[#allocation8 + $0xf8] sm:$0xf0]  ;;  %v7026_v4 = vld [vmem:[#allocation8 + $0xe28] sm:$0xf] }
 0x1d8   :  { %4363 = vmatpush.bf16.msra.mxu2 %v6499_v20  ;;  %v7075_v20 = vor.u32 %v7884_v49, %v7074_v6  ;;  %v7804_v38 = vld [vmem:[#allocation8 + $0xc14] sm:$0xf0]  ;;  %v7043_v61 = vor.u32 %v7876_v53, %v7042_v34  ;;  %v5300_v34 = vld [vmem:[#allocation8 + $0xb8] sm:$0xf0] }
 0x1d9   :  { %4383 = vmatpush.bf16.msrb.mxu0 %v6851_v2  ;;  %4376 = vmatpush.bf16.msra.mxu3 %v6627_v12  ;;  %v7202_v2 = vld [vmem:[#allocation8 + $0xf88] sm:$0xf]  ;;  %v6755_v50 = vor.u32 %v7804_v38, %v6754_v40 }
 0x1da   :  { %4396 = vmatpush.bf16.msrb.mxu1 %v6979_v36  ;;  %v7812_v36 = vld [vmem:[#allocation8 + $0xc54] sm:$0xf0]  ;;  %v7203_v0 = vor.u32 %v7916_v10, %v7202_v2  ;;  %v7186_v12 = vld [vmem:[#allocation8 + $0xf68] sm:$0xf]  ;;  %v5335_v2 = vor.u32 %v7446_v41, %v5332_v60  ;;  %v7538_v41 = vld [vmem:[#allocation8 + $0x3cc] sm:$0xf] }
 0x1db   :  { %4364 = vmatmul.bf16.vlgmr.msra.gmra.mxu2 %v8390_v13  ;;  %v6787_v22 = vor.u32 %v7812_v36, %v6786_v11  ;;  %v7187_v45 = vor.u32 %v7912_v24, %v7186_v12  ;;  %v7904_v10 = vld [vmem:[#allocation8 + $0xf34] sm:$0xf0]  ;;  %v5463_v11 = vor.u32 %v7478_v37, %v5460_v62  ;;  %v7442_v36 = vld [vmem:[#allocation8 + $0xcc] sm:$0xf]  ;;  %v7138_v12 = vld [vmem:[#allocation8 + $0xf08] sm:$0xf] }
 0x1dc   :  { %4408 = vmatpush.bf16.msrb.mxu2 %v7123_v23  ;;  %4377 = vmatmul.bf16.vlgmr.msra.gmra.mxu3 %v8392_v63  ;;  %v6915_v23 = vor.u32 %v7844_v18, %v6914_v17  ;;  %v4133_v31 = vpop.f32.mrf.mxu0  ;;  %v4146_v35 = vpop.f32.mrf.mxu1  ;;  %v5316_v17 = vld [vmem:[#allocation8 + $0xd8] sm:$0xf0]  ;;  %v7434_v37 = vld [vmem:[#allocation8 + $0x8c] sm:$0xf] }
 0x1dd   :  { %4421 = vmatpush.bf16.msrb.mxu3 %v7251_v19  ;;  %4384 = vmatpush.bf16.msrb.mxu0 %v6835_v28  ;;  %v6770_v19 = vld [vmem:[#allocation8 + $0xc28] sm:$0xf]  ;;  %v7808_v28 = vld [vmem:[#allocation8 + $0xc34] sm:$0xf0]  ;;  %v5319_v24 = vor.u32 %v7442_v36, %v5316_v17  ;;  %v5716_v31 = vld [vmem:[#allocation8 + $0x3f8] sm:$0xf0] }
 0x1de   :  { %4397 = vmatpush.bf16.msrb.mxu1 %v6963_v33  ;;  %v7059_v33 = vor.u32 %v7880_v3, %v7058_v39  ;;  %v6771_v48 = vor.u32 %v7808_v28, %v6770_v19  ;;  %v4157_v1 = vpop.f32.mrf.mxu2  ;;  %v7010_v39 = vld [vmem:[#allocation8 + $0xe08] sm:$0xf]  ;;  %v7510_v19 = vld [vmem:[#allocation8 + $0x2ec] sm:$0xf]  ;;  %v5588_v28 = vld [vmem:[#allocation8 + $0x2f8] sm:$0xf0] }
 0x1df   :  { %v4170_v6 = vpop.f32.mrf.mxu3  ;;  %v5284_v62 = vld [vmem:[#allocation8 + $0x98] sm:$0xf0]  ;;  %v7462_v36 = vld [vmem:[#allocation8 + $0x16c] sm:$0xf] }
 0x1e0   :  { %4409 = vmatpush.bf16.msrb.mxu2 %v7107_v44  ;;  %v7170_v44 = vld [vmem:[#allocation8 + $0xf48] sm:$0xf]  ;;  %v5396_v17 = vld [vmem:[#allocation8 + $0x178] sm:$0xf0] }
 0x1e1   :  { %4422 = vmatpush.bf16.msrb.mxu3 %v7235_v42  ;;  %4385 = vmatpush.bf16.msrb.mxu0 %v6819_v54  ;;  %v7908_v42 = vld [vmem:[#allocation8 + $0xf54] sm:$0xf0]  ;;  %v6899_v54 = vor.u32 %v7840_v30, %v6898_v29  ;;  %v7542_v29 = vld [vmem:[#allocation8 + $0x3ec] sm:$0xf] }
 0x1e2   :  { %4398 = vmatpush.bf16.msrb.mxu1 %v6947_v58  ;;  %v7836_v58 = vld [vmem:[#allocation8 + $0xd14] sm:$0xf0]  ;;  %v5719_v40 = vor.u32 %v7542_v29, %v5716_v31  ;;  %v7426_v29 = vld [vmem:[#allocation8 + $0x4c] sm:$0xf] }
 0x1e3   :  { %v6883_v49 = vor.u32 %v7836_v58, %v6882_v55  ;;  %v7506_v55 = vld [vmem:[#allocation8 + $0x2cc] sm:$0xf]  ;;  %v5572_v58 = vld [vmem:[#allocation8 + $0x2d8] sm:$0xf0] }
 0x1e4   :  { %4410 = vmatpush.bf16.msrb.mxu2 %v7091_v47  ;;  %v7171_v47 = vor.u32 %v7908_v42, %v7170_v44  ;;  %v5591_v42 = vor.u32 %v7510_v19, %v5588_v28  ;;  %v5399_v19 = vor.u32 %v7462_v36, %v5396_v17  ;;  %v5668_v28 = vld [vmem:[#allocation8 + $0x398] sm:$0xf0]  ;;  %v7606_v36 = vld [vmem:[#allocation8 + $0x5ec] sm:$0xf] }
 0x1e5   :  { %4423 = vmatpush.bf16.msrb.mxu3 %v7219_v5  ;;  %4386 = vmatpush.bf16.msrb.mxu0 %v6803_v59  ;;  %v7872_v5 = vld [vmem:[#allocation8 + $0xe34] sm:$0xf0]  ;;  %v4158_v59 = vadd.f32 %v4157_v1, %v4145_v16  ;;  %v7466_v1 = vld [vmem:[#allocation8 + $0x18c] sm:$0xf]  ;;  %v5972_v17 = vld [vmem:[#allocation8 + $0x5f8] sm:$0xf0] }
 0x1e6   :  { %4399 = vmatpush.bf16.msrb.mxu1 %v6931_v8  ;;  %v7154_v8 = vld [vmem:[#allocation8 + $0xf28] sm:$0xf]  ;;  %v7868_v16 = vld [vmem:[#allocation8 + $0xe14] sm:$0xf0]  ;;  %v4159_v53 = vpop.f32.mrf.mxu2 }
 0x1e7   :  { %v8461_v18 = vadd.f32 %v4170_v6, %v4158_v59  ;;  %v7155_v3 = vor.u32 %v7904_v10, %v7154_v8  ;;  %v7011_v35 = vor.u32 %v7868_v16, %v7010_v39  ;;  %v7502_v59 = vld [vmem:[#allocation8 + $0x2ac] sm:$0xf]  ;;  %v5556_v6 = vld [vmem:[#allocation8 + $0x2b8] sm:$0xf0] }
 0x1e8   :  { %4411 = vmatpush.bf16.msrb.mxu2 %v7075_v20  ;;  %v7027_v20 = vor.u32 %v7872_v5, %v7026_v4  ;;  %v5287_v5 = vor.u32 %v7434_v37, %v5284_v62  ;;  %v5684_v8 = vld [vmem:[#allocation8 + $0x3b8] sm:$0xf0]  ;;  %v7430_v10 = vld [vmem:[#allocation8 + $0x6c] sm:$0xf] }
 0x1e9   :  { %4424 = vmatpush.bf16.msrb.mxu3 %v7203_v0  ;;  %4387 = vmatpush.bf16.msrb.mxu0 %v6787_v22  ;;  %v7474_v0 = vld [vmem:[#allocation8 + $0x1cc] sm:$0xf]  ;;  %v5444_v22 = vld [vmem:[#allocation8 + $0x1d8] sm:$0xf0] }
 0x1ea   :  { %4400 = vmatpush.bf16.msrb.mxu1 %v6915_v23  ;;  %v7900_v23 = vld [vmem:[#allocation8 + $0xf14] sm:$0xf0]  ;;  %v5447_v30 = vor.u32 %v7474_v0, %v5444_v22  ;;  %v5559_v0 = vor.u32 %v7502_v59, %v5556_v6  ;;  %v5524_v53 = vld [vmem:[#allocation8 + $0x278] sm:$0xf0]  ;;  %v7418_v59 = vld [vmem:[#allocation8 + $0xc] sm:$0xf] }
 0x1eb   :  { %v7139_v44 = vor.u32 %v7900_v23, %v7138_v12  ;;  %v7498_v12 = vld [vmem:[#allocation8 + $0x28c] sm:$0xf]  ;;  %v5540_v23 = vld [vmem:[#allocation8 + $0x298] sm:$0xf0] }
 0x1ec   :  { %4412 = vmatpush.bf16.msrb.mxu2 %v7059_v33  ;;  %v7438_v33 = vld [vmem:[#allocation8 + $0xac] sm:$0xf]  ;;  %v5220_v6 = vld [vmem:[#allocation8 + $0x18] sm:$0xf0] }
 0x1ed   :  { %4425 = vmatpush.bf16.msrb.mxu3 %v7187_v45  ;;  %4388 = vmatpush.bf16.msrb.mxu0 %v6771_v48  ;;  %v7470_v45 = vld [vmem:[#allocation8 + $0x1ac] sm:$0xf]  ;;  %v5428_v48 = vld [vmem:[#allocation8 + $0x1b8] sm:$0xf0]  ;;  %v5303_v38 = vor.u32 %v7438_v33, %v5300_v34 }
 0x1ee   :  { %4401 = vmatpush.bf16.msrb.mxu1 %v6899_v54  ;;  %v4172_v54 = vpop.f32.mrf.mxu3  ;;  %v5431_v60 = vor.u32 %v7470_v45, %v5428_v48  ;;  %v7458_v33 = vld [vmem:[#allocation8 + $0x14c] sm:$0xf]  ;;  %v5380_v34 = vld [vmem:[#allocation8 + $0x158] sm:$0xf0] }
 0x1ef   :  { %v7494_v48 = vld [vmem:[#allocation8 + $0x26c] sm:$0xf]  ;;  %v5652_v54 = vld [vmem:[#allocation8 + $0x378] sm:$0xf0] }
 0x1f0   :  { %4413 = vmatpush.bf16.msrb.mxu2 %v7043_v61  ;;  %v5700_v61 = vld [vmem:[#allocation8 + $0x3d8] sm:$0xf0] }
 0x1f1   :  { %4426 = vmatpush.bf16.msrb.mxu3 %v7171_v47  ;;  %4389 = vmatpush.bf16.msrb.mxu0 %v6755_v50  ;;  %v5412_v47 = vld [vmem:[#allocation8 + $0x198] sm:$0xf0]  ;;  %v5575_v50 = vor.u32 %v7506_v55, %v5572_v58  ;;  %v5703_v4 = vor.u32 %v7538_v41, %v5700_v61  ;;  %v7454_v55 = vld [vmem:[#allocation8 + $0x12c] sm:$0xf] }
 0x1f2   :  { %4402 = vmatpush.bf16.msrb.mxu1 %v6883_v49  ;;  %v7534_v49 = vld [vmem:[#allocation8 + $0x3ac] sm:$0xf]  ;;  %v5364_v58 = vld [vmem:[#allocation8 + $0x138] sm:$0xf0] }
 0x1f3   :  { %v7490_v61 = vld [vmem:[#allocation8 + $0x24c] sm:$0xf] }
 0x1f4   :  { %4414 = vmatpush.bf16.msrb.mxu2 %v7027_v20  ;;  %4390 = vmatmul.bf16.vlgmr.msrb.gmra.mxu0 %v8406_v7  ;;  %v4183_v20 = vpop.f32.mrf.mxu0  ;;  %v4196_v39 = vpop.f32.mrf.mxu1 }
 0x1f5   :  { %4434 = vmatpush.bf16.msra.mxu0 %v5335_v2  ;;  %4427 = vmatpush.bf16.msrb.mxu3 %v7155_v3  ;;  %v5415_v2 = vor.u32 %v7466_v1, %v5412_v47  ;;  %v4184_v22 = vadd.f32 %v4183_v20, %v8461_v18  ;;  %v5687_v3 = vor.u32 %v7534_v49, %v5684_v8  ;;  %v5508_v47 = vld [vmem:[#allocation8 + $0x258] sm:$0xf0]  ;;  %v7450_v49 = vld [vmem:[#allocation8 + $0x10c] sm:$0xf] }
 0x1f6   :  { %4447 = vmatpush.bf16.msra.mxu1 %v5463_v11  ;;  %v5268_v11 = vld [vmem:[#allocation8 + $0x78] sm:$0xf0]  ;;  %v7574_v8 = vld [vmem:[#allocation8 + $0x4ec] sm:$0xf] }
 0x1f7   :  { %4403 = vmatmul.bf16.vlgmr.msrb.gmra.mxu1 %v8408_v14  ;;  %v5271_v16 = vor.u32 %v7430_v10, %v5268_v11  ;;  %v4197_v31 = vadd.f32 %v4196_v39, %v4184_v22  ;;  %v5844_v10 = vld [vmem:[#allocation8 + $0x4f8] sm:$0xf0]  ;;  %v5511_v11 = vor.u32 %v7490_v61, %v5508_v47  ;;  %v5223_v22 = vor.u32 %v7418_v59, %v5220_v6  ;;  %v7486_v39 = vld [vmem:[#allocation8 + $0x22c] sm:$0xf] }
 0x1f8   :  { %4415 = vmatpush.bf16.msrb.mxu2 %v7011_v35  ;;  %v5543_v35 = vor.u32 %v7498_v12, %v5540_v23  ;;  %v5812_v61 = vld [vmem:[#allocation8 + $0x4b8] sm:$0xf0] }
 0x1f9   :  { %4435 = vmatpush.bf16.msra.mxu0 %v5319_v24  ;;  %4428 = vmatpush.bf16.msrb.mxu3 %v7139_v44  ;;  %v7530_v24 = vld [vmem:[#allocation8 + $0x38c] sm:$0xf] }
 0x1fa   :  { %4448 = vmatpush.bf16.msra.mxu1 %v5447_v30  ;;  %v5252_v30 = vld [vmem:[#allocation8 + $0x58] sm:$0xf0]  ;;  %v5671_v18 = vor.u32 %v7530_v24, %v5668_v28  ;;  %v7526_v44 = vld [vmem:[#allocation8 + $0x36c] sm:$0xf]  ;;  %v5847_v24 = vor.u32 %v7574_v8, %v5844_v10 }
 0x1fb   :  { %4416 = vmatmul.bf16.vlgmr.msrb.gmra.mxu2 %v8412_v26  ;;  %v5255_v45 = vor.u32 %v7426_v29, %v5252_v30  ;;  %v5655_v62 = vor.u32 %v7526_v44, %v5652_v54  ;;  %v5620_v28 = vld [vmem:[#allocation8 + $0x338] sm:$0xf0]  ;;  %v5975_v29 = vor.u32 %v7606_v36, %v5972_v17  ;;  %v7570_v30 = vld [vmem:[#allocation8 + $0x4cc] sm:$0xf] }
 0x1fc   :  { %4460 = vmatpush.bf16.msra.mxu2 %v5591_v42  ;;  %4429 = vmatmul.bf16.vlgmr.msrb.gmra.mxu3 %v8414_v56  ;;  %v5383_v42 = vor.u32 %v7458_v33, %v5380_v34  ;;  %v4185_v41 = vpop.f32.mrf.mxu0  ;;  %v4198_v37 = vpop.f32.mrf.mxu1  ;;  %v5828_v33 = vld [vmem:[#allocation8 + $0x4d8] sm:$0xf0]  ;;  %v7514_v44 = vld [vmem:[#allocation8 + $0x30c] sm:$0xf] }
 0x1fd   :  { %4473 = vmatpush.bf16.msra.mxu3 %v5719_v40  ;;  %4436 = vmatpush.bf16.msra.mxu0 %v5303_v38  ;;  %v7422_v40 = vld [vmem:[#allocation8 + $0x2c] sm:$0xf]  ;;  %v5236_v38 = vld [vmem:[#allocation8 + $0x38] sm:$0xf0]  ;;  %v5831_v54 = vor.u32 %v7570_v30, %v5828_v33 }
 0x1fe   :  { %4449 = vmatpush.bf16.msra.mxu1 %v5431_v60  ;;  %v5527_v60 = vor.u32 %v7494_v48, %v5524_v53  ;;  %v5239_v1 = vor.u32 %v7422_v40, %v5236_v38  ;;  %v4209_v20 = vpop.f32.mrf.mxu2  ;;  %v7482_v48 = vld [vmem:[#allocation8 + $0x20c] sm:$0xf]  ;;  %v6100_v38 = vld [vmem:[#allocation8 + $0x6f8] sm:$0xf0] }
 0x1ff   :  { %v4222_v12 = vpop.f32.mrf.mxu3  ;;  %v7638_v40 = vld [vmem:[#allocation8 + $0x6ec] sm:$0xf]  ;;  %v6228_v41 = vld [vmem:[#allocation8 + $0x7f8] sm:$0xf0] }
 0x200   :  { %4461 = vmatpush.bf16.msra.mxu2 %v5575_v50  ;;  %v7522_v50 = vld [vmem:[#allocation8 + $0x34c] sm:$0xf]  ;;  %v5796_v36 = vld [vmem:[#allocation8 + $0x498] sm:$0xf0] }
 0x201   :  { %4474 = vmatpush.bf16.msra.mxu3 %v5703_v4  ;;  %4437 = vmatpush.bf16.msra.mxu0 %v5287_v5  ;;  %v5636_v4 = vld [vmem:[#allocation8 + $0x358] sm:$0xf0]  ;;  %v5367_v5 = vor.u32 %v7454_v55, %v5364_v58  ;;  %v7670_v55 = vld [vmem:[#allocation8 + $0x7ec] sm:$0xf] }
 0x202   :  { %4450 = vmatpush.bf16.msra.mxu1 %v5415_v2  ;;  %v5348_v2 = vld [vmem:[#allocation8 + $0x118] sm:$0xf0]  ;;  %v6231_v59 = vor.u32 %v7670_v55, %v6228_v41  ;;  %v7666_v8 = vld [vmem:[#allocation8 + $0x7cc] sm:$0xf] }
 0x203   :  { %v5351_v23 = vor.u32 %v7450_v49, %v5348_v2  ;;  %v7634_v49 = vld [vmem:[#allocation8 + $0x6cc] sm:$0xf]  ;;  %v6084_v2 = vld [vmem:[#allocation8 + $0x6d8] sm:$0xf0] }
 0x204   :  { %4462 = vmatpush.bf16.msra.mxu2 %v5559_v0  ;;  %v5639_v0 = vor.u32 %v7522_v50, %v5636_v4  ;;  %v6103_v4 = vor.u32 %v7638_v40, %v6100_v38  ;;  %v7594_v17 = vld [vmem:[#allocation8 + $0x58c] sm:$0xf]  ;;  %v5908_v33 = vld [vmem:[#allocation8 + $0x578] sm:$0xf0] }
 0x205   :  { %4475 = vmatpush.bf16.msra.mxu3 %v5687_v3  ;;  %4438 = vmatpush.bf16.msra.mxu0 %v5271_v16  ;;  %v5492_v3 = vld [vmem:[#allocation8 + $0x238] sm:$0xf0]  ;;  %v4210_v16 = vadd.f32 %v4209_v20, %v4197_v31  ;;  %v7590_v30 = vld [vmem:[#allocation8 + $0x56c] sm:$0xf] }
 0x206   :  { %4451 = vmatpush.bf16.msra.mxu1 %v5399_v19  ;;  %v7518_v19 = vld [vmem:[#allocation8 + $0x32c] sm:$0xf]  ;;  %v5476_v31 = vld [vmem:[#allocation8 + $0x218] sm:$0xf0]  ;;  %v4211_v47 = vpop.f32.mrf.mxu2 }
 0x207   :  { %v8468_v34 = vadd.f32 %v4222_v12, %v4210_v16  ;;  %v5623_v53 = vor.u32 %v7518_v19, %v5620_v28  ;;  %v5479_v37 = vor.u32 %v7482_v48, %v5476_v31  ;;  %v5924_v20 = vld [vmem:[#allocation8 + $0x598] sm:$0xf0]  ;;  %v7630_v16 = vld [vmem:[#allocation8 + $0x6ac] sm:$0xf] }
 0x208   :  { %4463 = vmatpush.bf16.msra.mxu2 %v5543_v35  ;;  %v5495_v35 = vor.u32 %v7486_v39, %v5492_v3  ;;  %v6068_v12 = vld [vmem:[#allocation8 + $0x6b8] sm:$0xf0]  ;;  %v7558_v28 = vld [vmem:[#allocation8 + $0x46c] sm:$0xf] }
 0x209   :  { %4476 = vmatpush.bf16.msra.mxu3 %v5671_v18  ;;  %4439 = vmatpush.bf16.msra.mxu0 %v5255_v45  ;;  %v7602_v18 = vld [vmem:[#allocation8 + $0x5cc] sm:$0xf]  ;;  %v5956_v45 = vld [vmem:[#allocation8 + $0x5d8] sm:$0xf0] }
 0x20a   :  { %4452 = vmatpush.bf16.msra.mxu1 %v5383_v42  ;;  %v5604_v42 = vld [vmem:[#allocation8 + $0x318] sm:$0xf0]  ;;  %v5959_v58 = vor.u32 %v7602_v18, %v5956_v45  ;;  %v6071_v18 = vor.u32 %v7630_v16, %v6068_v12  ;;  %v7554_v38 = vld [vmem:[#allocation8 + $0x44c] sm:$0xf] }
 0x20b   :  { %v5607_v50 = vor.u32 %v7514_v44, %v5604_v42  ;;  %v6196_v19 = vld [vmem:[#allocation8 + $0x7b8] sm:$0xf0]  ;;  %v7626_v44 = vld [vmem:[#allocation8 + $0x68c] sm:$0xf] }
 0x20c   :  { %4464 = vmatpush.bf16.msra.mxu2 %v5527_v60  ;;  %v7566_v60 = vld [vmem:[#allocation8 + $0x4ac] sm:$0xf]  ;;  %v6180_v40 = vld [vmem:[#allocation8 + $0x798] sm:$0xf0] }
 0x20d   :  { %4477 = vmatpush.bf16.msra.mxu3 %v5655_v62  ;;  %4440 = vmatpush.bf16.msra.mxu0 %v5239_v1  ;;  %v7598_v62 = vld [vmem:[#allocation8 + $0x5ac] sm:$0xf]  ;;  %v5940_v1 = vld [vmem:[#allocation8 + $0x5b8] sm:$0xf0]  ;;  %v5815_v6 = vor.u32 %v7566_v60, %v5812_v61 }
 0x20e   :  { %4453 = vmatpush.bf16.msra.mxu1 %v5367_v5  ;;  %v4224_v5 = vpop.f32.mrf.mxu3  ;;  %v5943_v10 = vor.u32 %v7598_v62, %v5940_v1  ;;  %v7658_v42 = vld [vmem:[#allocation8 + $0x78c] sm:$0xf]  ;;  %v5764_v55 = vld [vmem:[#allocation8 + $0x458] sm:$0xf0] }
 0x20f   :  { %v5892_v41 = vld [vmem:[#allocation8 + $0x558] sm:$0xf0]  ;;  %v6183_v61 = vor.u32 %v7658_v42, %v6180_v40  ;;  %v7622_v62 = vld [vmem:[#allocation8 + $0x66c] sm:$0xf] }
 0x210   :  { %4465 = vmatpush.bf16.msra.mxu2 %v5511_v11  ;;  %v6212_v11 = vld [vmem:[#allocation8 + $0x7d8] sm:$0xf0]  ;;  %v7654_v47 = vld [vmem:[#allocation8 + $0x76c] sm:$0xf] }
 0x211   :  { %4478 = vmatpush.bf16.msra.mxu3 %v5639_v0  ;;  %4441 = vmatpush.bf16.msra.mxu0 %v5223_v22  ;;  %v8472_v0 = vld [vmem:[#allocation10] ss:$4 sm:$0xf]  ;;  %v6215_v39 = vor.u32 %v7666_v8, %v6212_v11  ;;  %v6036_v1 = vld [vmem:[#allocation8 + $0x678] sm:$0xf0] }
 0x212   :  { %4454 = vmatpush.bf16.msra.mxu1 %v5351_v23  ;;  %v1244_v22 = vperm.slane %v8472_v0, 2  ;;  %v7662_v23 = vld [vmem:[#allocation8 + $0x7ac] sm:$0xf]  ;;  %v6039_v8 = vor.u32 %v7622_v62, %v6036_v1  ;;  %v5860_v12 = vld [vmem:[#allocation8 + $0x518] sm:$0xf0] }
 0x213   :  { %v7550_v5 = vld [vmem:[#allocation8 + $0x42c] sm:$0xf]  ;;  %v6132_v42 = vld [vmem:[#allocation8 + $0x738] sm:$0xf0] }
 0x214   :  { %4466 = vmatpush.bf16.msra.mxu2 %v5495_v35  ;;  %4442 = vmatmul.bf16.vlgmr.msra.gmra.mxu0 %v8314_v9  ;;  %v7562_v9 = vld [vmem:[#allocation8 + $0x48c] sm:$0xf]  ;;  %v4235_v35 = vpop.f32.mrf.mxu0  ;;  %v4248_v48 = vpop.f32.mrf.mxu1  ;;  %v6116_v1 = vld [vmem:[#allocation8 + $0x718] sm:$0xf0] }
 0x215   :  { %4486 = vmatpush.bf16.msrb.mxu0 %v5847_v24  ;;  %4479 = vmatpush.bf16.msra.mxu3 %v5623_v53  ;;  %v5799_v3 = vor.u32 %v7562_v9, %v5796_v36  ;;  %v5927_v24 = vor.u32 %v7594_v17, %v5924_v20  ;;  %v4236_v45 = vadd.f32 %v4235_v35, %v1244_v22  ;;  %v6020_v17 = vld [vmem:[#allocation8 + $0x658] sm:$0xf0]  ;;  %v7650_v20 = vld [vmem:[#allocation8 + $0x74c] sm:$0xf] }
 0x216   :  { %4499 = vmatpush.bf16.msrb.mxu1 %v5975_v29  ;;  %v5780_v29 = vld [vmem:[#allocation8 + $0x478] sm:$0xf0]  ;;  %v6199_v53 = vor.u32 %v7662_v23, %v6196_v19  ;;  %v7578_v16 = vld [vmem:[#allocation8 + $0x50c] sm:$0xf] }
 0x217   :  { %4455 = vmatmul.bf16.vlgmr.msra.gmra.mxu1 %v8317_v15  ;;  %v6087_v15 = vor.u32 %v7634_v49, %v6084_v2  ;;  %v5783_v31 = vor.u32 %v7558_v28, %v5780_v29  ;;  %v5876_v49 = vld [vmem:[#allocation8 + $0x538] sm:$0xf0]  ;;  %v7702_v23 = vld [vmem:[#allocation8 + $0x8ec] sm:$0xf] }
 0x218   :  { %4467 = vmatpush.bf16.msra.mxu2 %v5479_v37  ;;  %v5767_v37 = vor.u32 %v7554_v38, %v5764_v55  ;;  %v7734_v28 = vld [vmem:[#allocation8 + $0x9ec] sm:$0xf]  ;;  %v6484_v29 = vld [vmem:[#allocation8 + $0x9f8] sm:$0xf0] }
 0x219   :  { %4487 = vmatpush.bf16.msrb.mxu0 %v5831_v54  ;;  %4480 = vmatpush.bf16.msra.mxu3 %v5607_v50  ;;  %v5911_v54 = vor.u32 %v7590_v30, %v5908_v33  ;;  %v7698_v40 = vld [vmem:[#allocation8 + $0x8cc] sm:$0xf]  ;;  %v6340_v38 = vld [vmem:[#allocation8 + $0x8d8] sm:$0xf0] }
 0x21a   :  { %4500 = vmatpush.bf16.msrb.mxu1 %v5959_v58  ;;  %v7586_v58 = vld [vmem:[#allocation8 + $0x54c] sm:$0xf] }
 0x21b   :  { %4468 = vmatmul.bf16.vlgmr.msra.gmra.mxu2 %v8325_v52  ;;  %v6052_v52 = vld [vmem:[#allocation8 + $0x698] sm:$0xf0]  ;;  %v5895_v50 = vor.u32 %v7586_v58, %v5892_v41  ;;  %v7730_v41 = vld [vmem:[#allocation8 + $0x9cc] sm:$0xf] }
 0x21c   :  { %4512 = vmatpush.bf16.msrb.mxu2 %v6103_v4  ;;  %4481 = vmatmul.bf16.vlgmr.msra.gmra.mxu3 %v8329_v57  ;;  %v4249_v57 = vadd.f32 %v4248_v48, %v4236_v45  ;;  %v6055_v60 = vor.u32 %v7626_v44, %v6052_v52  ;;  %v6164_v4 = vld [vmem:[#allocation8 + $0x778] sm:$0xf0]  ;;  %v4237_v2 = vpop.f32.mrf.mxu0  ;;  %v4250_v11 = vpop.f32.mrf.mxu1  ;;  %v7646_v52 = vld [vmem:[#allocation8 + $0x72c] sm:$0xf] }
 0x21d   :  { %4525 = vmatpush.bf16.msrb.mxu3 %v6231_v59  ;;  %4488 = vmatpush.bf16.msrb.mxu0 %v5815_v6  ;;  %v5748_v59 = vld [vmem:[#allocation8 + $0x438] sm:$0xf0]  ;;  %v7582_v6 = vld [vmem:[#allocation8 + $0x52c] sm:$0xf]  ;;  %v6167_v9 = vor.u32 %v7654_v47, %v6164_v4  ;;  %v6343_v47 = vor.u32 %v7698_v40, %v6340_v38 }
 0x21e   :  { %4501 = vmatpush.bf16.msrb.mxu1 %v5943_v10  ;;  %v7618_v10 = vld [vmem:[#allocation8 + $0x64c] sm:$0xf]  ;;  %v5751_v36 = vor.u32 %v7550_v5, %v5748_v59  ;;  %v5879_v22 = vor.u32 %v7582_v6, %v5876_v49  ;;  %v4261_v30 = vpop.f32.mrf.mxu2  ;;  %v6004_v45 = vld [vmem:[#allocation8 + $0x638] sm:$0xf0] }
 0x21f   :  { %v6023_v19 = vor.u32 %v7618_v10, %v6020_v17  ;;  %v4262_v48 = vadd.f32 %v4261_v30, %v4249_v57  ;;  %v5988_v57 = vld [vmem:[#allocation8 + $0x618] sm:$0xf0]  ;;  %v7642_v62 = vld [vmem:[#allocation8 + $0x70c] sm:$0xf] }
 0x220   :  { %4513 = vmatpush.bf16.msrb.mxu2 %v6087_v15  ;;  %v6148_v15 = vld [vmem:[#allocation8 + $0x758] sm:$0xf0]  ;;  %v7798_v5 = vld [vmem:[#allocation8 + $0xbec] sm:$0xf] }
 0x221   :  { %4526 = vmatpush.bf16.msrb.mxu3 %v6215_v39  ;;  %4489 = vmatpush.bf16.msrb.mxu0 %v5799_v3  ;;  %v7546_v39 = vld [vmem:[#allocation8 + $0x40c] sm:$0xf]  ;;  %v5732_v3 = vld [vmem:[#allocation8 + $0x418] sm:$0xf0]  ;;  %v6151_v33 = vor.u32 %v7650_v20, %v6148_v15 }
 0x222   :  { %4502 = vmatpush.bf16.msrb.mxu1 %v5927_v24  ;;  %v6356_v24 = vld [vmem:[#allocation8 + $0x8f8] sm:$0xf0]  ;;  %v5735_v35 = vor.u32 %v7546_v39, %v5732_v3  ;;  %v7694_v49 = vld [vmem:[#allocation8 + $0x8ac] sm:$0xf] }
 0x223   :  { %v6359_v44 = vor.u32 %v7702_v23, %v6356_v24  ;;  %v6612_v4 = vld [vmem:[#allocation8 + $0xaf8] sm:$0xf0]  ;;  %v7726_v10 = vld [vmem:[#allocation8 + $0x9ac] sm:$0xf] }
 0x224   :  { %4514 = vmatpush.bf16.msrb.mxu2 %v6071_v18  ;;  %v7614_v18 = vld [vmem:[#allocation8 + $0x62c] sm:$0xf]  ;;  %v6740_v6 = vld [vmem:[#allocation8 + $0xbf8] sm:$0xf0] }
 0x225   :  { %4527 = vmatpush.bf16.msrb.mxu3 %v6199_v53  ;;  %4490 = vmatpush.bf16.msrb.mxu0 %v5783_v31  ;;  %v4274_v53 = vpop.f32.mrf.mxu3  ;;  %v5863_v31 = vor.u32 %v7578_v16, %v5860_v12  ;;  %v6007_v58 = vor.u32 %v7614_v18, %v6004_v45  ;;  %v6324_v2 = vld [vmem:[#allocation8 + $0x8b8] sm:$0xf0]  ;;  %v6743_v15 = vor.u32 %v7798_v5, %v6740_v6  ;;  %v7762_v39 = vld [vmem:[#allocation8 + $0xacc] sm:$0xf] }
 0x226   :  { %4503 = vmatpush.bf16.msrb.mxu1 %v5911_v54  ;;  %v6487_v54 = vor.u32 %v7734_v28, %v6484_v29  ;;  %v8477_v55 = vadd.f32 %v4274_v53, %v4262_v48  ;;  %v6452_v11 = vld [vmem:[#allocation8 + $0x9b8] sm:$0xf0]  ;;  %v7794_v16 = vld [vmem:[#allocation8 + $0xbcc] sm:$0xf] }
 0x227   :  { %v6596_v3 = vld [vmem:[#allocation8 + $0xad8] sm:$0xf0]  ;;  %v6455_v12 = vor.u32 %v7726_v10, %v6452_v11  ;;  %v7790_v18 = vld [vmem:[#allocation8 + $0xbac] sm:$0xf] }
 0x228   :  { %4515 = vmatpush.bf16.msrb.mxu2 %v6055_v60  ;;  %v6468_v60 = vld [vmem:[#allocation8 + $0x9d8] sm:$0xf0]  ;;  %v7686_v53 = vld [vmem:[#allocation8 + $0x86c] sm:$0xf] }
 0x229   :  { %4528 = vmatpush.bf16.msrb.mxu3 %v6183_v61  ;;  %4491 = vmatpush.bf16.msrb.mxu0 %v5767_v37  ;;  %v7610_v61 = vld [vmem:[#allocation8 + $0x60c] sm:$0xf]  ;;  %v6135_v37 = vor.u32 %v7646_v52, %v6132_v42  ;;  %v6471_v59 = vor.u32 %v7730_v41, %v6468_v60  ;;  %v6724_v23 = vld [vmem:[#allocation8 + $0xbd8] sm:$0xf0] }
 0x22a   :  { %4504 = vmatpush.bf16.msrb.mxu1 %v5895_v50  ;;  %v7766_v50 = vld [vmem:[#allocation8 + $0xaec] sm:$0xf]  ;;  %v6308_v24 = vld [vmem:[#allocation8 + $0x898] sm:$0xf0]  ;;  %v6727_v29 = vor.u32 %v7794_v16, %v6724_v23 }
 0x22b   :  { %v6615_v17 = vor.u32 %v7766_v50, %v6612_v4  ;;  %v6436_v28 = vld [vmem:[#allocation8 + $0x998] sm:$0xf0]  ;;  %v7786_v60 = vld [vmem:[#allocation8 + $0xb8c] sm:$0xf] }
 0x22c   :  { %4516 = vmatpush.bf16.msrb.mxu2 %v6039_v8  ;;  %v5991_v8 = vor.u32 %v7610_v61, %v5988_v57  ;;  %v6708_v48 = vld [vmem:[#allocation8 + $0xbb8] sm:$0xf0]  ;;  %v7682_v57 = vld [vmem:[#allocation8 + $0x84c] sm:$0xf] }
 0x22d   :  { %4529 = vmatpush.bf16.msrb.mxu3 %v6167_v9  ;;  %4492 = vmatpush.bf16.msrb.mxu0 %v5751_v36  ;;  %v4263_v9 = vpop.f32.mrf.mxu2  ;;  %v6119_v36 = vor.u32 %v7642_v62, %v6116_v1  ;;  %v4276_v20 = vpop.f32.mrf.mxu3  ;;  %v6420_v52 = vld [vmem:[#allocation8 + $0x978] sm:$0xf0]  ;;  %v6711_v38 = vor.u32 %v7790_v18, %v6708_v48  ;;  %v7714_v62 = vld [vmem:[#allocation8 + $0x94c] sm:$0xf] }
 0x22e   :  { %4505 = vmatpush.bf16.msrb.mxu1 %v5879_v22  ;;  %v6327_v22 = vor.u32 %v7694_v49, %v6324_v2  ;;  %v6564_v41 = vld [vmem:[#allocation8 + $0xa98] sm:$0xf0]  ;;  %v7750_v5 = vld [vmem:[#allocation8 + $0xa6c] sm:$0xf] }
 0x22f   :  { %v6404_v1 = vld [vmem:[#allocation8 + $0x958] sm:$0xf0]  ;;  %v7782_v6 = vld [vmem:[#allocation8 + $0xb6c] sm:$0xf] }
 0x230   :  { %4517 = vmatpush.bf16.msrb.mxu2 %v6023_v19  ;;  %v7722_v19 = vld [vmem:[#allocation8 + $0x98c] sm:$0xf]  ;;  %v6407_v49 = vor.u32 %v7714_v62, %v6404_v1  ;;  %v6676_v2 = vld [vmem:[#allocation8 + $0xb78] sm:$0xf0] }
 0x231   :  { %4530 = vmatpush.bf16.msrb.mxu3 %v6151_v33  ;;  %4493 = vmatpush.bf16.msrb.mxu0 %v5735_v35  ;;  %v7758_v33 = vld [vmem:[#allocation8 + $0xaac] sm:$0xf]  ;;  %v6580_v35 = vld [vmem:[#allocation8 + $0xab8] sm:$0xf0]  ;;  %v6439_v45 = vor.u32 %v7722_v19, %v6436_v28  ;;  %v8483_v42 = vpop.f32.mrf.mxu0 }
 0x232   :  { %4506 = vmatpush.bf16.msrb.mxu1 %v5863_v31  ;;  %v6292_v31 = vld [vmem:[#allocation8 + $0x878] sm:$0xf0]  ;;  %v7710_v11 = vld [vmem:[#allocation8 + $0x92c] sm:$0xf] }
 0x233   :  { %v6260_v10 = vld [vmem:[#allocation8 + $0x838] sm:$0xf0]  ;;  %v7746_v20 = vld [vmem:[#allocation8 + $0xa4c] sm:$0xf] }
 0x234   :  { %4518 = vmatpush.bf16.msrb.mxu2 %v6007_v58  ;;  %4494 = vmatmul.bf16.vlgmr.msrb.gmra.mxu0 %v8346_v46  ;;  %v7690_v46 = vld [vmem:[#allocation8 + $0x88c] sm:$0xf]  ;;  %v8485_v40 = vpop.f32.mrf.mxu1  ;;  %v6295_v58 = vor.u32 %v7686_v53, %v6292_v31  ;;  %v6388_v9 = vld [vmem:[#allocation8 + $0x938] sm:$0xf0] }
 0x235   :  { %4538 = vmatpush.bf16.msra.mxu0 %v6359_v44  ;;  %4531 = vmatpush.bf16.msrb.mxu3 %v6135_v37  ;;  %v6311_v30 = vor.u32 %v7690_v46, %v6308_v24  ;;  %v7718_v44 = vld [vmem:[#allocation8 + $0x96c] sm:$0xf]  ;;  %v6692_v37 = vld [vmem:[#allocation8 + $0xb98] sm:$0xf0]  ;;  %v6391_v23 = vor.u32 %v7710_v11, %v6388_v9 }
 0x236   :  { %4551 = vmatpush.bf16.msra.mxu1 %v6487_v54  ;;  %v6583_v54 = vor.u32 %v7758_v33, %v6580_v35  ;;  %v6423_v61 = vor.u32 %v7718_v44, %v6420_v52  ;;  %v6695_v50 = vor.u32 %v7786_v60, %v6692_v37  ;;  %v7778_v16 = vld [vmem:[#allocation8 + $0xb4c] sm:$0xf]  ;;  %v6244_v24 = vld [vmem:[#allocation8 + $0x818] sm:$0xf0] }
 0x237   :  { %4507 = vmatmul.bf16.vlgmr.msrb.gmra.mxu1 %v8351_v51  ;;  %v6599_v51 = vor.u32 %v7762_v39, %v6596_v3  ;;  %v6532_v3 = vld [vmem:[#allocation8 + $0xa58] sm:$0xf0]  ;;  %v7674_v46 = vld [vmem:[#allocation8 + $0x80c] sm:$0xf] }
 0x238   :  { %4519 = vmatpush.bf16.msrb.mxu2 %v5991_v8  ;;  %v7678_v8 = vld [vmem:[#allocation8 + $0x82c] sm:$0xf]  ;;  %v6372_v28 = vld [vmem:[#allocation8 + $0x918] sm:$0xf0]  ;;  %v6247_v48 = vor.u32 %v7674_v46, %v6244_v24 }
 0x239   :  { %4539 = vmatpush.bf16.msra.mxu0 %v6343_v47  ;;  %4532 = vmatpush.bf16.msrb.mxu3 %v6119_v36  ;;  %v4289_v36 = vpop.f32.mrf.mxu0  ;;  %v6263_v39 = vor.u32 %v7678_v8, %v6260_v10  ;;  %v7706_v19 = vld [vmem:[#allocation8 + $0x90c] sm:$0xf]  ;;  %v6996_v35 = vld [vmem:[#allocation8 + $0xdf8] sm:$0xf0] }
 0x23a   :  { %4552 = vmatpush.bf16.msra.mxu1 %v6471_v59  ;;  %v6548_v59 = vld [vmem:[#allocation8 + $0xa78] sm:$0xf0]  ;;  %v7862_v33 = vld [vmem:[#allocation8 + $0xdec] sm:$0xf]  ;;  %v6375_v52 = vor.u32 %v7706_v19, %v6372_v28 }
 0x23b   :  { %4520 = vmatmul.bf16.vlgmr.msrb.gmra.mxu2 %v8365_v25  ;;  %v7754_v25 = vld [vmem:[#allocation8 + $0xa8c] sm:$0xf]  ;;  %v6516_v31 = vld [vmem:[#allocation8 + $0xa38] sm:$0xf0] }
 0x23c   :  { %4564 = vmatpush.bf16.msra.mxu2 %v6615_v17  ;;  %4533 = vmatmul.bf16.vlgmr.msrb.gmra.mxu3 %v8367_v32  ;;  %v6276_v32 = vld [vmem:[#allocation8 + $0x858] sm:$0xf0]  ;;  %v6567_v47 = vor.u32 %v7754_v25, %v6564_v41  ;;  %v6551_v17 = vor.u32 %v7750_v5, %v6548_v59  ;;  %v7742_v53 = vld [vmem:[#allocation8 + $0xa2c] sm:$0xf]  ;;  %v6999_v25 = vor.u32 %v7862_v33, %v6996_v35 }
 0x23d   :  { %4577 = vmatpush.bf16.msra.mxu3 %v6743_v15  ;;  %4540 = vmatpush.bf16.msra.mxu0 %v6327_v22  ;;  %v6279_v4 = vor.u32 %v7682_v57, %v6276_v32  ;;  %v4302_v15 = vpop.f32.mrf.mxu1  ;;  %v6679_v22 = vor.u32 %v7782_v6, %v6676_v2  ;;  %v7826_v41 = vld [vmem:[#allocation8 + $0xccc] sm:$0xf]  ;;  %v6852_v60 = vld [vmem:[#allocation8 + $0xcd8] sm:$0xf0] }
 0x23e   :  { %4553 = vmatpush.bf16.msra.mxu1 %v6455_v12  ;;  %v6660_v12 = vld [vmem:[#allocation8 + $0xb58] sm:$0xf0]  ;;  %v8487_v18 = vpop.f32.mrf.mxu2  ;;  %v7858_v37 = vld [vmem:[#allocation8 + $0xdcc] sm:$0xf] }
 0x23f   :  { %v8489_v44 = vpop.f32.mrf.mxu3  ;;  %v6980_v57 = vld [vmem:[#allocation8 + $0xdd8] sm:$0xf0]  ;;  %v7738_v32 = vld [vmem:[#allocation8 + $0xa0c] sm:$0xf] }
 0x240   :  { %4565 = vmatpush.bf16.msra.mxu2 %v6599_v51  ;;  %v7830_v51 = vld [vmem:[#allocation8 + $0xcec] sm:$0xf]  ;;  %v6500_v1 = vld [vmem:[#allocation8 + $0xa18] sm:$0xf0] }
 0x241   :  { %4578 = vmatpush.bf16.msra.mxu3 %v6727_v29  ;;  %4541 = vmatpush.bf16.msra.mxu0 %v6311_v30  ;;  %v6868_v29 = vld [vmem:[#allocation8 + $0xcf8] sm:$0xf0]  ;;  %v6535_v30 = vor.u32 %v7746_v20, %v6532_v3  ;;  %v7894_v5 = vld [vmem:[#allocation8 + $0xeec] sm:$0xf]  ;;  %v6503_v11 = vor.u32 %v7738_v32, %v6500_v1 }
 0x242   :  { %4554 = vmatpush.bf16.msra.mxu1 %v6439_v45  ;;  %v6663_v45 = vor.u32 %v7778_v16, %v6660_v12  ;;  %v7124_v59 = vld [vmem:[#allocation8 + $0xef8] sm:$0xf0]  ;;  %v7926_v6 = vld [vmem:[#allocation8 + $0xfec] sm:$0xf] }
 0x243   :  { %v7252_v2 = vld [vmem:[#allocation8 + $0xff8] sm:$0xf0]  ;;  %v7822_v8 = vld [vmem:[#allocation8 + $0xcac] sm:$0xf]  ;;  %v7127_v15 = vor.u32 %v7894_v5, %v7124_v59 }
 0x244   :  { %4566 = vmatpush.bf16.msra.mxu2 %v6583_v54  ;;  %v6871_v54 = vor.u32 %v7830_v51, %v6868_v29  ;;  %v6836_v10 = vld [vmem:[#allocation8 + $0xcb8] sm:$0xf0]  ;;  %v7854_v9 = vld [vmem:[#allocation8 + $0xdac] sm:$0xf] }
 0x245   :  { %4579 = vmatpush.bf16.msra.mxu3 %v6711_v38  ;;  %4542 = vmatpush.bf16.msra.mxu0 %v6295_v58  ;;  %v7774_v38 = vld [vmem:[#allocation8 + $0xb2c] sm:$0xf]  ;;  %v6644_v58 = vld [vmem:[#allocation8 + $0xb38] sm:$0xf0]  ;;  %v6839_v3 = vor.u32 %v7822_v8, %v6836_v10 }
 0x246   :  { %4555 = vmatpush.bf16.msra.mxu1 %v6423_v61  ;;  %v6519_v61 = vor.u32 %v7742_v53, %v6516_v31  ;;  %v6647_v62 = vor.u32 %v7774_v38, %v6644_v58  ;;  %v6964_v36 = vld [vmem:[#allocation8 + $0xdb8] sm:$0xf0]  ;;  %v7890_v16 = vld [vmem:[#allocation8 + $0xecc] sm:$0xf] }
 0x247   :  { %v7108_v12 = vld [vmem:[#allocation8 + $0xed8] sm:$0xf0]  ;;  %v6967_v46 = vor.u32 %v7854_v9, %v6964_v36  ;;  %v7850_v28 = vld [vmem:[#allocation8 + $0xd8c] sm:$0xf] }
 0x248   :  { %4567 = vmatpush.bf16.msra.mxu2 %v6567_v47  ;;  %v7770_v47 = vld [vmem:[#allocation8 + $0xb0c] sm:$0xf]  ;;  %v7236_v24 = vld [vmem:[#allocation8 + $0xfd8] sm:$0xf0] }
 0x249   :  { %4580 = vmatpush.bf16.msra.mxu3 %v6695_v50  ;;  %4543 = vmatpush.bf16.msra.mxu0 %v6279_v4  ;;  %v6628_v50 = vld [vmem:[#allocation8 + $0xb18] sm:$0xf0]  ;;  %v6855_v4 = vor.u32 %v7826_v41, %v6852_v60  ;;  %v7886_v33 = vld [vmem:[#allocation8 + $0xeac] sm:$0xf] }
 0x24a   :  { %4556 = vmatpush.bf16.msra.mxu1 %v6407_v49  ;;  %v6983_v49 = vor.u32 %v7858_v37, %v6980_v57  ;;  %v6631_v20 = vor.u32 %v7770_v47, %v6628_v50  ;;  %v6820_v19 = vld [vmem:[#allocation8 + $0xc98] sm:$0xf0]  ;;  %v7814_v31 = vld [vmem:[#allocation8 + $0xc6c] sm:$0xf] }
 0x24b   :  { %v6948_v51 = vld [vmem:[#allocation8 + $0xd98] sm:$0xf0]  ;;  %v7914_v57 = vld [vmem:[#allocation8 + $0xf8c] sm:$0xf] }
 0x24c   :  { %4568 = vmatpush.bf16.msra.mxu2 %v6551_v17  ;;  %v4315_v17 = vpop.f32.mrf.mxu2  ;;  %v7092_v35 = vld [vmem:[#allocation8 + $0xeb8] sm:$0xf0]  ;;  %v7810_v1 = vld [vmem:[#allocation8 + $0xc4c] sm:$0xf] }
 0x24d   :  { %4581 = vmatpush.bf16.msra.mxu3 %v6679_v22  ;;  %4544 = vmatpush.bf16.msra.mxu0 %v6263_v39  ;;  %v4328_v22 = vpop.f32.mrf.mxu3  ;;  %v7255_v39 = vor.u32 %v7926_v6, %v7252_v2  ;;  %v7220_v53 = vld [vmem:[#allocation8 + $0xfb8] sm:$0xf0]  ;;  %v7842_v47 = vld [vmem:[#allocation8 + $0xd4c] sm:$0xf] }
 0x24e   :  { %4557 = vmatpush.bf16.msra.mxu1 %v6391_v23  ;;  %v7922_v23 = vld [vmem:[#allocation8 + $0xfcc] sm:$0xf]  ;;  %v6932_v38 = vld [vmem:[#allocation8 + $0xd78] sm:$0xf0] }
 0x24f   :  { %v7239_v29 = vor.u32 %v7922_v23, %v7236_v24  ;;  %v7076_v37 = vld [vmem:[#allocation8 + $0xe98] sm:$0xf0]  ;;  %v7878_v6 = vld [vmem:[#allocation8 + $0xe6c] sm:$0xf] }
 0x250   :  { %4569 = vmatpush.bf16.msra.mxu2 %v6535_v30  ;;  %v6916_v50 = vld [vmem:[#allocation8 + $0xd58] sm:$0xf0]  ;;  %v7910_v2 = vld [vmem:[#allocation8 + $0xf6c] sm:$0xf] }
 0x251   :  { %4582 = vmatpush.bf16.msra.mxu3 %v6663_v45  ;;  %4545 = vmatpush.bf16.msra.mxu0 %v6247_v48  ;;  %v7918_v45 = vld [vmem:[#allocation8 + $0xfac] sm:$0xf]  ;;  %v6951_v48 = vor.u32 %v7850_v28, %v6948_v51  ;;  %v8495_v58 = vpop.f32.mrf.mxu0  ;;  %v6919_v8 = vor.u32 %v7842_v47, %v6916_v50  ;;  %v7188_v10 = vld [vmem:[#allocation8 + $0xf78] sm:$0xf0] }
 0x252   :  { %4558 = vmatpush.bf16.msra.mxu1 %v6375_v52  ;;  %v6804_v52 = vld [vmem:[#allocation8 + $0xc78] sm:$0xf0]  ;;  %v7223_v60 = vor.u32 %v7918_v45, %v7220_v53  ;;  %v7838_v36 = vld [vmem:[#allocation8 + $0xd2c] sm:$0xf] }
 0x253   :  { %v6772_v9 = vld [vmem:[#allocation8 + $0xc38] sm:$0xf0]  ;;  %v7906_v23 = vld [vmem:[#allocation8 + $0xf4c] sm:$0xf] }
 0x254   :  { %4570 = vmatpush.bf16.msra.mxu2 %v6519_v61  ;;  %4546 = vmatmul.bf16.vlgmr.msra.gmra.mxu0 %v8379_v27  ;;  %v7818_v27 = vld [vmem:[#allocation8 + $0xc8c] sm:$0xf]  ;;  %v8497_v41 = vpop.f32.mrf.mxu1  ;;  %v6807_v61 = vor.u32 %v7814_v31, %v6804_v52  ;;  %v6900_v17 = vld [vmem:[#allocation8 + $0xd38] sm:$0xf0] }
 0x255   :  { %4590 = vmatpush.bf16.msrb.mxu0 %v6871_v54  ;;  %4583 = vmatpush.bf16.msra.mxu3 %v6647_v62  ;;  %v6823_v30 = vor.u32 %v7818_v27, %v6820_v19  ;;  %v7846_v54 = vld [vmem:[#allocation8 + $0xd6c] sm:$0xf]  ;;  %v7204_v62 = vld [vmem:[#allocation8 + $0xf98] sm:$0xf0] }
 0x256   :  { %4603 = vmatpush.bf16.msrb.mxu1 %v6999_v25  ;;  %v7095_v25 = vor.u32 %v7886_v33, %v7092_v35  ;;  %v6935_v32 = vor.u32 %v7846_v54, %v6932_v38  ;;  %v7207_v5 = vor.u32 %v7914_v57, %v7204_v62  ;;  %v7172_v24 = vld [vmem:[#allocation8 + $0xf58] sm:$0xf0]  ;;  %v7802_v27 = vld [vmem:[#allocation8 + $0xc0c] sm:$0xf] }
 0x257   :  { %4559 = vmatmul.bf16.vlgmr.msra.gmra.mxu1 %v8382_v43  ;;  %v7111_v43 = vor.u32 %v7890_v16, %v7108_v12  ;;  %v7874_v16 = vld [vmem:[#allocation8 + $0xe4c] sm:$0xf]  ;;  %v7044_v12 = vld [vmem:[#allocation8 + $0xe58] sm:$0xf0]  ;;  %v7175_v33 = vor.u32 %v7906_v23, %v7172_v24 }
 0x258   :  { %4571 = vmatpush.bf16.msra.mxu2 %v6503_v11  ;;  %v7806_v11 = vld [vmem:[#allocation8 + $0xc2c] sm:$0xf]  ;;  %v6756_v19 = vld [vmem:[#allocation8 + $0xc18] sm:$0xf0] }
 0x259   :  { %4591 = vmatpush.bf16.msrb.mxu0 %v6855_v4  ;;  %4584 = vmatpush.bf16.msra.mxu3 %v6631_v20  ;;  %v4341_v20 = vpop.f32.mrf.mxu0  ;;  %v7834_v28 = vld [vmem:[#allocation8 + $0xd0c] sm:$0xf]  ;;  %v6884_v51 = vld [vmem:[#allocation8 + $0xd18] sm:$0xf0]  ;;  %v6759_v35 = vor.u32 %v7802_v27, %v6756_v19 }
 0x25a   :  { %4604 = vmatpush.bf16.msrb.mxu1 %v6983_v49  ;;  %v7060_v49 = vld [vmem:[#allocation8 + $0xe78] sm:$0xf0]  ;;  %v7870_v45 = vld [vmem:[#allocation8 + $0xe2c] sm:$0xf]  ;;  %v6887_v31 = vor.u32 %v7834_v28, %v6884_v51 }
 0x25b   :  { %4572 = vmatmul.bf16.vlgmr.msra.gmra.mxu2 %v8390_v13  ;;  %v7882_v13 = vld [vmem:[#allocation8 + $0xe8c] sm:$0xf]  ;;  %v7156_v38 = vld [vmem:[#allocation8 + $0xf38] sm:$0xf0] }
 0x25c   :  { %4616 = vmatpush.bf16.msrb.mxu2 %v7127_v15  ;;  %4585 = vmatmul.bf16.vlgmr.msra.gmra.mxu3 %v8392_v63  ;;  %v6788_v63 = vld [vmem:[#allocation8 + $0xc58] sm:$0xf0]  ;;  %v7079_v4 = vor.u32 %v7882_v13, %v7076_v37  ;;  %v7063_v15 = vor.u32 %v7878_v6, %v7060_v49  ;;  %v4354_v22 = vpop.f32.mrf.mxu1  ;;  %v7936_v52 = vld [vmem:[#allocation11 + $0x38] sm:$0xff]  ;;  %v7935_v37 = vld [vmem:[#allocation11 + $0x30] sm:$0xff] }
 0x25d   :  { %4629 = vmatpush.bf16.msrb.mxu3 %v7255_v39  ;;  %4592 = vmatpush.bf16.msrb.mxu0 %v6839_v3  ;;  %v6791_v59 = vor.u32 %v7810_v1, %v6788_v63  ;;  %v7191_v39 = vor.u32 %v7910_v2, %v7188_v10  ;;  %v6775_v3 = vor.u32 %v7806_v11, %v6772_v9  ;;  %v7902_v54 = vld [vmem:[#allocation8 + $0xf2c] sm:$0xf]  ;;  %v7012_v13 = vld [vmem:[#allocation8 + $0xe18] sm:$0xf0]  ;;  %v7943_v1 = vld [vmem:[#allocation11 + $0x70] sm:$0xff]  ;;  %v4642_v9 = vmax.f32 %v8440_v21, 0.0 }
 0x25e   :  { %4605 = vmatpush.bf16.msrb.mxu1 %v6967_v46  ;;  %v6903_v46 = vor.u32 %v7838_v36, %v6900_v17  ;;  %v7898_v57 = vld [vmem:[#allocation8 + $0xf0c] sm:$0xf]  ;;  %v7942_v6 = vld [vmem:[#allocation11 + $0x68] sm:$0xff]  ;;  %v7933_v49 = vld [vmem:[#allocation11 + $0x20] sm:$0xff] }
 0x25f   :  { %v8503_v53 = vpop.f32.mrf.mxu3  ;;  %v7952_v50 = vld [vmem:[#allocation11 + $0xb8] sm:$0xff]  ;;  %v7950_v10 = vld [vmem:[#allocation11 + $0xa8] sm:$0xff]  ;;  %v7931_v22 = vld [vmem:[#allocation11 + $0x10] sm:$0xff] }
 0x260   :  { %4617 = vmatpush.bf16.msrb.mxu2 %v7111_v43  ;;  %v7047_v43 = vor.u32 %v7874_v16, %v7044_v12  ;;  %v8512_v2 = vld [vmem:[#allocation10 + $0x1] ss:$4 sm:$0xf]  ;;  %v8519_v20 = vld [vmem:[#allocation10 + $0x2] ss:$4 sm:$0xf] }
 0x261   :  { %4630 = vmatpush.bf16.msrb.mxu3 %v7239_v29  ;;  %4593 = vmatpush.bf16.msrb.mxu0 %v6823_v30  ;;  %v4288_v29 = vadd.f32 %v8483_v42, %v8477_v55  ;;  %v8501_v30 = vpop.f32.mrf.mxu2  ;;  %v7159_v42 = vor.u32 %v7902_v54, %v7156_v38  ;;  %v4649_v36 = vperm.slane %v8512_v2, 0  ;;  %v7940_v17 = vld [vmem:[#allocation11 + $0x58] sm:$0xff]  ;;  %v7939_v16 = vld [vmem:[#allocation11 + $0x50] sm:$0xff]  ;;  %v4665_v23 = vperm.slane %v8519_v20, 1  ;;  %v7930_v19 = vld [vmem:[#allocation11 + $0x8] sm:$0xff] }
 0x262   :  { %4606 = vmatpush.bf16.msrb.mxu1 %v6951_v48  ;;  %v7028_v48 = vld [vmem:[#allocation8 + $0xe38] sm:$0xf0]  ;;  %v4651_v38 = vperm.slane %v8512_v2, 2 }
 0x263   :  { %v4301_v55 = vadd.f32 %v8485_v40, %v4288_v29  ;;  %v7938_v51 = vld [vmem:[#allocation11 + $0x48] sm:$0xff] }
 0x264   :  { %4618 = vmatpush.bf16.msrb.mxu2 %v7095_v25  ;;  %v7944_v25 = vld [vmem:[#allocation11 + $0x78] sm:$0xff] }
 0x265   :  { %4631 = vmatpush.bf16.msrb.mxu3 %v7223_v60  ;;  %4594 = vmatpush.bf16.msrb.mxu0 %v6807_v61  ;;  %v7031_v60 = vor.u32 %v7870_v45, %v7028_v48  ;;  %v7866_v61 = vld [vmem:[#allocation8 + $0xe0c] sm:$0xf]  ;;  %v4314_v62 = vadd.f32 %v8487_v18, %v4301_v55 }
 0x266   :  { %4607 = vmatpush.bf16.msrb.mxu1 %v6935_v32  ;;  %v7140_v32 = vld [vmem:[#allocation8 + $0xf18] sm:$0xf0]  ;;  %v7015_v63 = vor.u32 %v7866_v61, %v7012_v13 }
 0x267   :  { %v7143_v47 = vor.u32 %v7898_v57, %v7140_v32 }
 0x268   :  { %4619 = vmatpush.bf16.msrb.mxu2 %v7079_v4  ;;  %v4380_v4 = vpop.f32.mrf.mxu3 }
 0x269   :  { %4632 = vmatpush.bf16.msrb.mxu3 %v7207_v5  ;;  %4595 = vmatpush.bf16.msrb.mxu0 %v6791_v59  ;;  %v4367_v40 = vpop.f32.mrf.mxu2  ;;  %v7934_v5 = vld [vmem:[#allocation11 + $0x28] sm:$0xff]  ;;  %v4327_v59 = vadd.f32 %v8489_v44, %v4314_v62 }
 0x26a   :  { %4608 = vmatpush.bf16.msrb.mxu1 %v6919_v8  ;;  %v1245_v40 = vperm.slane %v8472_v0, 3  ;;  %v7960_v0 = vld [vmem:[#allocation11 + $0xf8] sm:$0xff] }
 0x26b   :  { %v4340_v18 = vadd.f32 %v8495_v58, %v4327_v59  ;;  %v7932_v58 = vld [vmem:[#allocation11 + $0x18] sm:$0xff] }
 0x26c   :  { %4620 = vmatpush.bf16.msrb.mxu2 %v7063_v15  ;;  %v7949_v15 = vld [vmem:[#allocation11 + $0xa0] sm:$0xff] }
 0x26d   :  { %4633 = vmatpush.bf16.msrb.mxu3 %v7191_v39  ;;  %4596 = vmatpush.bf16.msrb.mxu0 %v6775_v3  ;;  %v4353_v44 = vadd.f32 %v8497_v41, %v4340_v18  ;;  %v4650_v41 = vperm.slane %v8512_v2, 1  ;;  %v4657_v39 = vmul.f32 %v4649_v36, %v4642_v9  ;;  %v4664_v3 = vperm.slane %v8519_v20, 0 }
 0x26e   :  { %4609 = vmatpush.bf16.msrb.mxu1 %v6903_v46 }
 0x26f   :  { %v4672_v28 = vadd.f32 %v4664_v3, %v4657_v39  ;;  %v7957_v3 = vld [vmem:[#allocation11 + $0xe0] sm:$0xff] }
 0x270   :  { %4621 = vmatpush.bf16.msrb.mxu2 %v7047_v43 }
 0x271   :  { %4634 = vmatpush.bf16.msrb.mxu3 %v7175_v33  ;;  %4597 = vmatpush.bf16.msrb.mxu0 %v6759_v35  ;;  %v4391_v8 = vpop.f32.mrf.mxu0  ;;  %v7929_v35 = vld [vmem:[#allocation11] sm:$0xff]  ;;  %v4676_v45 = vmax.f32 %v4672_v28, 0.0 }
 0x272   :  { %4610 = vmatpush.bf16.msrb.mxu1 %v6887_v31  ;;  %v7937_v31 = vld [vmem:[#allocation11 + $0x40] sm:$0xff] }
 0x274   :  { %4622 = vmatpush.bf16.msrb.mxu2 %v7031_v60  ;;  %4598 = vmatmul.bf16.vlgmr.msrb.gmra.mxu0 %v8406_v7  ;;  %v7951_v7 = vld [vmem:[#allocation11 + $0xb0] sm:$0xff]  ;;  %v4404_v11 = vpop.f32.mrf.mxu1  ;;  %v4680_v60 = vpack.c.bf16 %v4676_v45, %v4676_v45 }
 0x275   :  { %4942 = vmatpush.bf16.msra.mxu0 %v7936_v52  ;;  %4635 = vmatpush.bf16.msrb.mxu3 %v7159_v42  ;;  %v4666_v42 = vperm.slane %v8519_v20, 2 }
 0x276   :  { %4955 = vmatpush.bf16.msra.mxu1 %v7944_v25  ;;  %v7946_v25 = vld [vmem:[#allocation11 + $0x88] sm:$0xff] }
 0x277   :  { %4611 = vmatmul.bf16.vlgmr.msrb.gmra.mxu1 %v8408_v14  ;;  %v7941_v14 = vld [vmem:[#allocation11 + $0x60] sm:$0xff] }
 0x278   :  { %4623 = vmatpush.bf16.msrb.mxu2 %v7015_v63 }
 0x279   :  { %4943 = vmatpush.bf16.msra.mxu0 %v7935_v37  ;;  %4636 = vmatpush.bf16.msrb.mxu3 %v7143_v47  ;;  %v4393_v24 = vpop.f32.mrf.mxu0  ;;  %v7945_v37 = vld [vmem:[#allocation11 + $0x80] sm:$0xff] }
 0x27a   :  { %4956 = vmatpush.bf16.msra.mxu1 %v7943_v1  ;;  %v7955_v24 = vld [vmem:[#allocation11 + $0xd0] sm:$0xff] }
 0x27b   :  { %4624 = vmatmul.bf16.vlgmr.msrb.gmra.mxu2 %v8412_v26  ;;  %v4366_v26 = vadd.f32 %v8501_v30, %v4353_v44  ;;  %v7947_v30 = vld [vmem:[#allocation11 + $0x90] sm:$0xff] }
 0x27c   :  { %4968 = vmatpush.bf16.msra.mxu2 %v7952_v50  ;;  %4637 = vmatmul.bf16.vlgmr.msrb.gmra.mxu3 %v8414_v56  ;;  %v4643_v56 = vmax.f32 %v8468_v34, 0.0  ;;  %v7948_v34 = vld [vmem:[#allocation11 + $0x98] sm:$0xff]  ;;  %v4406_v27 = vpop.f32.mrf.mxu1 }
 0x27d   :  { %4944 = vmatpush.bf16.msra.mxu0 %v7934_v5  ;;  %v4379_v21 = vadd.f32 %v8503_v53, %v4366_v26  ;;  %4981 = vmatpush.bf16.msra.mxu3 %v7960_v0  ;;  %v7980_v0 = vld [vmem:[#allocation13 + $0x3] ss:$0 sm:$0xff] }
 0x27e   :  { %4957 = vmatpush.bf16.msra.mxu1 %v7942_v6  ;;  %v4658_v12 = vmul.f32 %v4650_v41, %v4643_v56  ;;  %v4417_v33 = vpop.f32.mrf.mxu2  ;;  %v7959_v41 = vld [vmem:[#allocation11 + $0xf0] sm:$0xff] }
 0x27f   :  { %v4392_v46 = vadd.f32 %v4391_v8, %v4379_v21  ;;  %v4430_v53 = vpop.f32.mrf.mxu3 }
 0x280   :  { %4969 = vmatpush.bf16.msra.mxu2 %v7951_v7  ;;  %v4673_v43 = vadd.f32 %v4665_v23, %v4658_v12  ;;  %v7956_v12 = vld [vmem:[#allocation11 + $0xd8] sm:$0xff] }
 0x281   :  { %4945 = vmatpush.bf16.msra.mxu0 %v7933_v49  ;;  %v4405_v29 = vadd.f32 %v4404_v11, %v4392_v46  ;;  %4982 = vmatpush.bf16.msra.mxu3 %v7959_v41 }
 0x282   :  { %4958 = vmatpush.bf16.msra.mxu1 %v7941_v14  ;;  %v4677_v52 = vmax.f32 %v4673_v43, 0.0  ;;  %v7953_v43 = vld [vmem:[#allocation11 + $0xc0] sm:$0xff] }
 0x283   :  { %v4418_v48 = vadd.f32 %v4417_v33, %v4405_v29 }
 0x284   :  { %4970 = vmatpush.bf16.msra.mxu2 %v7950_v10  ;;  %v4681_v61 = vpack.c.bf16 %v4677_v52, %v4677_v52 }
 0x285   :  { %4946 = vmatpush.bf16.msra.mxu0 %v7932_v58  ;;  %v4431_v54 = vadd.f32 %v4430_v53, %v4418_v48 }
 0x286   :  { %4959 = vmatpush.bf16.msra.mxu1 %v7940_v17  ;;  %v4419_v57 = vpop.f32.mrf.mxu2 }
 0x287   :  { %v4644_v55 = vmax.f32 %v4431_v54, 0.0  ;;  %v4432_v62 = vpop.f32.mrf.mxu3  ;;  %v4667_v57 = vperm.slane %v8519_v20, 3 }
 0x288   :  { %4971 = vmatpush.bf16.msra.mxu2 %v7949_v15 }
 0x289   :  { %4947 = vmatpush.bf16.msra.mxu0 %v7931_v22  ;;  %v4659_v13 = vmul.f32 %v4651_v38, %v4644_v55  ;;  %v7958_v22 = vld [vmem:[#allocation11 + $0xe8] sm:$0xff] }
 0x28a   :  { %4960 = vmatpush.bf16.msra.mxu1 %v7939_v16  ;;  %4983 = vmatpush.bf16.msra.mxu3 %v7958_v22 }
 0x28b   :  { %v4674_v32 = vadd.f32 %v4666_v42, %v4659_v13  ;;  %v4652_v13 = vperm.slane %v8512_v2, 3 }
 0x28c   :  { %4972 = vmatpush.bf16.msra.mxu2 %v7948_v34 }
 0x28d   :  { %4948 = vmatpush.bf16.msra.mxu0 %v7930_v19  ;;  %v4678_v1 = vmax.f32 %v4674_v32, 0.0  ;;  %v7954_v19 = vld [vmem:[#allocation11 + $0xc8] sm:$0xff]  ;;  %v5007_v32 = vld [vmem:[#allocation13 + $0x4] sm:$0x1] }
 0x28e   :  { %4961 = vmatpush.bf16.msra.mxu1 %v7938_v51  ;;  %4984 = vmatpush.bf16.msra.mxu3 %v7957_v3 }
 0x28f   :  { %v4682_v63 = vpack.c.bf16 %v4678_v1, %v4678_v1  ;;  %v8200_v1 = vmov 0  }
 0x290   :  { %4973 = vmatpush.bf16.msra.mxu2 %v7947_v30  ;;  %7975 = vset.pattern.permute.xlu0 %v8200_v1 }
 0x291   :  { %4949 = vmatpush.bf16.msra.mxu0 %v7929_v35  ;;  %v4443_v47 = vpop.f32.mrf.mxu0  ;;  %7976 = vset.pattern.permute.xlu1 %v8200_v1 }
 0x292   :  { %4962 = vmatpush.bf16.msra.mxu1 %v7937_v31  ;;  %v4444_v50 = vadd.f32 %v4443_v47, %v1245_v40  ;;  %4985 = vmatpush.bf16.msra.mxu3 %v7956_v12 }
 0x293   :  { %5010 = vperm.xlu0 %7975, %v5007_v32  }
 0x294   :  { %4950 = vmatmul.bf16.vlgmr.msra.gmra.mxu0 %v4680_v60  ;;  %4974 = vmatpush.bf16.msra.mxu2 %v7946_v25  ;;  %v4456_v4 = vpop.f32.mrf.mxu1 }
 0x295   :  { %4963 = vmatmul.bf16.vlgmr.msra.gmra.mxu1 %v4681_v61  ;;  %v4457_v5 = vadd.f32 %v4456_v4, %v4444_v50 }
 0x296   :  { %4986 = vmatpush.bf16.msra.mxu3 %v7955_v24 }
 0x298   :  { %4975 = vmatpush.bf16.msra.mxu2 %v7945_v37 }
 0x299   :  { %v4445_v59 = vpop.f32.mrf.mxu0 }
 0x29a   :  { %4987 = vmatpush.bf16.msra.mxu3 %v7954_v19 }
 0x29b   :  { %4976 = vmatmul.bf16.vlgmr.msra.gmra.mxu2 %v4682_v63 }
 0x29c   :  { %v4458_v6 = vpop.f32.mrf.mxu1 }
 0x29e   :  { %v4469_v18 = vpop.f32.mrf.mxu2  ;;  %4988 = vmatpush.bf16.msra.mxu3 %v7953_v43 }
 0x29f   :  { %v4470_v7 = vadd.f32 %v4469_v18, %v4457_v5  ;;  %v4482_v49 = vpop.f32.mrf.mxu3  ;;  %v7977_v5 = vld [vmem:[#allocation13] ss:$0 sm:$0xff] }
 0x2a1   :  { %v4483_v14 = vadd.f32 %v4482_v49, %v4470_v7 }
 0x2a6   :  { %v4471_v44 = vpop.f32.mrf.mxu2 }
 0x2a7   :  { %v4484_v8 = vpop.f32.mrf.mxu3 }
 0x2b1   :  { %v4495_v10 = vpop.f32.mrf.mxu0 }
 0x2b2   :  { %v4496_v23 = vadd.f32 %v4495_v10, %v4483_v14 }
 0x2b4   :  { %v4508_v11 = vpop.f32.mrf.mxu1 }
 0x2b5   :  { %v4509_v27 = vadd.f32 %v4508_v11, %v4496_v23  ;;  %v7978_v11 = vld [vmem:[#allocation13 + $0x1] ss:$0 sm:$0xff] }
 0x2b9   :  { %v4497_v58 = vpop.f32.mrf.mxu0 }
 0x2bc   :  { %v4510_v9 = vpop.f32.mrf.mxu1 }
 0x2bd   :  { %v7979_v9 = vld [vmem:[#allocation13 + $0x2] ss:$0 sm:$0xff] }
 0x2be   :  { %v4521_v36 = vpop.f32.mrf.mxu2 }
 0x2bf   :  { %v4534_v26 = vpop.f32.mrf.mxu3  ;;  %v4522_v28 = vadd.f32 %v4521_v36, %v4509_v27 }
 0x2c1   :  { %v4535_v30 = vadd.f32 %v4534_v26, %v4522_v28 }
 0x2c6   :  { %v4523_v17 = vpop.f32.mrf.mxu2 }
 0x2c7   :  { %v4536_v56 = vpop.f32.mrf.mxu3 }
 0x2d1   :  { %v4547_v15 = vpop.f32.mrf.mxu0 }
 0x2d2   :  { %v4548_v33 = vadd.f32 %v4547_v15, %v4535_v30  ;;  %v5038_v30 = vlaneseq }
 0x2d4   :  { %v4560_v39 = vpop.f32.mrf.mxu1 }
 0x2d5   :  { %v4561_v35 = vadd.f32 %v4560_v39, %v4548_v33  ;;  %v5039_v33 = vand.u32 127, %v5038_v30 }
 0x2d9   :  { %v4549_v21 = vpop.f32.mrf.mxu0 }
 0x2dc   :  { %v4562_v16 = vpop.f32.mrf.mxu1 }
 0x2de   :  { %v4573_v46 = vpop.f32.mrf.mxu2 }
 0x2df   :  { %v4586_v34 = vpop.f32.mrf.mxu3  ;;  %v4574_v53 = vadd.f32 %v4573_v46, %v4561_v35 }
 0x2e1   :  { %v4587_v31 = vadd.f32 %v4586_v34, %v4574_v53 }
 0x2e6   :  { %v4575_v51 = vpop.f32.mrf.mxu2 }
 0x2e7   :  { %v4588_v29 = vpop.f32.mrf.mxu3 }
 0x2f1   :  { %v4599_v45 = vpop.f32.mrf.mxu0 }
 0x2f2   :  { %v4600_v52 = vadd.f32 %v4599_v45, %v4587_v31 }
 0x2f4   :  { %v4612_v48 = vpop.f32.mrf.mxu1 }
 0x2f5   :  { %v4613_v25 = vadd.f32 %v4612_v48, %v4600_v52 }
 0x2f9   :  { %v4601_v54 = vpop.f32.mrf.mxu0 }
 0x2fc   :  { %v4614_v38 = vpop.f32.mrf.mxu1 }
 0x2fe   :  { %v4625_v60 = vpop.f32.mrf.mxu2 }
 0x2ff   :  { %v4626_v55 = vadd.f32 %v4625_v60, %v4613_v25  ;;  %v4638_v42 = vpop.f32.mrf.mxu3 }
 0x301   :  { %v4639_v61 = vadd.f32 %v4638_v42, %v4626_v55 }
 0x303   :  { %v4645_v37 = vmax.f32 %v4639_v61, 0.0 }
 0x305   :  { %v4660_v62 = vmul.f32 %v4652_v13, %v4645_v37  ;;  %v5011_v15 = vpop.permute.xlu0 %5010 }
 0x306   :  { %v4627_v63 = vpop.f32.mrf.mxu2  ;;  %v5012_v22 = vperm.slane %v5011_v15, 0 }
 0x307   :  { %v4675_v40 = vadd.f32 %v4667_v57, %v4660_v62  ;;  %v4640_v47 = vpop.f32.mrf.mxu3 }
 0x309   :  { %v4679_v50 = vmax.f32 %v4675_v40, 0.0 }
 0x30b   :  { %v4683_v4 = vpack.c.bf16 %v4679_v50, %v4679_v50 }
 0x30d   :  { %4989 = vmatmul.bf16.vlgmr.msra.gmra.mxu3 %v4683_v4 }
 0x311   :  { %v4951_v59 = vpop.f32.mrf.mxu0 }
 0x312   :  { %v4952_v6 = vadd.f32 %v7977_v5, %v4951_v59  ;;  %v4964_v18 = vpop.f32.mrf.mxu1 }
 0x314   :  { %v4965_v2 = vadd.f32 %v4964_v18, %v4952_v6 }
 0x319   :  { %v4953_v7 = vpop.f32.mrf.mxu0 }
 0x31a   :  { %v4966_v49 = vpop.f32.mrf.mxu1 }
 0x31e   :  { %v4977_v20 = vpop.f32.mrf.mxu2 }
 0x31f   :  { %v4978_v14 = vadd.f32 %v4977_v20, %v4965_v2 }
 0x326   :  { %v4979_v44 = vpop.f32.mrf.mxu2 }
 0x390   :  { %v4990_v8 = vpop.f32.mrf.mxu3 }
 0x391   :  { %v4991_v10 = vadd.f32 %v4990_v8, %v4978_v14 }
 0x393   :  { %v4994_v58 = vmax.f32 %v4991_v10, 0.0 }
 0x395   :  { %v4997_v36 = vmul.f32 %v7978_v11, %v4994_v58 }
 0x397   :  { %v5000_v26 = vadd.f32 %v7979_v9, %v4997_v36 }
 0x398   :  { %v4992_v17 = vpop.f32.mrf.mxu3 }
 0x399   :  { %v5001_v56 = vmax.f32 %v5000_v26, 0.0 }
 0x39b   :  { %v5004_v41 = vmul.f32 %v7980_v0, %v5001_v56 }
 0x39d   :  { %5005 = vadd.xlane.f32.xlu0 %v5004_v41 }
 0x410   :  { %v5006_v39 = vpop.xlane.xlu0 %5005 }
 0x411   :  { %v5014_v3 = vadd.f32 %v5012_v22, %v5006_v39 }
 0x413   :  { %v7384_v21 = vmul.f32 -1.442695, %v5014_v3 }
 0x415   :  { %7981 = vpow2.f32 %v7384_v21 }
 0x41b   :  { %v7982_v16 = vpop.eup %7981 }
 0x41c   :  { %v5018_v12 = vadd.f32 1.0, %v7982_v16 }
 0x41e   :  { %7983 = vrcp.f32 %v5018_v12  ;;  %v5030_v34 = vand.u32 2147483648, %v5018_v12  ;;  %v5028_v19 = vand.u32 2147483647, %v5018_v12  ;;  %vm5024_vm2 = vweird.f32 %v5018_v12 }
 0x420   :  { %v5031_v51 = vor.u32 1.1754944e-38, %v5030_v34  ;;  %vm5029_vm4 = vcmp.eq.f32.partialorder %v5028_v19, 8.507059e+37 }
 0x424   :  { %v7984_v23 = vpop.eup %7983 }
 0x425   :  { %v5020_v46 = vmul.f32 %v7984_v23, %v5018_v12  ;;  %vm5025_vm1 = vweird.f32 %v7984_v23 }
 0x426   :  { %vm5026_vm3 = vmor %vm5024_vm2, %vm5025_vm1 }
 0x427   :  { %v5021_v24 = vsub.f32 1.0, %v5020_v46 }
 0x429   :  { %v5022_v27 = vmul.f32 %v7984_v23, %v5021_v24 }
 0x42b   :  { %v5023_v28 = vadd.f32 %v7984_v23, %v5022_v27 }
 0x42d   :  { %v5027_v43 = vsel %vm5026_vm3, %v7984_v23, %v5023_v28 }
 0x42e   :  { %v5032_v29 = vsel %vm5029_vm4, %v5031_v51, %v5027_v43 }
 0x42f   :  { %5036 = vperm.xlu1 %7976, %v5032_v29  }
 0x4a1   :  { %v5037_v35 = vpop.permute.xlu1 %5036 }
 0x4a2   :  { %v5040_v45 = vperm.slane %v5037_v35, %v5039_v33 }
 0x4a4   :  { %5043 = vst.msk [vmem:[#allocation14] sm:$0x1] %vm5042_vm5, %v5040_v45 }
 0x4a5   :  { %5054 = dma.vmem_to_hbm [thread:$0]  %s5050_s6, 16, %s5052_s1, [#allocation4]  }
 0x4a6   :  { %8186 = dma.done.wait [#allocation4], 16  }
 0x4a7   :  { %8187 = vsyncadd [#allocation4], 4294967280 }
 0x4a8   :  { %5059 = vsyncpa [#allocation3], 1 }
 0x4a9   :  { %5060 = vsyncpa [#allocation6], 1 }
 0x4aa   :  { %5061 = vsyncpa [#allocation9], 1 }
 0x4ab   :  { %5062 = vsyncpa [#allocation12], 1 }
 0x4ac   :  { %5063 = vsyncpa [#allocation4], 1 }

</bundles_post_ra>
